<compile_context>
chip_gen: v6e
topology: v6e:2x2x1
jax: 0.10.0
libtpu: 0.0.40
codegen_flags: <defaults>
</compile_context>

<pallas_src>
import functools

import jax
import jax.numpy as jnp
import numpy as np
from jax import lax
from jax.experimental import pallas as pl
from jax.experimental.pallas import tpu as pltpu


def _round_up(x, m):
    return (x + m - 1) // m * m


# ----------------------------------------------------------------------------
# Kernel 1: down path -- Conv2d(k=4, s=2, p=1, bias=False) on LeakyReLU(x),
# with the up-path ReLU fused into the epilogue.  Implicit GEMM over 16 taps.
# ----------------------------------------------------------------------------
def _down_kernel(a_ref, w_ref, r_ref, *, oh, ow):
    # a_ref: (4, 1, oh+1, ow+1, cin_p) bf16  parity slabs of padded LeakyReLU(x)
    # w_ref: (4, 2, 2, cin_p, icp)     bf16  per-(parity, tap) weights
    # r_ref: (1, oh, ow, icp)          bf16  relu(conv(x))
    icp = r_ref.shape[-1]
    acc = jnp.zeros((oh * ow, icp), jnp.float32)
    for s in range(4):            # input parity phase s = rh*2 + rw
        for qh in range(2):       # tap row offset inside the slab
            for qw in range(2):   # tap col offset inside the slab
                win = a_ref[s, 0, qh:qh + oh, qw:qw + ow, :]
                win = win.reshape(oh * ow, win.shape[-1])
                acc = acc + jnp.dot(win, w_ref[s, qh, qw],
                                    preferred_element_type=jnp.float32)
    r = jnp.maximum(acc, 0.0)                       # fused up-path ReLU
    r_ref[...] = r.reshape(1, oh, ow, icp).astype(r_ref.dtype)


# ----------------------------------------------------------------------------
# Kernel 2: up path -- ConvTranspose2d(k=4, s=2, p=1, bias=False) on relu(d),
# decomposed into 4 output sub-pixel phases x 4 taps, with per-batch BN
# partial statistics emitted from the f32 accumulators.
# ----------------------------------------------------------------------------
def _up_kernel(rp_ref, w_ref, u_ref, s_ref, ss_ref, *, oh, ow):
    # rp_ref: (1, oh+2, ow+2, icp) bf16   padded relu(d)
    # w_ref:  (4, 2, 2, icp, ocp)  bf16   per-(phase, tap) weights
    # u_ref:  (1, 4, oh, ow, ocp)  bf16   phase-major conv-transpose output
    # s_ref/ss_ref: (1, 1, ocp) f32       per-batch partial sum / sum-of-squares
    ocp = u_ref.shape[-1]
    psum = jnp.zeros((1, ocp), jnp.float32)
    psumsq = jnp.zeros((1, ocp), jnp.float32)
    for p, (ry, rx) in enumerate(((0, 0), (0, 1), (1, 0), (1, 1))):
        acc = jnp.zeros((oh * ow, ocp), jnp.float32)
        for jy in range(2):
            for jx in range(2):
                dy, dx = ry + jy, rx + jx
                win = rp_ref[0, dy:dy + oh, dx:dx + ow, :]
                win = win.reshape(oh * ow, win.shape[-1])
                acc = acc + jnp.dot(win, w_ref[p, jy, jx],
                                    preferred_element_type=jnp.float32)
        u_ref[0, p] = acc.reshape(oh, ow, ocp).astype(u_ref.dtype)
        psum = psum + jnp.sum(acc, axis=0, keepdims=True)
        psumsq = psumsq + jnp.sum(acc * acc, axis=0, keepdims=True)
    s_ref[...] = psum.reshape(1, 1, ocp)
    ss_ref[...] = psumsq.reshape(1, 1, ocp)


# ----------------------------------------------------------------------------
# Kernel 3: BatchNorm affine normalization (scale/shift from fused statistics).
# ----------------------------------------------------------------------------
def _bn_norm_kernel(u_ref, sc_ref, sh_ref, o_ref):
    u = u_ref[...].astype(jnp.float32)
    o_ref[...] = u * sc_ref[...] + sh_ref[...]


# ----------------------------------------------------------------------------
# pallas_call wrappers
# ----------------------------------------------------------------------------
def _down_conv(ar, wd_r, oh, ow, icp):
    _, n, ohp, owp, cin_p = ar.shape
    return pl.pallas_call(
        functools.partial(_down_kernel, oh=oh, ow=ow),
        out_shape=jax.ShapeDtypeStruct((n, oh, ow, icp), jnp.bfloat16),
        grid=(n,),
        in_specs=[
            pl.BlockSpec((4, 1, ohp, owp, cin_p), lambda i: (0, i, 0, 0, 0)),
            pl.BlockSpec(wd_r.shape, lambda i: (0, 0, 0, 0, 0)),
        ],
        out_specs=pl.BlockSpec((1, oh, ow, icp), lambda i: (i, 0, 0, 0)),
        compiler_params=pltpu.CompilerParams(
            dimension_semantics=("parallel",)),
    )(ar, wd_r)


def _up_conv(rpad, wu_r, oh, ow, ocp):
    n, ohp, owp, icp = rpad.shape
    return pl.pallas_call(
        functools.partial(_up_kernel, oh=oh, ow=ow),
        out_shape=(
            jax.ShapeDtypeStruct((n, 4, oh, ow, ocp), jnp.bfloat16),
            jax.ShapeDtypeStruct((n, 1, ocp), jnp.float32),
            jax.ShapeDtypeStruct((n, 1, ocp), jnp.float32),
        ),
        grid=(n,),
        in_specs=[
            pl.BlockSpec((1, ohp, owp, icp), lambda i: (i, 0, 0, 0)),
            pl.BlockSpec(wu_r.shape, lambda i: (0, 0, 0, 0, 0)),
        ],
        out_specs=(
            pl.BlockSpec((1, 4, oh, ow, ocp), lambda i: (i, 0, 0, 0, 0)),
            pl.BlockSpec((1, 1, ocp), lambda i: (i, 0, 0)),
            pl.BlockSpec((1, 1, ocp), lambda i: (i, 0, 0)),
        ),
        compiler_params=pltpu.CompilerParams(
            dimension_semantics=("parallel",)),
    )(rpad, wu_r)


def _bn_normalize(u_phase, scale, shift):
    n, _, oh, ow, ocp = u_phase.shape
    return pl.pallas_call(
        _bn_norm_kernel,
        out_shape=jax.ShapeDtypeStruct((n, 4, oh, ow, ocp), jnp.float32),
        grid=(n,),
        in_specs=[
            pl.BlockSpec((1, 4, oh, ow, ocp), lambda i: (i, 0, 0, 0, 0)),
            pl.BlockSpec((1, ocp), lambda i: (0, 0)),
            pl.BlockSpec((1, ocp), lambda i: (0, 0)),
        ],
        out_specs=pl.BlockSpec((1, 4, oh, ow, ocp), lambda i: (i, 0, 0, 0, 0)),
        compiler_params=pltpu.CompilerParams(
            dimension_semantics=("parallel",)),
    )(u_phase, scale, shift)


# ----------------------------------------------------------------------------
# Forward pass of the innermost UnetSkipConnectionBlock
# ----------------------------------------------------------------------------
def unet_innermost_block(x, params):
    """x: (N, Cin, H, W) f32 NCHW (H, W even).  Returns (N, Cin+outer_nc, H, W)."""
    n, cin, h, w = x.shape
    assert h % 2 == 0 and w % 2 == 0
    wd = params["down_w"]            # (inner_nc, cin, 4, 4)      Conv2d weight
    wu = params["up_w"]              # (inner_nc, outer_nc, 4, 4) ConvTranspose2d weight
    gamma, beta = params["bn_gamma"], params["bn_beta"]
    inner_nc, outer_nc = wd.shape[0], wu.shape[1]
    oh, ow = h // 2, w // 2
    cin_p = _round_up(cin, 8)        # contraction dim, sublane friendly
    icp = _round_up(inner_nc, 128)   # lane-dense intermediate channels
    ocp = _round_up(outer_nc, 128)   # lane-dense output channels

    # ---- boundary conversion (once) + LeakyReLU(0.2) once/elem + pad + parity split
    xl = jnp.transpose(x, (0, 2, 3, 1))
    a = jnp.where(xl >= 0, xl, 0.2 * xl)
    a = jnp.pad(a, ((0, 0), (1, 1), (1, 1), (0, cin_p - cin)))
    ar = a.reshape(n, oh + 1, 2, ow + 1, 2, cin_p)
    ar = ar.transpose(2, 4, 0, 1, 3, 5).reshape(4, n, oh + 1, ow + 1, cin_p)
    ar = ar.astype(jnp.bfloat16)

    # ---- down weights -> (phase s=rh*2+rw, qh, qw, cin_p, icp), bf16
    #      tap (kh, kw) = (2*qh + rh, 2*qw + rw)
    wd_t = jnp.transpose(wd, (2, 3, 1, 0))                       # (kh, kw, cin, inner)
    wd_t = jnp.pad(wd_t, ((0, 0), (0, 0), (0, cin_p - cin), (0, icp - inner_nc)))
    wd_r = wd_t.reshape(2, 2, 2, 2, cin_p, icp)                  # (qh, rh, qw, rw, ., .)
    wd_r = wd_r.transpose(1, 3, 0, 2, 4, 5).reshape(4, 2, 2, cin_p, icp)
    wd_r = wd_r.astype(jnp.bfloat16)

    r = _down_conv(ar, wd_r, oh, ow, icp)       # (n, oh, ow, icp) = relu(down(x))

    # ---- up weights: output phase (ry, rx), tap (jy, jx) uses
    #      W[:, :, 3-2*jy-ry, 3-2*jx-rx]   (from Y = 2*ih - 1 + kh)
    wu_p = jnp.pad(wu, ((0, icp - inner_nc), (0, ocp - outer_nc), (0, 0), (0, 0)))
    phases = []
    for ry in range(2):
        for rx in range(2):
            taps = []
            for jy in range(2):
                taps.append(jnp.stack(
                    [wu_p[:, :, 3 - 2 * jy - ry, 3 - 2 * jx - rx]
                     for jx in range(2)], axis=0))
            phases.append(jnp.stack(taps, axis=0))
    wu_r = jnp.stack(phases, axis=0).astype(jnp.bfloat16)        # (4, 2, 2, icp, ocp)

    rpad = jnp.pad(r, ((0, 0), (1, 1), (1, 1), (0, 0)))
    u_phase, part_sum, part_sumsq = _up_conv(rpad, wu_r, oh, ow, ocp)

    # ---- BatchNorm2d (training-mode batch stats, eps=1e-5): scale/shift
    cnt = jnp.float32(n * h * w)
    bn_sum = jnp.sum(part_sum[:, 0, :], axis=0, keepdims=True)      # (1, ocp)
    bn_sumsq = jnp.sum(part_sumsq[:, 0, :], axis=0, keepdims=True)  # (1, ocp)
    mean = bn_sum / cnt
    var = jnp.maximum(bn_sumsq / cnt - mean * mean, 0.0)            # biased variance
    gamma_p = jnp.pad(gamma, (0, ocp - outer_nc)).reshape(1, ocp)
    beta_p = jnp.pad(beta, (0, ocp - outer_nc)).reshape(1, ocp)
    scale = (gamma_p * lax.rsqrt(var + 1e-5)).astype(jnp.float32)
    shift = (beta_p - mean * scale).astype(jnp.float32)
    # TODO(synk): running_mean/running_var buffer updates are not emitted.

    y_phase = _bn_normalize(u_phase, scale, shift)   # (n, 4, oh, ow, ocp) f32

    # ---- boundary conversion (once): phase-major channel-last -> NCHW + skip concat
    y = y_phase[..., :outer_nc].reshape(n, 2, 2, oh, ow, outer_nc)
    y = y.transpose(0, 5, 3, 1, 4, 2).reshape(n, outer_nc, h, w)
    return jnp.concatenate([x, y], axis=1)


# ----------------------------------------------------------------------------
# Pure-JAX f32 reference (mirrors the PyTorch module) for a correctness check.
# ----------------------------------------------------------------------------
def _reference(x, params):
    a = jnp.where(x >= 0, x, 0.2 * x)
    d = lax.conv_general_dilated(
        a, params["down_w"], window_strides=(2, 2), padding=((1, 1), (1, 1)),
        dimension_numbers=("NCHW", "OIHW", "NCHW"))
    r = jnp.maximum(d, 0.0)
    wt = jnp.flip(params["up_w"], (2, 3)).transpose(1, 0, 2, 3)
    u = lax.conv_general_dilated(
        r, wt, window_strides=(1, 1), padding=((2, 2), (2, 2)),
        lhs_dilation=(2, 2), dimension_numbers=("NCHW", "OIHW", "NCHW"))
    mean = u.mean(axis=(0, 2, 3), keepdims=True)
    var = jnp.mean((u - mean) ** 2, axis=(0, 2, 3), keepdims=True)
    ub = (u - mean) * lax.rsqrt(var + 1e-5)
    ub = ub * params["bn_gamma"].reshape(1, -1, 1, 1) \
         + params["bn_beta"].reshape(1, -1, 1, 1)
    return jnp.concatenate([x, ub], axis=1)


if __name__ == "__main__":
    key = jax.random.PRNGKey(0)
    n, c, h, w = 2, 4, 16, 16            # input_nc = outer_nc = 4
    outer_nc, inner_nc = c, 8

    k1, k2, k3, k4, kx = jax.random.split(key, 5)
    params = {
        "down_w": 0.05 * jax.random.normal(k1, (inner_nc, c, 4, 4), jnp.float32),
        "up_w": 0.05 * jax.random.normal(k2, (inner_nc, outer_nc, 4, 4), jnp.float32),
        "bn_gamma": 1.0 + 0.1 * jax.random.normal(k3, (outer_nc,), jnp.float32),
        "bn_beta": 0.1 * jax.random.normal(k4, (outer_nc,), jnp.float32),
    }
    x = jax.random.normal(kx, (n, c, h, w), jnp.float32)

    out = jax.jit(unet_innermost_block)(x, params)
    jax.block_until_ready(out)
    assert out.shape == (n, c + outer_nc, h, w), out.shape

    ref = _reference(x, params)
    np.testing.assert_allclose(np.asarray(out), np.asarray(ref),
                               atol=7e-2, rtol=7e-2)
    print("KERNEL_OK")
</pallas_src>

<mosaic_0001>
module attributes {stable_mosaic.version = 11 : i64} {
  func.func @_down_kernel(%arg0: i32, %arg1: memref<4x1x9x9x8xbf16, #tpu.memory_space<vmem>>, %arg2: memref<4x2x2x8x128xbf16, #tpu.memory_space<vmem>>, %arg3: memref<1x8x8x128xbf16, #tpu.memory_space<vmem>>) attributes {dimension_semantics = [#tpu.dimension_semantics<parallel>], iteration_bounds = array<i64: 2>, scalar_prefetch = 0 : i64, scratch_operands = 0 : i64, tpu.core_type = #tpu.core_type<tc>, window_params = [{transform_indices = @transform_0, window_bounds = array<i64: 4, 1, 9, 9, 8>}, {pipeline_mode = #tpu.pipeline_mode<synchronous>, transform_indices = @transform_1, window_bounds = array<i64: 4, 2, 2, 8, 128>}, {transform_indices = @transform_2, window_bounds = array<i64: 1, 8, 8, 128>}]} {
    %cst = arith.constant 0.000000e+00 : f32
    %0 = vector.broadcast %cst : f32 to vector<64x128xf32>
    %c0 = arith.constant 0 : index
    %c0_0 = arith.constant 0 : index
    %c0_1 = arith.constant 0 : index
    %c0_2 = arith.constant 0 : index
    %c0_3 = arith.constant 0 : index
    %1 = vector.load %arg1[%c0, %c0_0, %c0_1, %c0_2, %c0_3] : memref<4x1x9x9x8xbf16, #tpu.memory_space<vmem>>, vector<1x1x8x8x8xbf16>
    %2 = vector.shape_cast %1 : vector<1x1x8x8x8xbf16> to vector<8x8x8xbf16>
    %3 = vector.shape_cast %2 : vector<8x8x8xbf16> to vector<64x8xbf16>
    %c0_4 = arith.constant 0 : index
    %c0_5 = arith.constant 0 : index
    %c0_6 = arith.constant 0 : index
    %c0_7 = arith.constant 0 : index
    %c0_8 = arith.constant 0 : index
    %4 = vector.load %arg2[%c0_4, %c0_5, %c0_6, %c0_7, %c0_8] : memref<4x2x2x8x128xbf16, #tpu.memory_space<vmem>>, vector<1x1x1x8x128xbf16>
    %5 = vector.shape_cast %4 : vector<1x1x1x8x128xbf16> to vector<8x128xbf16>
    %cst_9 = arith.constant dense<0.000000e+00> : vector<64x128xf32>
    %6 = tpu.matmul %3, %5, %cst_9 {dimension_numbers = #tpu.dot_dimension_numbers<[1], [0], [0], [1], [0, 0, 1, 1], [], []>} : vector<64x8xbf16>, vector<8x128xbf16>, vector<64x128xf32> -> vector<64x128xf32>
    %7 = arith.addf %0, %6 : vector<64x128xf32>
    %c0_10 = arith.constant 0 : index
    %c0_11 = arith.constant 0 : index
    %c0_12 = arith.constant 0 : index
    %c1 = arith.constant 1 : index
    %c0_13 = arith.constant 0 : index
    %8 = vector.load %arg1[%c0_10, %c0_11, %c0_12, %c1, %c0_13] : memref<4x1x9x9x8xbf16, #tpu.memory_space<vmem>>, vector<1x1x8x8x8xbf16>
    %9 = vector.shape_cast %8 : vector<1x1x8x8x8xbf16> to vector<8x8x8xbf16>
    %10 = vector.shape_cast %9 : vector<8x8x8xbf16> to vector<64x8xbf16>
    %c0_14 = arith.constant 0 : index
    %c0_15 = arith.constant 0 : index
    %c1_16 = arith.constant 1 : index
    %c0_17 = arith.constant 0 : index
    %c0_18 = arith.constant 0 : index
    %11 = vector.load %arg2[%c0_14, %c0_15, %c1_16, %c0_17, %c0_18] : memref<4x2x2x8x128xbf16, #tpu.memory_space<vmem>>, vector<1x1x1x8x128xbf16>
    %12 = vector.shape_cast %11 : vector<1x1x1x8x128xbf16> to vector<8x128xbf16>
    %cst_19 = arith.constant dense<0.000000e+00> : vector<64x128xf32>
    %13 = tpu.matmul %10, %12, %cst_19 {dimension_numbers = #tpu.dot_dimension_numbers<[1], [0], [0], [1], [0, 0, 1, 1], [], []>} : vector<64x8xbf16>, vector<8x128xbf16>, vector<64x128xf32> -> vector<64x128xf32>
    %14 = arith.addf %7, %13 : vector<64x128xf32>
    %c0_20 = arith.constant 0 : index
    %c0_21 = arith.constant 0 : index
    %c1_22 = arith.constant 1 : index
    %c0_23 = arith.constant 0 : index
    %c0_24 = arith.constant 0 : index
    %15 = vector.load %arg1[%c0_20, %c0_21, %c1_22, %c0_23, %c0_24] : memref<4x1x9x9x8xbf16, #tpu.memory_space<vmem>>, vector<1x1x8x8x8xbf16>
    %16 = vector.shape_cast %15 : vector<1x1x8x8x8xbf16> to vector<8x8x8xbf16>
    %17 = vector.shape_cast %16 : vector<8x8x8xbf16> to vector<64x8xbf16>
    %c0_25 = arith.constant 0 : index
    %c1_26 = arith.constant 1 : index
    %c0_27 = arith.constant 0 : index
    %c0_28 = arith.constant 0 : index
    %c0_29 = arith.constant 0 : index
    %18 = vector.load %arg2[%c0_25, %c1_26, %c0_27, %c0_28, %c0_29] : memref<4x2x2x8x128xbf16, #tpu.memory_space<vmem>>, vector<1x1x1x8x128xbf16>
    %19 = vector.shape_cast %18 : vector<1x1x1x8x128xbf16> to vector<8x128xbf16>
    %cst_30 = arith.constant dense<0.000000e+00> : vector<64x128xf32>
    %20 = tpu.matmul %17, %19, %cst_30 {dimension_numbers = #tpu.dot_dimension_numbers<[1], [0], [0], [1], [0, 0, 1, 1], [], []>} : vector<64x8xbf16>, vector<8x128xbf16>, vector<64x128xf32> -> vector<64x128xf32>
    %21 = arith.addf %14, %20 : vector<64x128xf32>
    %c0_31 = arith.constant 0 : index
    %c0_32 = arith.constant 0 : index
    %c1_33 = arith.constant 1 : index
    %c1_34 = arith.constant 1 : index
    %c0_35 = arith.constant 0 : index
    %22 = vector.load %arg1[%c0_31, %c0_32, %c1_33, %c1_34, %c0_35] : memref<4x1x9x9x8xbf16, #tpu.memory_space<vmem>>, vector<1x1x8x8x8xbf16>
    %23 = vector.shape_cast %22 : vector<1x1x8x8x8xbf16> to vector<8x8x8xbf16>
    %24 = vector.shape_cast %23 : vector<8x8x8xbf16> to vector<64x8xbf16>
    %c0_36 = arith.constant 0 : index
    %c1_37 = arith.constant 1 : index
    %c1_38 = arith.constant 1 : index
    %c0_39 = arith.constant 0 : index
    %c0_40 = arith.constant 0 : index
    %25 = vector.load %arg2[%c0_36, %c1_37, %c1_38, %c0_39, %c0_40] : memref<4x2x2x8x128xbf16, #tpu.memory_space<vmem>>, vector<1x1x1x8x128xbf16>
    %26 = vector.shape_cast %25 : vector<1x1x1x8x128xbf16> to vector<8x128xbf16>
    %cst_41 = arith.constant dense<0.000000e+00> : vector<64x128xf32>
    %27 = tpu.matmul %24, %26, %cst_41 {dimension_numbers = #tpu.dot_dimension_numbers<[1], [0], [0], [1], [0, 0, 1, 1], [], []>} : vector<64x8xbf16>, vector<8x128xbf16>, vector<64x128xf32> -> vector<64x128xf32>
    %28 = arith.addf %21, %27 : vector<64x128xf32>
    %c1_42 = arith.constant 1 : index
    %c0_43 = arith.constant 0 : index
    %c0_44 = arith.constant 0 : index
    %c0_45 = arith.constant 0 : index
    %c0_46 = arith.constant 0 : index
    %29 = vector.load %arg1[%c1_42, %c0_43, %c0_44, %c0_45, %c0_46] : memref<4x1x9x9x8xbf16, #tpu.memory_space<vmem>>, vector<1x1x8x8x8xbf16>
    %30 = vector.shape_cast %29 : vector<1x1x8x8x8xbf16> to vector<8x8x8xbf16>
    %31 = vector.shape_cast %30 : vector<8x8x8xbf16> to vector<64x8xbf16>
    %c1_47 = arith.constant 1 : index
    %c0_48 = arith.constant 0 : index
    %c0_49 = arith.constant 0 : index
    %c0_50 = arith.constant 0 : index
    %c0_51 = arith.constant 0 : index
    %32 = vector.load %arg2[%c1_47, %c0_48, %c0_49, %c0_50, %c0_51] : memref<4x2x2x8x128xbf16, #tpu.memory_space<vmem>>, vector<1x1x1x8x128xbf16>
    %33 = vector.shape_cast %32 : vector<1x1x1x8x128xbf16> to vector<8x128xbf16>
    %cst_52 = arith.constant dense<0.000000e+00> : vector<64x128xf32>
    %34 = tpu.matmul %31, %33, %cst_52 {dimension_numbers = #tpu.dot_dimension_numbers<[1], [0], [0], [1], [0, 0, 1, 1], [], []>} : vector<64x8xbf16>, vector<8x128xbf16>, vector<64x128xf32> -> vector<64x128xf32>
    %35 = arith.addf %28, %34 : vector<64x128xf32>
    %c1_53 = arith.constant 1 : index
    %c0_54 = arith.constant 0 : index
    %c0_55 = arith.constant 0 : index
    %c1_56 = arith.constant 1 : index
    %c0_57 = arith.constant 0 : index
    %36 = vector.load %arg1[%c1_53, %c0_54, %c0_55, %c1_56, %c0_57] : memref<4x1x9x9x8xbf16, #tpu.memory_space<vmem>>, vector<1x1x8x8x8xbf16>
    %37 = vector.shape_cast %36 : vector<1x1x8x8x8xbf16> to vector<8x8x8xbf16>
    %38 = vector.shape_cast %37 : vector<8x8x8xbf16> to vector<64x8xbf16>
    %c1_58 = arith.constant 1 : index
    %c0_59 = arith.constant 0 : index
    %c1_60 = arith.constant 1 : index
    %c0_61 = arith.constant 0 : index
    %c0_62 = arith.constant 0 : index
    %39 = vector.load %arg2[%c1_58, %c0_59, %c1_60, %c0_61, %c0_62] : memref<4x2x2x8x128xbf16, #tpu.memory_space<vmem>>, vector<1x1x1x8x128xbf16>
    %40 = vector.shape_cast %39 : vector<1x1x1x8x128xbf16> to vector<8x128xbf16>
    %cst_63 = arith.constant dense<0.000000e+00> : vector<64x128xf32>
    %41 = tpu.matmul %38, %40, %cst_63 {dimension_numbers = #tpu.dot_dimension_numbers<[1], [0], [0], [1], [0, 0, 1, 1], [], []>} : vector<64x8xbf16>, vector<8x128xbf16>, vector<64x128xf32> -> vector<64x128xf32>
    %42 = arith.addf %35, %41 : vector<64x128xf32>
    %c1_64 = arith.constant 1 : index
    %c0_65 = arith.constant 0 : index
    %c1_66 = arith.constant 1 : index
    %c0_67 = arith.constant 0 : index
    %c0_68 = arith.constant 0 : index
    %43 = vector.load %arg1[%c1_64, %c0_65, %c1_66, %c0_67, %c0_68] : memref<4x1x9x9x8xbf16, #tpu.memory_space<vmem>>, vector<1x1x8x8x8xbf16>
    %44 = vector.shape_cast %43 : vector<1x1x8x8x8xbf16> to vector<8x8x8xbf16>
    %45 = vector.shape_cast %44 : vector<8x8x8xbf16> to vector<64x8xbf16>
    %c1_69 = arith.constant 1 : index
    %c1_70 = arith.constant 1 : index
    %c0_71 = arith.constant 0 : index
    %c0_72 = arith.constant 0 : index
    %c0_73 = arith.constant 0 : index
    %46 = vector.load %arg2[%c1_69, %c1_70, %c0_71, %c0_72, %c0_73] : memref<4x2x2x8x128xbf16, #tpu.memory_space<vmem>>, vector<1x1x1x8x128xbf16>
    %47 = vector.shape_cast %46 : vector<1x1x1x8x128xbf16> to vector<8x128xbf16>
    %cst_74 = arith.constant dense<0.000000e+00> : vector<64x128xf32>
    %48 = tpu.matmul %45, %47, %cst_74 {dimension_numbers = #tpu.dot_dimension_numbers<[1], [0], [0], [1], [0, 0, 1, 1], [], []>} : vector<64x8xbf16>, vector<8x128xbf16>, vector<64x128xf32> -> vector<64x128xf32>
    %49 = arith.addf %42, %48 : vector<64x128xf32>
    %c1_75 = arith.constant 1 : index
    %c0_76 = arith.constant 0 : index
    %c1_77 = arith.constant 1 : index
    %c1_78 = arith.constant 1 : index
    %c0_79 = arith.constant 0 : index
    %50 = vector.load %arg1[%c1_75, %c0_76, %c1_77, %c1_78, %c0_79] : memref<4x1x9x9x8xbf16, #tpu.memory_space<vmem>>, vector<1x1x8x8x8xbf16>
    %51 = vector.shape_cast %50 : vector<1x1x8x8x8xbf16> to vector<8x8x8xbf16>
    %52 = vector.shape_cast %51 : vector<8x8x8xbf16> to vector<64x8xbf16>
    %c1_80 = arith.constant 1 : index
    %c1_81 = arith.constant 1 : index
    %c1_82 = arith.constant 1 : index
    %c0_83 = arith.constant 0 : index
    %c0_84 = arith.constant 0 : index
    %53 = vector.load %arg2[%c1_80, %c1_81, %c1_82, %c0_83, %c0_84] : memref<4x2x2x8x128xbf16, #tpu.memory_space<vmem>>, vector<1x1x1x8x128xbf16>
    %54 = vector.shape_cast %53 : vector<1x1x1x8x128xbf16> to vector<8x128xbf16>
    %cst_85 = arith.constant dense<0.000000e+00> : vector<64x128xf32>
    %55 = tpu.matmul %52, %54, %cst_85 {dimension_numbers = #tpu.dot_dimension_numbers<[1], [0], [0], [1], [0, 0, 1, 1], [], []>} : vector<64x8xbf16>, vector<8x128xbf16>, vector<64x128xf32> -> vector<64x128xf32>
    %56 = arith.addf %49, %55 : vector<64x128xf32>
    %c2 = arith.constant 2 : index
    %c0_86 = arith.constant 0 : index
    %c0_87 = arith.constant 0 : index
    %c0_88 = arith.constant 0 : index
    %c0_89 = arith.constant 0 : index
    %57 = vector.load %arg1[%c2, %c0_86, %c0_87, %c0_88, %c0_89] : memref<4x1x9x9x8xbf16, #tpu.memory_space<vmem>>, vector<1x1x8x8x8xbf16>
    %58 = vector.shape_cast %57 : vector<1x1x8x8x8xbf16> to vector<8x8x8xbf16>
    %59 = vector.shape_cast %58 : vector<8x8x8xbf16> to vector<64x8xbf16>
    %c2_90 = arith.constant 2 : index
    %c0_91 = arith.constant 0 : index
    %c0_92 = arith.constant 0 : index
    %c0_93 = arith.constant 0 : index
    %c0_94 = arith.constant 0 : index
    %60 = vector.load %arg2[%c2_90, %c0_91, %c0_92, %c0_93, %c0_94] : memref<4x2x2x8x128xbf16, #tpu.memory_space<vmem>>, vector<1x1x1x8x128xbf16>
    %61 = vector.shape_cast %60 : vector<1x1x1x8x128xbf16> to vector<8x128xbf16>
    %cst_95 = arith.constant dense<0.000000e+00> : vector<64x128xf32>
    %62 = tpu.matmul %59, %61, %cst_95 {dimension_numbers = #tpu.dot_dimension_numbers<[1], [0], [0], [1], [0, 0, 1, 1], [], []>} : vector<64x8xbf16>, vector<8x128xbf16>, vector<64x128xf32> -> vector<64x128xf32>
    %63 = arith.addf %56, %62 : vector<64x128xf32>
    %c2_96 = arith.constant 2 : index
    %c0_97 = arith.constant 0 : index
    %c0_98 = arith.constant 0 : index
    %c1_99 = arith.constant 1 : index
    %c0_100 = arith.constant 0 : index
    %64 = vector.load %arg1[%c2_96, %c0_97, %c0_98, %c1_99, %c0_100] : memref<4x1x9x9x8xbf16, #tpu.memory_space<vmem>>, vector<1x1x8x8x8xbf16>
    %65 = vector.shape_cast %64 : vector<1x1x8x8x8xbf16> to vector<8x8x8xbf16>
    %66 = vector.shape_cast %65 : vector<8x8x8xbf16> to vector<64x8xbf16>
    %c2_101 = arith.constant 2 : index
    %c0_102 = arith.constant 0 : index
    %c1_103 = arith.constant 1 : index
    %c0_104 = arith.constant 0 : index
    %c0_105 = arith.constant 0 : index
    %67 = vector.load %arg2[%c2_101, %c0_102, %c1_103, %c0_104, %c0_105] : memref<4x2x2x8x128xbf16, #tpu.memory_space<vmem>>, vector<1x1x1x8x128xbf16>
    %68 = vector.shape_cast %67 : vector<1x1x1x8x128xbf16> to vector<8x128xbf16>
    %cst_106 = arith.constant dense<0.000000e+00> : vector<64x128xf32>
    %69 = tpu.matmul %66, %68, %cst_106 {dimension_numbers = #tpu.dot_dimension_numbers<[1], [0], [0], [1], [0, 0, 1, 1], [], []>} : vector<64x8xbf16>, vector<8x128xbf16>, vector<64x128xf32> -> vector<64x128xf32>
    %70 = arith.addf %63, %69 : vector<64x128xf32>
    %c2_107 = arith.constant 2 : index
    %c0_108 = arith.constant 0 : index
    %c1_109 = arith.constant 1 : index
    %c0_110 = arith.constant 0 : index
    %c0_111 = arith.constant 0 : index
    %71 = vector.load %arg1[%c2_107, %c0_108, %c1_109, %c0_110, %c0_111] : memref<4x1x9x9x8xbf16, #tpu.memory_space<vmem>>, vector<1x1x8x8x8xbf16>
    %72 = vector.shape_cast %71 : vector<1x1x8x8x8xbf16> to vector<8x8x8xbf16>
    %73 = vector.shape_cast %72 : vector<8x8x8xbf16> to vector<64x8xbf16>
    %c2_112 = arith.constant 2 : index
    %c1_113 = arith.constant 1 : index
    %c0_114 = arith.constant 0 : index
    %c0_115 = arith.constant 0 : index
    %c0_116 = arith.constant 0 : index
    %74 = vector.load %arg2[%c2_112, %c1_113, %c0_114, %c0_115, %c0_116] : memref<4x2x2x8x128xbf16, #tpu.memory_space<vmem>>, vector<1x1x1x8x128xbf16>
    %75 = vector.shape_cast %74 : vector<1x1x1x8x128xbf16> to vector<8x128xbf16>
    %cst_117 = arith.constant dense<0.000000e+00> : vector<64x128xf32>
    %76 = tpu.matmul %73, %75, %cst_117 {dimension_numbers = #tpu.dot_dimension_numbers<[1], [0], [0], [1], [0, 0, 1, 1], [], []>} : vector<64x8xbf16>, vector<8x128xbf16>, vector<64x128xf32> -> vector<64x128xf32>
    %77 = arith.addf %70, %76 : vector<64x128xf32>
    %c2_118 = arith.constant 2 : index
    %c0_119 = arith.constant 0 : index
    %c1_120 = arith.constant 1 : index
    %c1_121 = arith.constant 1 : index
    %c0_122 = arith.constant 0 : index
    %78 = vector.load %arg1[%c2_118, %c0_119, %c1_120, %c1_121, %c0_122] : memref<4x1x9x9x8xbf16, #tpu.memory_space<vmem>>, vector<1x1x8x8x8xbf16>
    %79 = vector.shape_cast %78 : vector<1x1x8x8x8xbf16> to vector<8x8x8xbf16>
    %80 = vector.shape_cast %79 : vector<8x8x8xbf16> to vector<64x8xbf16>
    %c2_123 = arith.constant 2 : index
    %c1_124 = arith.constant 1 : index
    %c1_125 = arith.constant 1 : index
    %c0_126 = arith.constant 0 : index
    %c0_127 = arith.constant 0 : index
    %81 = vector.load %arg2[%c2_123, %c1_124, %c1_125, %c0_126, %c0_127] : memref<4x2x2x8x128xbf16, #tpu.memory_space<vmem>>, vector<1x1x1x8x128xbf16>
    %82 = vector.shape_cast %81 : vector<1x1x1x8x128xbf16> to vector<8x128xbf16>
    %cst_128 = arith.constant dense<0.000000e+00> : vector<64x128xf32>
    %83 = tpu.matmul %80, %82, %cst_128 {dimension_numbers = #tpu.dot_dimension_numbers<[1], [0], [0], [1], [0, 0, 1, 1], [], []>} : vector<64x8xbf16>, vector<8x128xbf16>, vector<64x128xf32> -> vector<64x128xf32>
    %84 = arith.addf %77, %83 : vector<64x128xf32>
    %c3 = arith.constant 3 : index
    %c0_129 = arith.constant 0 : index
    %c0_130 = arith.constant 0 : index
    %c0_131 = arith.constant 0 : index
    %c0_132 = arith.constant 0 : index
    %85 = vector.load %arg1[%c3, %c0_129, %c0_130, %c0_131, %c0_132] : memref<4x1x9x9x8xbf16, #tpu.memory_space<vmem>>, vector<1x1x8x8x8xbf16>
    %86 = vector.shape_cast %85 : vector<1x1x8x8x8xbf16> to vector<8x8x8xbf16>
    %87 = vector.shape_cast %86 : vector<8x8x8xbf16> to vector<64x8xbf16>
    %c3_133 = arith.constant 3 : index
    %c0_134 = arith.constant 0 : index
    %c0_135 = arith.constant 0 : index
    %c0_136 = arith.constant 0 : index
    %c0_137 = arith.constant 0 : index
    %88 = vector.load %arg2[%c3_133, %c0_134, %c0_135, %c0_136, %c0_137] : memref<4x2x2x8x128xbf16, #tpu.memory_space<vmem>>, vector<1x1x1x8x128xbf16>
    %89 = vector.shape_cast %88 : vector<1x1x1x8x128xbf16> to vector<8x128xbf16>
    %cst_138 = arith.constant dense<0.000000e+00> : vector<64x128xf32>
    %90 = tpu.matmul %87, %89, %cst_138 {dimension_numbers = #tpu.dot_dimension_numbers<[1], [0], [0], [1], [0, 0, 1, 1], [], []>} : vector<64x8xbf16>, vector<8x128xbf16>, vector<64x128xf32> -> vector<64x128xf32>
    %91 = arith.addf %84, %90 : vector<64x128xf32>
    %c3_139 = arith.constant 3 : index
    %c0_140 = arith.constant 0 : index
    %c0_141 = arith.constant 0 : index
    %c1_142 = arith.constant 1 : index
    %c0_143 = arith.constant 0 : index
    %92 = vector.load %arg1[%c3_139, %c0_140, %c0_141, %c1_142, %c0_143] : memref<4x1x9x9x8xbf16, #tpu.memory_space<vmem>>, vector<1x1x8x8x8xbf16>
    %93 = vector.shape_cast %92 : vector<1x1x8x8x8xbf16> to vector<8x8x8xbf16>
    %94 = vector.shape_cast %93 : vector<8x8x8xbf16> to vector<64x8xbf16>
    %c3_144 = arith.constant 3 : index
    %c0_145 = arith.constant 0 : index
    %c1_146 = arith.constant 1 : index
    %c0_147 = arith.constant 0 : index
    %c0_148 = arith.constant 0 : index
    %95 = vector.load %arg2[%c3_144, %c0_145, %c1_146, %c0_147, %c0_148] : memref<4x2x2x8x128xbf16, #tpu.memory_space<vmem>>, vector<1x1x1x8x128xbf16>
    %96 = vector.shape_cast %95 : vector<1x1x1x8x128xbf16> to vector<8x128xbf16>
    %cst_149 = arith.constant dense<0.000000e+00> : vector<64x128xf32>
    %97 = tpu.matmul %94, %96, %cst_149 {dimension_numbers = #tpu.dot_dimension_numbers<[1], [0], [0], [1], [0, 0, 1, 1], [], []>} : vector<64x8xbf16>, vector<8x128xbf16>, vector<64x128xf32> -> vector<64x128xf32>
    %98 = arith.addf %91, %97 : vector<64x128xf32>
    %c3_150 = arith.constant 3 : index
    %c0_151 = arith.constant 0 : index
    %c1_152 = arith.constant 1 : index
    %c0_153 = arith.constant 0 : index
    %c0_154 = arith.constant 0 : index
    %99 = vector.load %arg1[%c3_150, %c0_151, %c1_152, %c0_153, %c0_154] : memref<4x1x9x9x8xbf16, #tpu.memory_space<vmem>>, vector<1x1x8x8x8xbf16>
    %100 = vector.shape_cast %99 : vector<1x1x8x8x8xbf16> to vector<8x8x8xbf16>
    %101 = vector.shape_cast %100 : vector<8x8x8xbf16> to vector<64x8xbf16>
    %c3_155 = arith.constant 3 : index
    %c1_156 = arith.constant 1 : index
    %c0_157 = arith.constant 0 : index
    %c0_158 = arith.constant 0 : index
    %c0_159 = arith.constant 0 : index
    %102 = vector.load %arg2[%c3_155, %c1_156, %c0_157, %c0_158, %c0_159] : memref<4x2x2x8x128xbf16, #tpu.memory_space<vmem>>, vector<1x1x1x8x128xbf16>
    %103 = vector.shape_cast %102 : vector<1x1x1x8x128xbf16> to vector<8x128xbf16>
    %cst_160 = arith.constant dense<0.000000e+00> : vector<64x128xf32>
    %104 = tpu.matmul %101, %103, %cst_160 {dimension_numbers = #tpu.dot_dimension_numbers<[1], [0], [0], [1], [0, 0, 1, 1], [], []>} : vector<64x8xbf16>, vector<8x128xbf16>, vector<64x128xf32> -> vector<64x128xf32>
    %105 = arith.addf %98, %104 : vector<64x128xf32>
    %c3_161 = arith.constant 3 : index
    %c0_162 = arith.constant 0 : index
    %c1_163 = arith.constant 1 : index
    %c1_164 = arith.constant 1 : index
    %c0_165 = arith.constant 0 : index
    %106 = vector.load %arg1[%c3_161, %c0_162, %c1_163, %c1_164, %c0_165] : memref<4x1x9x9x8xbf16, #tpu.memory_space<vmem>>, vector<1x1x8x8x8xbf16>
    %107 = vector.shape_cast %106 : vector<1x1x8x8x8xbf16> to vector<8x8x8xbf16>
    %108 = vector.shape_cast %107 : vector<8x8x8xbf16> to vector<64x8xbf16>
    %c3_166 = arith.constant 3 : index
    %c1_167 = arith.constant 1 : index
    %c1_168 = arith.constant 1 : index
    %c0_169 = arith.constant 0 : index
    %c0_170 = arith.constant 0 : index
    %109 = vector.load %arg2[%c3_166, %c1_167, %c1_168, %c0_169, %c0_170] : memref<4x2x2x8x128xbf16, #tpu.memory_space<vmem>>, vector<1x1x1x8x128xbf16>
    %110 = vector.shape_cast %109 : vector<1x1x1x8x128xbf16> to vector<8x128xbf16>
    %cst_171 = arith.constant dense<0.000000e+00> : vector<64x128xf32>
    %111 = tpu.matmul %108, %110, %cst_171 {dimension_numbers = #tpu.dot_dimension_numbers<[1], [0], [0], [1], [0, 0, 1, 1], [], []>} : vector<64x8xbf16>, vector<8x128xbf16>, vector<64x128xf32> -> vector<64x128xf32>
    %112 = arith.addf %105, %111 : vector<64x128xf32>
    %cst_172 = arith.constant 0.000000e+00 : f32
    %113 = vector.broadcast %cst_172 : f32 to vector<64x128xf32>
    %114 = arith.maximumf %112, %113 : vector<64x128xf32>
    %115 = vector.shape_cast %114 : vector<64x128xf32> to vector<1x8x8x128xf32>
    %116 = arith.truncf %115 : vector<1x8x8x128xf32> to vector<1x8x8x128xbf16>
    %c0_173 = arith.constant 0 : index
    %c0_174 = arith.constant 0 : index
    %c0_175 = arith.constant 0 : index
    %c0_176 = arith.constant 0 : index
    %117 = vector.load %arg3[%c0_173, %c0_174, %c0_175, %c0_176] : memref<1x8x8x128xbf16, #tpu.memory_space<vmem>>, vector<1x8x8x128xbf16>
    tpu.vector_store %arg3[%c0_173, %c0_174, %c0_175, %c0_176], %116 {strides = array<i32>} : memref<1x8x8x128xbf16, #tpu.memory_space<vmem>>, vector<1x8x8x128xbf16>,
    return
  }
  func.func @transform_0(%arg0: i32) -> (i32, i32, i32, i32, i32) {
    %c0_i32 = arith.constant 0 : i32
    %c0_i32_0 = arith.constant 0 : i32
    %c0_i32_1 = arith.constant 0 : i32
    %c0_i32_2 = arith.constant 0 : i32
    %c0_i32_3 = arith.constant 0 : i32
    return %c0_i32, %arg0, %c0_i32_0, %c0_i32_1, %c0_i32_2 : i32, i32, i32, i32, i32
  }
  func.func @transform_1(%arg0: i32) -> (i32, i32, i32, i32, i32) {
    %c0_i32 = arith.constant 0 : i32
    %c0_i32_0 = arith.constant 0 : i32
    %c0_i32_1 = arith.constant 0 : i32
    %c0_i32_2 = arith.constant 0 : i32
    %c0_i32_3 = arith.constant 0 : i32
    %c0_i32_4 = arith.constant 0 : i32
    return %c0_i32, %c0_i32_0, %c0_i32_1, %c0_i32_2, %c0_i32_3 : i32, i32, i32, i32, i32
  }
  func.func @transform_2(%arg0: i32) -> (i32, i32, i32, i32) {
    %c0_i32 = arith.constant 0 : i32
    %c0_i32_0 = arith.constant 0 : i32
    %c0_i32_1 = arith.constant 0 : i32
    %c0_i32_2 = arith.constant 0 : i32
    return %arg0, %c0_i32, %c0_i32_0, %c0_i32_1 : i32, i32, i32, i32
  }
}

module attributes {stable_mosaic.version = 11 : i64} {
  func.func @_bn_norm_kernel(%arg0: i32, %arg1: memref<1x4x8x8x128xbf16, #tpu.memory_space<vmem>>, %arg2: memref<1x128xf32, #tpu.memory_space<vmem>>, %arg3: memref<1x128xf32, #tpu.memory_space<vmem>>, %arg4: memref<1x4x8x8x128xf32, #tpu.memory_space<vmem>>) attributes {dimension_semantics = [#tpu.dimension_semantics<parallel>], iteration_bounds = array<i64: 2>, scalar_prefetch = 0 : i64, scratch_operands = 0 : i64, tpu.core_type = #tpu.core_type<tc>, window_params = [{transform_indices = @transform_0, window_bounds = array<i64: 1, 4, 8, 8, 128>}, {pipeline_mode = #tpu.pipeline_mode<synchronous>, transform_indices = @transform_1, window_bounds = array<i64: 1, 128>}, {pipeline_mode = #tpu.pipeline_mode<synchronous>, transform_indices = @transform_2, window_bounds = array<i64: 1, 128>}, {transform_indices = @transform_3, window_bounds = array<i64: 1, 4, 8, 8, 128>}]} {
    %c0 = arith.constant 0 : index
    %c0_0 = arith.constant 0 : index
    %c0_1 = arith.constant 0 : index
    %c0_2 = arith.constant 0 : index
    %c0_3 = arith.constant 0 : index
    %0 = vector.load %arg1[%c0, %c0_0, %c0_1, %c0_2, %c0_3] : memref<1x4x8x8x128xbf16, #tpu.memory_space<vmem>>, vector<1x4x8x8x128xbf16>
    %1 = arith.extf %0 : vector<1x4x8x8x128xbf16> to vector<1x4x8x8x128xf32>
    %c0_4 = arith.constant 0 : index
    %c0_5 = arith.constant 0 : index
    %2 = vector.load %arg2[%c0_4, %c0_5] : memref<1x128xf32, #tpu.memory_space<vmem>>, vector<1x128xf32>
    %3 = vector.shape_cast %2 : vector<1x128xf32> to vector<1x1x1x1x128xf32>
    %4 = vector.broadcast %3 : vector<1x1x1x1x128xf32> to vector<1x4x8x8x128xf32>
    %5 = arith.mulf %1, %4 : vector<1x4x8x8x128xf32>
    %c0_6 = arith.constant 0 : index
    %c0_7 = arith.constant 0 : index
    %6 = vector.load %arg3[%c0_6, %c0_7] : memref<1x128xf32, #tpu.memory_space<vmem>>, vector<1x128xf32>
    %7 = vector.shape_cast %6 : vector<1x128xf32> to vector<1x1x1x1x128xf32>
    %8 = vector.broadcast %7 : vector<1x1x1x1x128xf32> to vector<1x4x8x8x128xf32>
    %9 = arith.addf %5, %8 : vector<1x4x8x8x128xf32>
    %c0_8 = arith.constant 0 : index
    %c0_9 = arith.constant 0 : index
    %c0_10 = arith.constant 0 : index
    %c0_11 = arith.constant 0 : index
    %c0_12 = arith.constant 0 : index
    %10 = vector.load %arg4[%c0_8, %c0_9, %c0_10, %c0_11, %c0_12] : memref<1x4x8x8x128xf32, #tpu.memory_space<vmem>>, vector<1x4x8x8x128xf32>
    tpu.vector_store %arg4[%c0_8, %c0_9, %c0_10, %c0_11, %c0_12], %9 {strides = array<i32>} : memref<1x4x8x8x128xf32, #tpu.memory_space<vmem>>, vector<1x4x8x8x128xf32>,
    return
  }
  func.func @transform_0(%arg0: i32) -> (i32, i32, i32, i32, i32) {
    %c0_i32 = arith.constant 0 : i32
    %c0_i32_0 = arith.constant 0 : i32
    %c0_i32_1 = arith.constant 0 : i32
    %c0_i32_2 = arith.constant 0 : i32
    %c0_i32_3 = arith.constant 0 : i32
    return %arg0, %c0_i32, %c0_i32_0, %c0_i32_1, %c0_i32_2 : i32, i32, i32, i32, i32
  }
  func.func @transform_1(%arg0: i32) -> (i32, i32) {
    %c0_i32 = arith.constant 0 : i32
    %c0_i32_0 = arith.constant 0 : i32
    %c0_i32_1 = arith.constant 0 : i32
    return %c0_i32, %c0_i32_0 : i32, i32
  }
  func.func @transform_2(%arg0: i32) -> (i32, i32) {
    %c0_i32 = arith.constant 0 : i32
    %c0_i32_0 = arith.constant 0 : i32
    %c0_i32_1 = arith.constant 0 : i32
    return %c0_i32, %c0_i32_0 : i32, i32
  }
  func.func @transform_3(%arg0: i32) -> (i32, i32, i32, i32, i32) {
    %c0_i32 = arith.constant 0 : i32
    %c0_i32_0 = arith.constant 0 : i32
    %c0_i32_1 = arith.constant 0 : i32
    %c0_i32_2 = arith.constant 0 : i32
    %c0_i32_3 = arith.constant 0 : i32
    return %arg0, %c0_i32, %c0_i32_0, %c0_i32_1, %c0_i32_2 : i32, i32, i32, i32, i32
  }
}

module attributes {stable_mosaic.version = 11 : i64} {
  func.func @_up_kernel(%arg0: i32, %arg1: memref<1x10x10x128xbf16, #tpu.memory_space<vmem>>, %arg2: memref<4x2x2x128x128xbf16, #tpu.memory_space<vmem>>, %arg3: memref<1x4x8x8x128xbf16, #tpu.memory_space<vmem>>, %arg4: memref<1x1x128xf32, #tpu.memory_space<vmem>>, %arg5: memref<1x1x128xf32, #tpu.memory_space<vmem>>) attributes {dimension_semantics = [#tpu.dimension_semantics<parallel>], iteration_bounds = array<i64: 2>, scalar_prefetch = 0 : i64, scratch_operands = 0 : i64, tpu.core_type = #tpu.core_type<tc>, window_params = [{transform_indices = @transform_0, window_bounds = array<i64: 1, 10, 10, 128>}, {pipeline_mode = #tpu.pipeline_mode<synchronous>, transform_indices = @transform_1, window_bounds = array<i64: 4, 2, 2, 128, 128>}, {transform_indices = @transform_2, window_bounds = array<i64: 1, 4, 8, 8, 128>}, {transform_indices = @transform_3, window_bounds = array<i64: 1, 1, 128>}, {transform_indices = @transform_4, window_bounds = array<i64: 1, 1, 128>}]} {
    %cst = arith.constant 0.000000e+00 : f32
    %0 = vector.broadcast %cst : f32 to vector<1x128xf32>
    %cst_0 = arith.constant 0.000000e+00 : f32
    %1 = vector.broadcast %cst_0 : f32 to vector<1x128xf32>
    %cst_1 = arith.constant 0.000000e+00 : f32
    %2 = vector.broadcast %cst_1 : f32 to vector<64x128xf32>
    %c0 = arith.constant 0 : index
    %c0_2 = arith.constant 0 : index
    %c0_3 = arith.constant 0 : index
    %c0_4 = arith.constant 0 : index
    %3 = vector.load %arg1[%c0, %c0_2, %c0_3, %c0_4] : memref<1x10x10x128xbf16, #tpu.memory_space<vmem>>, vector<1x8x8x128xbf16>
    %4 = vector.shape_cast %3 : vector<1x8x8x128xbf16> to vector<8x8x128xbf16>
    %5 = vector.shape_cast %4 : vector<8x8x128xbf16> to vector<64x128xbf16>
    %c0_5 = arith.constant 0 : index
    %c0_6 = arith.constant 0 : index
    %c0_7 = arith.constant 0 : index
    %c0_8 = arith.constant 0 : index
    %c0_9 = arith.constant 0 : index
    %6 = vector.load %arg2[%c0_5, %c0_6, %c0_7, %c0_8, %c0_9] : memref<4x2x2x128x128xbf16, #tpu.memory_space<vmem>>, vector<1x1x1x128x128xbf16>
    %7 = vector.shape_cast %6 : vector<1x1x1x128x128xbf16> to vector<128x128xbf16>
    %cst_10 = arith.constant dense<0.000000e+00> : vector<64x128xf32>
    %8 = tpu.matmul %5, %7, %cst_10 {dimension_numbers = #tpu.dot_dimension_numbers<[1], [0], [0], [1], [0, 0, 1, 1], [], []>} : vector<64x128xbf16>, vector<128x128xbf16>, vector<64x128xf32> -> vector<64x128xf32>
    %9 = arith.addf %2, %8 : vector<64x128xf32>
    %c0_11 = arith.constant 0 : index
    %c0_12 = arith.constant 0 : index
    %c1 = arith.constant 1 : index
    %c0_13 = arith.constant 0 : index
    %10 = vector.load %arg1[%c0_11, %c0_12, %c1, %c0_13] : memref<1x10x10x128xbf16, #tpu.memory_space<vmem>>, vector<1x8x8x128xbf16>
    %11 = vector.shape_cast %10 : vector<1x8x8x128xbf16> to vector<8x8x128xbf16>
    %12 = vector.shape_cast %11 : vector<8x8x128xbf16> to vector<64x128xbf16>
    %c0_14 = arith.constant 0 : index
    %c0_15 = arith.constant 0 : index
    %c1_16 = arith.constant 1 : index
    %c0_17 = arith.constant 0 : index
    %c0_18 = arith.constant 0 : index
    %13 = vector.load %arg2[%c0_14, %c0_15, %c1_16, %c0_17, %c0_18] : memref<4x2x2x128x128xbf16, #tpu.memory_space<vmem>>, vector<1x1x1x128x128xbf16>
    %14 = vector.shape_cast %13 : vector<1x1x1x128x128xbf16> to vector<128x128xbf16>
    %cst_19 = arith.constant dense<0.000000e+00> : vector<64x128xf32>
    %15 = tpu.matmul %12, %14, %cst_19 {dimension_numbers = #tpu.dot_dimension_numbers<[1], [0], [0], [1], [0, 0, 1, 1], [], []>} : vector<64x128xbf16>, vector<128x128xbf16>, vector<64x128xf32> -> vector<64x128xf32>
    %16 = arith.addf %9, %15 : vector<64x128xf32>
    %c0_20 = arith.constant 0 : index
    %c1_21 = arith.constant 1 : index
    %c0_22 = arith.constant 0 : index
    %c0_23 = arith.constant 0 : index
    %17 = vector.load %arg1[%c0_20, %c1_21, %c0_22, %c0_23] : memref<1x10x10x128xbf16, #tpu.memory_space<vmem>>, vector<1x8x8x128xbf16>
    %18 = vector.shape_cast %17 : vector<1x8x8x128xbf16> to vector<8x8x128xbf16>
    %19 = vector.shape_cast %18 : vector<8x8x128xbf16> to vector<64x128xbf16>
    %c0_24 = arith.constant 0 : index
    %c1_25 = arith.constant 1 : index
    %c0_26 = arith.constant 0 : index
    %c0_27 = arith.constant 0 : index
    %c0_28 = arith.constant 0 : index
    %20 = vector.load %arg2[%c0_24, %c1_25, %c0_26, %c0_27, %c0_28] : memref<4x2x2x128x128xbf16, #tpu.memory_space<vmem>>, vector<1x1x1x128x128xbf16>
    %21 = vector.shape_cast %20 : vector<1x1x1x128x128xbf16> to vector<128x128xbf16>
    %cst_29 = arith.constant dense<0.000000e+00> : vector<64x128xf32>
    %22 = tpu.matmul %19, %21, %cst_29 {dimension_numbers = #tpu.dot_dimension_numbers<[1], [0], [0], [1], [0, 0, 1, 1], [], []>} : vector<64x128xbf16>, vector<128x128xbf16>, vector<64x128xf32> -> vector<64x128xf32>
    %23 = arith.addf %16, %22 : vector<64x128xf32>
    %c0_30 = arith.constant 0 : index
    %c1_31 = arith.constant 1 : index
    %c1_32 = arith.constant 1 : index
    %c0_33 = arith.constant 0 : index
    %24 = vector.load %arg1[%c0_30, %c1_31, %c1_32, %c0_33] : memref<1x10x10x128xbf16, #tpu.memory_space<vmem>>, vector<1x8x8x128xbf16>
    %25 = vector.shape_cast %24 : vector<1x8x8x128xbf16> to vector<8x8x128xbf16>
    %26 = vector.shape_cast %25 : vector<8x8x128xbf16> to vector<64x128xbf16>
    %c0_34 = arith.constant 0 : index
    %c1_35 = arith.constant 1 : index
    %c1_36 = arith.constant 1 : index
    %c0_37 = arith.constant 0 : index
    %c0_38 = arith.constant 0 : index
    %27 = vector.load %arg2[%c0_34, %c1_35, %c1_36, %c0_37, %c0_38] : memref<4x2x2x128x128xbf16, #tpu.memory_space<vmem>>, vector<1x1x1x128x128xbf16>
    %28 = vector.shape_cast %27 : vector<1x1x1x128x128xbf16> to vector<128x128xbf16>
    %cst_39 = arith.constant dense<0.000000e+00> : vector<64x128xf32>
    %29 = tpu.matmul %26, %28, %cst_39 {dimension_numbers = #tpu.dot_dimension_numbers<[1], [0], [0], [1], [0, 0, 1, 1], [], []>} : vector<64x128xbf16>, vector<128x128xbf16>, vector<64x128xf32> -> vector<64x128xf32>
    %30 = arith.addf %23, %29 : vector<64x128xf32>
    %31 = vector.shape_cast %30 : vector<64x128xf32> to vector<8x8x128xf32>
    %32 = arith.truncf %31 : vector<8x8x128xf32> to vector<8x8x128xbf16>
    %c0_40 = arith.constant 0 : index
    %c0_41 = arith.constant 0 : index
    %c0_42 = arith.constant 0 : index
    %c0_43 = arith.constant 0 : index
    %c0_44 = arith.constant 0 : index
    %33 = vector.load %arg3[%c0_40, %c0_41, %c0_42, %c0_43, %c0_44] : memref<1x4x8x8x128xbf16, #tpu.memory_space<vmem>>, vector<1x1x8x8x128xbf16>
    %34 = vector.shape_cast %33 : vector<1x1x8x8x128xbf16> to vector<8x8x128xbf16>
    %35 = vector.shape_cast %32 : vector<8x8x128xbf16> to vector<1x1x8x8x128xbf16>
    tpu.vector_store %arg3[%c0_40, %c0_41, %c0_42, %c0_43, %c0_44], %35 {strides = array<i32>} : memref<1x4x8x8x128xbf16, #tpu.memory_space<vmem>>, vector<1x1x8x8x128xbf16>,
    %cst_45 = arith.constant dense<0.000000e+00> : vector<128xf32>
    %36 = vector.multi_reduction <add>, %30, %cst_45 [0] : vector<64x128xf32> to vector<128xf32>
    %37 = vector.shape_cast %36 : vector<128xf32> to vector<1x128xf32>
    %38 = arith.addf %0, %37 : vector<1x128xf32>
    %39 = arith.mulf %30, %30 : vector<64x128xf32>
    %cst_46 = arith.constant dense<0.000000e+00> : vector<128xf32>
    %40 = vector.multi_reduction <add>, %39, %cst_46 [0] : vector<64x128xf32> to vector<128xf32>
    %41 = vector.shape_cast %40 : vector<128xf32> to vector<1x128xf32>
    %42 = arith.addf %1, %41 : vector<1x128xf32>
    %cst_47 = arith.constant 0.000000e+00 : f32
    %43 = vector.broadcast %cst_47 : f32 to vector<64x128xf32>
    %c0_48 = arith.constant 0 : index
    %c0_49 = arith.constant 0 : index
    %c1_50 = arith.constant 1 : index
    %c0_51 = arith.constant 0 : index
    %44 = vector.load %arg1[%c0_48, %c0_49, %c1_50, %c0_51] : memref<1x10x10x128xbf16, #tpu.memory_space<vmem>>, vector<1x8x8x128xbf16>
    %45 = vector.shape_cast %44 : vector<1x8x8x128xbf16> to vector<8x8x128xbf16>
    %46 = vector.shape_cast %45 : vector<8x8x128xbf16> to vector<64x128xbf16>
    %c1_52 = arith.constant 1 : index
    %c0_53 = arith.constant 0 : index
    %c0_54 = arith.constant 0 : index
    %c0_55 = arith.constant 0 : index
    %c0_56 = arith.constant 0 : index
    %47 = vector.load %arg2[%c1_52, %c0_53, %c0_54, %c0_55, %c0_56] : memref<4x2x2x128x128xbf16, #tpu.memory_space<vmem>>, vector<1x1x1x128x128xbf16>
    %48 = vector.shape_cast %47 : vector<1x1x1x128x128xbf16> to vector<128x128xbf16>
    %cst_57 = arith.constant dense<0.000000e+00> : vector<64x128xf32>
    %49 = tpu.matmul %46, %48, %cst_57 {dimension_numbers = #tpu.dot_dimension_numbers<[1], [0], [0], [1], [0, 0, 1, 1], [], []>} : vector<64x128xbf16>, vector<128x128xbf16>, vector<64x128xf32> -> vector<64x128xf32>
    %50 = arith.addf %43, %49 : vector<64x128xf32>
    %c0_58 = arith.constant 0 : index
    %c0_59 = arith.constant 0 : index
    %c2 = arith.constant 2 : index
    %c0_60 = arith.constant 0 : index
    %51 = vector.load %arg1[%c0_58, %c0_59, %c2, %c0_60] : memref<1x10x10x128xbf16, #tpu.memory_space<vmem>>, vector<1x8x8x128xbf16>
    %52 = vector.shape_cast %51 : vector<1x8x8x128xbf16> to vector<8x8x128xbf16>
    %53 = vector.shape_cast %52 : vector<8x8x128xbf16> to vector<64x128xbf16>
    %c1_61 = arith.constant 1 : index
    %c0_62 = arith.constant 0 : index
    %c1_63 = arith.constant 1 : index
    %c0_64 = arith.constant 0 : index
    %c0_65 = arith.constant 0 : index
    %54 = vector.load %arg2[%c1_61, %c0_62, %c1_63, %c0_64, %c0_65] : memref<4x2x2x128x128xbf16, #tpu.memory_space<vmem>>, vector<1x1x1x128x128xbf16>
    %55 = vector.shape_cast %54 : vector<1x1x1x128x128xbf16> to vector<128x128xbf16>
    %cst_66 = arith.constant dense<0.000000e+00> : vector<64x128xf32>
    %56 = tpu.matmul %53, %55, %cst_66 {dimension_numbers = #tpu.dot_dimension_numbers<[1], [0], [0], [1], [0, 0, 1, 1], [], []>} : vector<64x128xbf16>, vector<128x128xbf16>, vector<64x128xf32> -> vector<64x128xf32>
    %57 = arith.addf %50, %56 : vector<64x128xf32>
    %c0_67 = arith.constant 0 : index
    %c1_68 = arith.constant 1 : index
    %c1_69 = arith.constant 1 : index
    %c0_70 = arith.constant 0 : index
    %58 = vector.load %arg1[%c0_67, %c1_68, %c1_69, %c0_70] : memref<1x10x10x128xbf16, #tpu.memory_space<vmem>>, vector<1x8x8x128xbf16>
    %59 = vector.shape_cast %58 : vector<1x8x8x128xbf16> to vector<8x8x128xbf16>
    %60 = vector.shape_cast %59 : vector<8x8x128xbf16> to vector<64x128xbf16>
    %c1_71 = arith.constant 1 : index
    %c1_72 = arith.constant 1 : index
    %c0_73 = arith.constant 0 : index
    %c0_74 = arith.constant 0 : index
    %c0_75 = arith.constant 0 : index
    %61 = vector.load %arg2[%c1_71, %c1_72, %c0_73, %c0_74, %c0_75] : memref<4x2x2x128x128xbf16, #tpu.memory_space<vmem>>, vector<1x1x1x128x128xbf16>
    %62 = vector.shape_cast %61 : vector<1x1x1x128x128xbf16> to vector<128x128xbf16>
    %cst_76 = arith.constant dense<0.000000e+00> : vector<64x128xf32>
    %63 = tpu.matmul %60, %62, %cst_76 {dimension_numbers = #tpu.dot_dimension_numbers<[1], [0], [0], [1], [0, 0, 1, 1], [], []>} : vector<64x128xbf16>, vector<128x128xbf16>, vector<64x128xf32> -> vector<64x128xf32>
    %64 = arith.addf %57, %63 : vector<64x128xf32>
    %c0_77 = arith.constant 0 : index
    %c1_78 = arith.constant 1 : index
    %c2_79 = arith.constant 2 : index
    %c0_80 = arith.constant 0 : index
    %65 = vector.load %arg1[%c0_77, %c1_78, %c2_79, %c0_80] : memref<1x10x10x128xbf16, #tpu.memory_space<vmem>>, vector<1x8x8x128xbf16>
    %66 = vector.shape_cast %65 : vector<1x8x8x128xbf16> to vector<8x8x128xbf16>
    %67 = vector.shape_cast %66 : vector<8x8x128xbf16> to vector<64x128xbf16>
    %c1_81 = arith.constant 1 : index
    %c1_82 = arith.constant 1 : index
    %c1_83 = arith.constant 1 : index
    %c0_84 = arith.constant 0 : index
    %c0_85 = arith.constant 0 : index
    %68 = vector.load %arg2[%c1_81, %c1_82, %c1_83, %c0_84, %c0_85] : memref<4x2x2x128x128xbf16, #tpu.memory_space<vmem>>, vector<1x1x1x128x128xbf16>
    %69 = vector.shape_cast %68 : vector<1x1x1x128x128xbf16> to vector<128x128xbf16>
    %cst_86 = arith.constant dense<0.000000e+00> : vector<64x128xf32>
    %70 = tpu.matmul %67, %69, %cst_86 {dimension_numbers = #tpu.dot_dimension_numbers<[1], [0], [0], [1], [0, 0, 1, 1], [], []>} : vector<64x128xbf16>, vector<128x128xbf16>, vector<64x128xf32> -> vector<64x128xf32>
    %71 = arith.addf %64, %70 : vector<64x128xf32>
    %72 = vector.shape_cast %71 : vector<64x128xf32> to vector<8x8x128xf32>
    %73 = arith.truncf %72 : vector<8x8x128xf32> to vector<8x8x128xbf16>
    %c0_87 = arith.constant 0 : index
    %c1_88 = arith.constant 1 : index
    %c0_89 = arith.constant 0 : index
    %c0_90 = arith.constant 0 : index
    %c0_91 = arith.constant 0 : index
    %74 = vector.load %arg3[%c0_87, %c1_88, %c0_89, %c0_90, %c0_91] : memref<1x4x8x8x128xbf16, #tpu.memory_space<vmem>>, vector<1x1x8x8x128xbf16>
    %75 = vector.shape_cast %74 : vector<1x1x8x8x128xbf16> to vector<8x8x128xbf16>
    %76 = vector.shape_cast %73 : vector<8x8x128xbf16> to vector<1x1x8x8x128xbf16>
    tpu.vector_store %arg3[%c0_87, %c1_88, %c0_89, %c0_90, %c0_91], %76 {strides = array<i32>} : memref<1x4x8x8x128xbf16, #tpu.memory_space<vmem>>, vector<1x1x8x8x128xbf16>,
    %cst_92 = arith.constant dense<0.000000e+00> : vector<128xf32>
    %77 = vector.multi_reduction <add>, %71, %cst_92 [0] : vector<64x128xf32> to vector<128xf32>
    %78 = vector.shape_cast %77 : vector<128xf32> to vector<1x128xf32>
    %79 = arith.addf %38, %78 : vector<1x128xf32>
    %80 = arith.mulf %71, %71 : vector<64x128xf32>
    %cst_93 = arith.constant dense<0.000000e+00> : vector<128xf32>
    %81 = vector.multi_reduction <add>, %80, %cst_93 [0] : vector<64x128xf32> to vector<128xf32>
    %82 = vector.shape_cast %81 : vector<128xf32> to vector<1x128xf32>
    %83 = arith.addf %42, %82 : vector<1x128xf32>
    %cst_94 = arith.constant 0.000000e+00 : f32
    %84 = vector.broadcast %cst_94 : f32 to vector<64x128xf32>
    %c0_95 = arith.constant 0 : index
    %c1_96 = arith.constant 1 : index
    %c0_97 = arith.constant 0 : index
    %c0_98 = arith.constant 0 : index
    %85 = vector.load %arg1[%c0_95, %c1_96, %c0_97, %c0_98] : memref<1x10x10x128xbf16, #tpu.memory_space<vmem>>, vector<1x8x8x128xbf16>
    %86 = vector.shape_cast %85 : vector<1x8x8x128xbf16> to vector<8x8x128xbf16>
    %87 = vector.shape_cast %86 : vector<8x8x128xbf16> to vector<64x128xbf16>
    %c2_99 = arith.constant 2 : index
    %c0_100 = arith.constant 0 : index
    %c0_101 = arith.constant 0 : index
    %c0_102 = arith.constant 0 : index
    %c0_103 = arith.constant 0 : index
    %88 = vector.load %arg2[%c2_99, %c0_100, %c0_101, %c0_102, %c0_103] : memref<4x2x2x128x128xbf16, #tpu.memory_space<vmem>>, vector<1x1x1x128x128xbf16>
    %89 = vector.shape_cast %88 : vector<1x1x1x128x128xbf16> to vector<128x128xbf16>
    %cst_104 = arith.constant dense<0.000000e+00> : vector<64x128xf32>
    %90 = tpu.matmul %87, %89, %cst_104 {dimension_numbers = #tpu.dot_dimension_numbers<[1], [0], [0], [1], [0, 0, 1, 1], [], []>} : vector<64x128xbf16>, vector<128x128xbf16>, vector<64x128xf32> -> vector<64x128xf32>
    %91 = arith.addf %84, %90 : vector<64x128xf32>
    %c0_105 = arith.constant 0 : index
    %c1_106 = arith.constant 1 : index
    %c1_107 = arith.constant 1 : index
    %c0_108 = arith.constant 0 : index
    %92 = vector.load %arg1[%c0_105, %c1_106, %c1_107, %c0_108] : memref<1x10x10x128xbf16, #tpu.memory_space<vmem>>, vector<1x8x8x128xbf16>
    %93 = vector.shape_cast %92 : vector<1x8x8x128xbf16> to vector<8x8x128xbf16>
    %94 = vector.shape_cast %93 : vector<8x8x128xbf16> to vector<64x128xbf16>
    %c2_109 = arith.constant 2 : index
    %c0_110 = arith.constant 0 : index
    %c1_111 = arith.constant 1 : index
    %c0_112 = arith.constant 0 : index
    %c0_113 = arith.constant 0 : index
    %95 = vector.load %arg2[%c2_109, %c0_110, %c1_111, %c0_112, %c0_113] : memref<4x2x2x128x128xbf16, #tpu.memory_space<vmem>>, vector<1x1x1x128x128xbf16>
    %96 = vector.shape_cast %95 : vector<1x1x1x128x128xbf16> to vector<128x128xbf16>
    %cst_114 = arith.constant dense<0.000000e+00> : vector<64x128xf32>
    %97 = tpu.matmul %94, %96, %cst_114 {dimension_numbers = #tpu.dot_dimension_numbers<[1], [0], [0], [1], [0, 0, 1, 1], [], []>} : vector<64x128xbf16>, vector<128x128xbf16>, vector<64x128xf32> -> vector<64x128xf32>
    %98 = arith.addf %91, %97 : vector<64x128xf32>
    %c0_115 = arith.constant 0 : index
    %c2_116 = arith.constant 2 : index
    %c0_117 = arith.constant 0 : index
    %c0_118 = arith.constant 0 : index
    %99 = vector.load %arg1[%c0_115, %c2_116, %c0_117, %c0_118] : memref<1x10x10x128xbf16, #tpu.memory_space<vmem>>, vector<1x8x8x128xbf16>
    %100 = vector.shape_cast %99 : vector<1x8x8x128xbf16> to vector<8x8x128xbf16>
    %101 = vector.shape_cast %100 : vector<8x8x128xbf16> to vector<64x128xbf16>
    %c2_119 = arith.constant 2 : index
    %c1_120 = arith.constant 1 : index
    %c0_121 = arith.constant 0 : index
    %c0_122 = arith.constant 0 : index
    %c0_123 = arith.constant 0 : index
    %102 = vector.load %arg2[%c2_119, %c1_120, %c0_121, %c0_122, %c0_123] : memref<4x2x2x128x128xbf16, #tpu.memory_space<vmem>>, vector<1x1x1x128x128xbf16>
    %103 = vector.shape_cast %102 : vector<1x1x1x128x128xbf16> to vector<128x128xbf16>
    %cst_124 = arith.constant dense<0.000000e+00> : vector<64x128xf32>
    %104 = tpu.matmul %101, %103, %cst_124 {dimension_numbers = #tpu.dot_dimension_numbers<[1], [0], [0], [1], [0, 0, 1, 1], [], []>} : vector<64x128xbf16>, vector<128x128xbf16>, vector<64x128xf32> -> vector<64x128xf32>
    %105 = arith.addf %98, %104 : vector<64x128xf32>
    %c0_125 = arith.constant 0 : index
    %c2_126 = arith.constant 2 : index
    %c1_127 = arith.constant 1 : index
    %c0_128 = arith.constant 0 : index
    %106 = vector.load %arg1[%c0_125, %c2_126, %c1_127, %c0_128] : memref<1x10x10x128xbf16, #tpu.memory_space<vmem>>, vector<1x8x8x128xbf16>
    %107 = vector.shape_cast %106 : vector<1x8x8x128xbf16> to vector<8x8x128xbf16>
    %108 = vector.shape_cast %107 : vector<8x8x128xbf16> to vector<64x128xbf16>
    %c2_129 = arith.constant 2 : index
    %c1_130 = arith.constant 1 : index
    %c1_131 = arith.constant 1 : index
    %c0_132 = arith.constant 0 : index
    %c0_133 = arith.constant 0 : index
    %109 = vector.load %arg2[%c2_129, %c1_130, %c1_131, %c0_132, %c0_133] : memref<4x2x2x128x128xbf16, #tpu.memory_space<vmem>>, vector<1x1x1x128x128xbf16>
    %110 = vector.shape_cast %109 : vector<1x1x1x128x128xbf16> to vector<128x128xbf16>
    %cst_134 = arith.constant dense<0.000000e+00> : vector<64x128xf32>
    %111 = tpu.matmul %108, %110, %cst_134 {dimension_numbers = #tpu.dot_dimension_numbers<[1], [0], [0], [1], [0, 0, 1, 1], [], []>} : vector<64x128xbf16>, vector<128x128xbf16>, vector<64x128xf32> -> vector<64x128xf32>
    %112 = arith.addf %105, %111 : vector<64x128xf32>
    %113 = vector.shape_cast %112 : vector<64x128xf32> to vector<8x8x128xf32>
    %114 = arith.truncf %113 : vector<8x8x128xf32> to vector<8x8x128xbf16>
    %c0_135 = arith.constant 0 : index
    %c2_136 = arith.constant 2 : index
    %c0_137 = arith.constant 0 : index
    %c0_138 = arith.constant 0 : index
    %c0_139 = arith.constant 0 : index
    %115 = vector.load %arg3[%c0_135, %c2_136, %c0_137, %c0_138, %c0_139] : memref<1x4x8x8x128xbf16, #tpu.memory_space<vmem>>, vector<1x1x8x8x128xbf16>
    %116 = vector.shape_cast %115 : vector<1x1x8x8x128xbf16> to vector<8x8x128xbf16>
    %117 = vector.shape_cast %114 : vector<8x8x128xbf16> to vector<1x1x8x8x128xbf16>
    tpu.vector_store %arg3[%c0_135, %c2_136, %c0_137, %c0_138, %c0_139], %117 {strides = array<i32>} : memref<1x4x8x8x128xbf16, #tpu.memory_space<vmem>>, vector<1x1x8x8x128xbf16>,
    %cst_140 = arith.constant dense<0.000000e+00> : vector<128xf32>
    %118 = vector.multi_reduction <add>, %112, %cst_140 [0] : vector<64x128xf32> to vector<128xf32>
    %119 = vector.shape_cast %118 : vector<128xf32> to vector<1x128xf32>
    %120 = arith.addf %79, %119 : vector<1x128xf32>
    %121 = arith.mulf %112, %112 : vector<64x128xf32>
    %cst_141 = arith.constant dense<0.000000e+00> : vector<128xf32>
    %122 = vector.multi_reduction <add>, %121, %cst_141 [0] : vector<64x128xf32> to vector<128xf32>
    %123 = vector.shape_cast %122 : vector<128xf32> to vector<1x128xf32>
    %124 = arith.addf %83, %123 : vector<1x128xf32>
    %cst_142 = arith.constant 0.000000e+00 : f32
    %125 = vector.broadcast %cst_142 : f32 to vector<64x128xf32>
    %c0_143 = arith.constant 0 : index
    %c1_144 = arith.constant 1 : index
    %c1_145 = arith.constant 1 : index
    %c0_146 = arith.constant 0 : index
    %126 = vector.load %arg1[%c0_143, %c1_144, %c1_145, %c0_146] : memref<1x10x10x128xbf16, #tpu.memory_space<vmem>>, vector<1x8x8x128xbf16>
    %127 = vector.shape_cast %126 : vector<1x8x8x128xbf16> to vector<8x8x128xbf16>
    %128 = vector.shape_cast %127 : vector<8x8x128xbf16> to vector<64x128xbf16>
    %c3 = arith.constant 3 : index
    %c0_147 = arith.constant 0 : index
    %c0_148 = arith.constant 0 : index
    %c0_149 = arith.constant 0 : index
    %c0_150 = arith.constant 0 : index
    %129 = vector.load %arg2[%c3, %c0_147, %c0_148, %c0_149, %c0_150] : memref<4x2x2x128x128xbf16, #tpu.memory_space<vmem>>, vector<1x1x1x128x128xbf16>
    %130 = vector.shape_cast %129 : vector<1x1x1x128x128xbf16> to vector<128x128xbf16>
    %cst_151 = arith.constant dense<0.000000e+00> : vector<64x128xf32>
    %131 = tpu.matmul %128, %130, %cst_151 {dimension_numbers = #tpu.dot_dimension_numbers<[1], [0], [0], [1], [0, 0, 1, 1], [], []>} : vector<64x128xbf16>, vector<128x128xbf16>, vector<64x128xf32> -> vector<64x128xf32>
    %132 = arith.addf %125, %131 : vector<64x128xf32>
    %c0_152 = arith.constant 0 : index
    %c1_153 = arith.constant 1 : index
    %c2_154 = arith.constant 2 : index
    %c0_155 = arith.constant 0 : index
    %133 = vector.load %arg1[%c0_152, %c1_153, %c2_154, %c0_155] : memref<1x10x10x128xbf16, #tpu.memory_space<vmem>>, vector<1x8x8x128xbf16>
    %134 = vector.shape_cast %133 : vector<1x8x8x128xbf16> to vector<8x8x128xbf16>
    %135 = vector.shape_cast %134 : vector<8x8x128xbf16> to vector<64x128xbf16>
    %c3_156 = arith.constant 3 : index
    %c0_157 = arith.constant 0 : index
    %c1_158 = arith.constant 1 : index
    %c0_159 = arith.constant 0 : index
    %c0_160 = arith.constant 0 : index
    %136 = vector.load %arg2[%c3_156, %c0_157, %c1_158, %c0_159, %c0_160] : memref<4x2x2x128x128xbf16, #tpu.memory_space<vmem>>, vector<1x1x1x128x128xbf16>
    %137 = vector.shape_cast %136 : vector<1x1x1x128x128xbf16> to vector<128x128xbf16>
    %cst_161 = arith.constant dense<0.000000e+00> : vector<64x128xf32>
    %138 = tpu.matmul %135, %137, %cst_161 {dimension_numbers = #tpu.dot_dimension_numbers<[1], [0], [0], [1], [0, 0, 1, 1], [], []>} : vector<64x128xbf16>, vector<128x128xbf16>, vector<64x128xf32> -> vector<64x128xf32>
    %139 = arith.addf %132, %138 : vector<64x128xf32>
    %c0_162 = arith.constant 0 : index
    %c2_163 = arith.constant 2 : index
    %c1_164 = arith.constant 1 : index
    %c0_165 = arith.constant 0 : index
    %140 = vector.load %arg1[%c0_162, %c2_163, %c1_164, %c0_165] : memref<1x10x10x128xbf16, #tpu.memory_space<vmem>>, vector<1x8x8x128xbf16>
    %141 = vector.shape_cast %140 : vector<1x8x8x128xbf16> to vector<8x8x128xbf16>
    %142 = vector.shape_cast %141 : vector<8x8x128xbf16> to vector<64x128xbf16>
    %c3_166 = arith.constant 3 : index
    %c1_167 = arith.constant 1 : index
    %c0_168 = arith.constant 0 : index
    %c0_169 = arith.constant 0 : index
    %c0_170 = arith.constant 0 : index
    %143 = vector.load %arg2[%c3_166, %c1_167, %c0_168, %c0_169, %c0_170] : memref<4x2x2x128x128xbf16, #tpu.memory_space<vmem>>, vector<1x1x1x128x128xbf16>
    %144 = vector.shape_cast %143 : vector<1x1x1x128x128xbf16> to vector<128x128xbf16>
    %cst_171 = arith.constant dense<0.000000e+00> : vector<64x128xf32>
    %145 = tpu.matmul %142, %144, %cst_171 {dimension_numbers = #tpu.dot_dimension_numbers<[1], [0], [0], [1], [0, 0, 1, 1], [], []>} : vector<64x128xbf16>, vector<128x128xbf16>, vector<64x128xf32> -> vector<64x128xf32>
    %146 = arith.addf %139, %145 : vector<64x128xf32>
    %c0_172 = arith.constant 0 : index
    %c2_173 = arith.constant 2 : index
    %c2_174 = arith.constant 2 : index
    %c0_175 = arith.constant 0 : index
    %147 = vector.load %arg1[%c0_172, %c2_173, %c2_174, %c0_175] : memref<1x10x10x128xbf16, #tpu.memory_space<vmem>>, vector<1x8x8x128xbf16>
    %148 = vector.shape_cast %147 : vector<1x8x8x128xbf16> to vector<8x8x128xbf16>
    %149 = vector.shape_cast %148 : vector<8x8x128xbf16> to vector<64x128xbf16>
    %c3_176 = arith.constant 3 : index
    %c1_177 = arith.constant 1 : index
    %c1_178 = arith.constant 1 : index
    %c0_179 = arith.constant 0 : index
    %c0_180 = arith.constant 0 : index
    %150 = vector.load %arg2[%c3_176, %c1_177, %c1_178, %c0_179, %c0_180] : memref<4x2x2x128x128xbf16, #tpu.memory_space<vmem>>, vector<1x1x1x128x128xbf16>
    %151 = vector.shape_cast %150 : vector<1x1x1x128x128xbf16> to vector<128x128xbf16>
    %cst_181 = arith.constant dense<0.000000e+00> : vector<64x128xf32>
    %152 = tpu.matmul %149, %151, %cst_181 {dimension_numbers = #tpu.dot_dimension_numbers<[1], [0], [0], [1], [0, 0, 1, 1], [], []>} : vector<64x128xbf16>, vector<128x128xbf16>, vector<64x128xf32> -> vector<64x128xf32>
    %153 = arith.addf %146, %152 : vector<64x128xf32>
    %154 = vector.shape_cast %153 : vector<64x128xf32> to vector<8x8x128xf32>
    %155 = arith.truncf %154 : vector<8x8x128xf32> to vector<8x8x128xbf16>
    %c0_182 = arith.constant 0 : index
    %c3_183 = arith.constant 3 : index
    %c0_184 = arith.constant 0 : index
    %c0_185 = arith.constant 0 : index
    %c0_186 = arith.constant 0 : index
    %156 = vector.load %arg3[%c0_182, %c3_183, %c0_184, %c0_185, %c0_186] : memref<1x4x8x8x128xbf16, #tpu.memory_space<vmem>>, vector<1x1x8x8x128xbf16>
    %157 = vector.shape_cast %156 : vector<1x1x8x8x128xbf16> to vector<8x8x128xbf16>
    %158 = vector.shape_cast %155 : vector<8x8x128xbf16> to vector<1x1x8x8x128xbf16>
    tpu.vector_store %arg3[%c0_182, %c3_183, %c0_184, %c0_185, %c0_186], %158 {strides = array<i32>} : memref<1x4x8x8x128xbf16, #tpu.memory_space<vmem>>, vector<1x1x8x8x128xbf16>,
    %cst_187 = arith.constant dense<0.000000e+00> : vector<128xf32>
    %159 = vector.multi_reduction <add>, %153, %cst_187 [0] : vector<64x128xf32> to vector<128xf32>
    %160 = vector.shape_cast %159 : vector<128xf32> to vector<1x128xf32>
    %161 = arith.addf %120, %160 : vector<1x128xf32>
    %162 = arith.mulf %153, %153 : vector<64x128xf32>
    %cst_188 = arith.constant dense<0.000000e+00> : vector<128xf32>
    %163 = vector.multi_reduction <add>, %162, %cst_188 [0] : vector<64x128xf32> to vector<128xf32>
    %164 = vector.shape_cast %163 : vector<128xf32> to vector<1x128xf32>
    %165 = arith.addf %124, %164 : vector<1x128xf32>
    %166 = vector.shape_cast %161 : vector<1x128xf32> to vector<1x1x128xf32>
    %c0_189 = arith.constant 0 : index
    %c0_190 = arith.constant 0 : index
    %c0_191 = arith.constant 0 : index
    %167 = vector.load %arg4[%c0_189, %c0_190, %c0_191] : memref<1x1x128xf32, #tpu.memory_space<vmem>>, vector<1x1x128xf32>
    tpu.vector_store %arg4[%c0_189, %c0_190, %c0_191], %166 {strides = array<i32>} : memref<1x1x128xf32, #tpu.memory_space<vmem>>, vector<1x1x128xf32>,
    %168 = vector.shape_cast %165 : vector<1x128xf32> to vector<1x1x128xf32>
    %c0_192 = arith.constant 0 : index
    %c0_193 = arith.constant 0 : index
    %c0_194 = arith.constant 0 : index
    %169 = vector.load %arg5[%c0_192, %c0_193, %c0_194] : memref<1x1x128xf32, #tpu.memory_space<vmem>>, vector<1x1x128xf32>
    tpu.vector_store %arg5[%c0_192, %c0_193, %c0_194], %168 {strides = array<i32>} : memref<1x1x128xf32, #tpu.memory_space<vmem>>, vector<1x1x128xf32>,
    return
  }
  func.func @transform_0(%arg0: i32) -> (i32, i32, i32, i32) {
    %c0_i32 = arith.constant 0 : i32
    %c0_i32_0 = arith.constant 0 : i32
    %c0_i32_1 = arith.constant 0 : i32
    %c0_i32_2 = arith.constant 0 : i32
    return %arg0, %c0_i32, %c0_i32_0, %c0_i32_1 : i32, i32, i32, i32
  }
  func.func @transform_1(%arg0: i32) -> (i32, i32, i32, i32, i32) {
    %c0_i32 = arith.constant 0 : i32
    %c0_i32_0 = arith.constant 0 : i32
    %c0_i32_1 = arith.constant 0 : i32
    %c0_i32_2 = arith.constant 0 : i32
    %c0_i32_3 = arith.constant 0 : i32
    %c0_i32_4 = arith.constant 0 : i32
    return %c0_i32, %c0_i32_0, %c0_i32_1, %c0_i32_2, %c0_i32_3 : i32, i32, i32, i32, i32
  }
  func.func @transform_2(%arg0: i32) -> (i32, i32, i32, i32, i32) {
    %c0_i32 = arith.constant 0 : i32
    %c0_i32_0 = arith.constant 0 : i32
    %c0_i32_1 = arith.constant 0 : i32
    %c0_i32_2 = arith.constant 0 : i32
    %c0_i32_3 = arith.constant 0 : i32
    return %arg0, %c0_i32, %c0_i32_0, %c0_i32_1, %c0_i32_2 : i32, i32, i32, i32, i32
  }
  func.func @transform_3(%arg0: i32) -> (i32, i32, i32) {
    %c0_i32 = arith.constant 0 : i32
    %c0_i32_0 = arith.constant 0 : i32
    %c0_i32_1 = arith.constant 0 : i32
    return %arg0, %c0_i32, %c0_i32_0 : i32, i32, i32
  }
  func.func @transform_4(%arg0: i32) -> (i32, i32, i32) {
    %c0_i32 = arith.constant 0 : i32
    %c0_i32_0 = arith.constant 0 : i32
    %c0_i32_1 = arith.constant 0 : i32
    return %arg0, %c0_i32, %c0_i32_0 : i32, i32, i32
  }
}

</mosaic_0001>

<bundles_post_ra>
// kernel: unet_innermost_block.5
= control target key start
LH: loop header
LB: loop body
LE: loop exit
PB: predicated region body
PF: predicated region fallthrough
CT: control target
= control target key end

     0   :  { %s530_s12 = smov 0   ;;  %s673_s0 = inlined_call_operand.vmem [shape: bf16[2,4,8,8,128], index: 0, kind: input, shape index: {}]   ;;  %s674_s1 = inlined_call_operand.vmem [shape: f32[1,128], index: 1, kind: input, shape index: {}]   ;;  %s675_s2 = inlined_call_operand.vmem [shape: f32[1,128], index: 2, kind: input, shape index: {}]   ;;  %s676_s3 = inlined_call_operand.vmem [shape: f32[2,4,8,8,128], index: 3, kind: output, shape index: {}]  }
   0x1 LB: > { %s400_s13 = sadd.s32 4294967295, %s508_s12   ;;  %p404_p0 = scmp.ge.s32.totalorder %s508_s12, 1  ;;  %s508_s12 = sphi %s530_s12, %s13_s12  }
   0x2   : > { %p137_p1 = scmp.lt.s32.totalorder %s508_s12, 3 }
   0x4   : > { %p138_p2 = pnand %p404_p0, %p137_p1 }
   0x5   : > { %p161_p3 = scmp.lt.s32.totalorder (!%p138_p2), %s400_s13, 1 }
   0x6   : > { %141 = sbr.rel (%p138_p2) target bundleno = 43 (0x2b), region = 32 }
   0xb   : > { %s678_s13 = smov (!%p161_p3, %s400_s13), 1  ;;  %v546_v0 = vld [vmem:[%s674_s1] ss:$0 sm:$0xff] }
   0xc   : > { %s413_s14 = sshll.u32 %s678_s13, 7  ;;  %s414_s20 = sshll.u32 %s678_s13, 8  ;;  %v555_v9 = vld [vmem:[%s675_s2] ss:$0 sm:$0xff] }
   0xd   : > { %s541_s17 = scalar_lea.vmem %s673_s0, %s413_s14  ;;  %s564_s25 = scalar_lea.vmem %s676_s3, %s414_s20 }
   0xe   : > { %v416_v1 = vld [vmem:[%s541_s17] sm:$0xff]   ;;  %v479_v2 = vld [vmem:[%s541_s17 + $0x8] sm:$0xff]   ;;  %v480_v3 = vld [vmem:[%s541_s17 + $0x10] sm:$0xff]  }
   0xf   : > { %v417_v4 = vunpack.c.l.bf16 %v416_v1  ;;  %v418_v5 = vunpack.c.h.bf16 %v416_v1  ;;  %v421_v6 = vunpack.c.l.bf16 %v479_v2  ;;  %v422_v7 = vunpack.c.h.bf16 %v479_v2  ;;  %v481_v8 = vld [vmem:[%s541_s17 + $0x18] sm:$0xff]   ;;  %v482_v22 = vld [vmem:[%s541_s17 + $0x20] sm:$0xff]   ;;  %v483_v23 = vld [vmem:[%s541_s17 + $0x28] sm:$0xff]  }
  0x10   : > { %v425_v10 = vunpack.c.l.bf16 %v480_v3  ;;  %v426_v11 = vunpack.c.h.bf16 %v480_v3  ;;  %v429_v12 = vunpack.c.l.bf16 %v481_v8  ;;  %v430_v13 = vunpack.c.h.bf16 %v481_v8  ;;  %v484_v28 = vld [vmem:[%s541_s17 + $0x30] sm:$0xff]   ;;  %v485_v29 = vld [vmem:[%s541_s17 + $0x38] sm:$0xff]   ;;  %v486_v50 = vld [vmem:[%s541_s17 + $0x40] sm:$0xff]  }
  0x11   : > { %v242_v14 = vmul.f32 %v417_v4, %v546_v0  ;;  %v243_v15 = vmul.f32 %v418_v5, %v546_v0  ;;  %v244_v16 = vmul.f32 %v421_v6, %v546_v0  ;;  %v245_v17 = vmul.f32 %v422_v7, %v546_v0  ;;  %v487_v51 = vld [vmem:[%s541_s17 + $0x48] sm:$0xff]   ;;  %v488_v56 = vld [vmem:[%s541_s17 + $0x50] sm:$0xff]   ;;  %v489_v57 = vld [vmem:[%s541_s17 + $0x58] sm:$0xff]  }
  0x12   : > { %v246_v18 = vmul.f32 %v425_v10, %v546_v0  ;;  %v247_v19 = vmul.f32 %v426_v11, %v546_v0  ;;  %v248_v20 = vmul.f32 %v429_v12, %v546_v0  ;;  %v249_v21 = vmul.f32 %v430_v13, %v546_v0 }
  0x13   : > { %v281_v24 = vadd.f32 %v555_v9, %v242_v14  ;;  %v282_v25 = vadd.f32 %v555_v9, %v243_v15  ;;  %v283_v26 = vadd.f32 %v555_v9, %v244_v16  ;;  %v284_v27 = vadd.f32 %v555_v9, %v245_v17  ;;  %v490_v16 = vld [vmem:[%s541_s17 + $0x60] sm:$0xff]   ;;  %v491_v17 = vld [vmem:[%s541_s17 + $0x68] sm:$0xff]  }
  0x14   : > { %v285_v30 = vadd.f32 %v555_v9, %v246_v18  ;;  %v286_v31 = vadd.f32 %v555_v9, %v247_v19  ;;  %v287_v32 = vadd.f32 %v555_v9, %v248_v20  ;;  %v288_v33 = vadd.f32 %v555_v9, %v249_v21 }
  0x15   : > { %313 = vst [vmem:[%s564_s25] sm:$0xff] %v281_v24  ;;  %314 = vst [vmem:[%s564_s25 + $0x8] sm:$0xff] %v282_v25  ;;  %v433_v34 = vunpack.c.l.bf16 %v482_v22  ;;  %v434_v35 = vunpack.c.h.bf16 %v482_v22  ;;  %v437_v36 = vunpack.c.l.bf16 %v483_v23  ;;  %v438_v37 = vunpack.c.h.bf16 %v483_v23  ;;  %v492_v22 = vld [vmem:[%s541_s17 + $0x70] sm:$0xff]   ;;  %v493_v23 = vld [vmem:[%s541_s17 + $0x78] sm:$0xff]  }
  0x16   : > { %315 = vst [vmem:[%s564_s25 + $0x10] sm:$0xff] %v283_v26  ;;  %316 = vst [vmem:[%s564_s25 + $0x18] sm:$0xff] %v284_v27  ;;  %v441_v38 = vunpack.c.l.bf16 %v484_v28  ;;  %v442_v39 = vunpack.c.h.bf16 %v484_v28  ;;  %v445_v40 = vunpack.c.l.bf16 %v485_v29  ;;  %v446_v41 = vunpack.c.h.bf16 %v485_v29 }
  0x17   : > { %317 = vst [vmem:[%s564_s25 + $0x20] sm:$0xff] %v285_v30  ;;  %318 = vst [vmem:[%s564_s25 + $0x28] sm:$0xff] %v286_v31  ;;  %v250_v42 = vmul.f32 %v433_v34, %v546_v0  ;;  %v251_v43 = vmul.f32 %v434_v35, %v546_v0  ;;  %v252_v44 = vmul.f32 %v437_v36, %v546_v0  ;;  %v449_v62 = vunpack.c.l.bf16 %v486_v50 }
  0x18   : > { %319 = vst [vmem:[%s564_s25 + $0x30] sm:$0xff] %v287_v32  ;;  %320 = vst [vmem:[%s564_s25 + $0x38] sm:$0xff] %v288_v33  ;;  %v253_v45 = vmul.f32 %v438_v37, %v546_v0  ;;  %v254_v46 = vmul.f32 %v441_v38, %v546_v0  ;;  %v255_v47 = vmul.f32 %v442_v39, %v546_v0  ;;  %v450_v63 = vunpack.c.h.bf16 %v486_v50 }
  0x19   : > { %v256_v48 = vmul.f32 %v445_v40, %v546_v0  ;;  %v257_v49 = vmul.f32 %v446_v41, %v546_v0  ;;  %v289_v52 = vadd.f32 %v555_v9, %v250_v42  ;;  %v290_v53 = vadd.f32 %v555_v9, %v251_v43 }
  0x1a   : > { %v291_v54 = vadd.f32 %v555_v9, %v252_v44  ;;  %v292_v55 = vadd.f32 %v555_v9, %v253_v45  ;;  %v293_v58 = vadd.f32 %v555_v9, %v254_v46  ;;  %v294_v59 = vadd.f32 %v555_v9, %v255_v47 }
  0x1b   : > { %v295_v60 = vadd.f32 %v555_v9, %v256_v48  ;;  %v296_v61 = vadd.f32 %v555_v9, %v257_v49  ;;  %321 = vst [vmem:[%s564_s25 + $0x40] sm:$0xff] %v289_v52  ;;  %322 = vst [vmem:[%s564_s25 + $0x48] sm:$0xff] %v290_v53  ;;  %v453_v1 = vunpack.c.l.bf16 %v487_v51  ;;  %v454_v2 = vunpack.c.h.bf16 %v487_v51 }
  0x1c   : > { %323 = vst [vmem:[%s564_s25 + $0x50] sm:$0xff] %v291_v54  ;;  %324 = vst [vmem:[%s564_s25 + $0x58] sm:$0xff] %v292_v55  ;;  %v457_v3 = vunpack.c.l.bf16 %v488_v56  ;;  %v458_v4 = vunpack.c.h.bf16 %v488_v56  ;;  %v461_v5 = vunpack.c.l.bf16 %v489_v57  ;;  %v462_v6 = vunpack.c.h.bf16 %v489_v57 }
  0x1d   : > { %325 = vst [vmem:[%s564_s25 + $0x60] sm:$0xff] %v293_v58  ;;  %326 = vst [vmem:[%s564_s25 + $0x68] sm:$0xff] %v294_v59  ;;  %v258_v7 = vmul.f32 %v449_v62, %v546_v0  ;;  %v259_v8 = vmul.f32 %v450_v63, %v546_v0  ;;  %v260_v10 = vmul.f32 %v453_v1, %v546_v0  ;;  %v465_v28 = vunpack.c.l.bf16 %v490_v16 }
  0x1e   : > { %327 = vst [vmem:[%s564_s25 + $0x70] sm:$0xff] %v295_v60  ;;  %328 = vst [vmem:[%s564_s25 + $0x78] sm:$0xff] %v296_v61  ;;  %v261_v11 = vmul.f32 %v454_v2, %v546_v0  ;;  %v262_v12 = vmul.f32 %v457_v3, %v546_v0  ;;  %v263_v13 = vmul.f32 %v458_v4, %v546_v0  ;;  %v466_v29 = vunpack.c.h.bf16 %v490_v16 }
  0x1f   : > { %v264_v14 = vmul.f32 %v461_v5, %v546_v0  ;;  %v265_v15 = vmul.f32 %v462_v6, %v546_v0  ;;  %v297_v18 = vadd.f32 %v555_v9, %v258_v7  ;;  %v298_v19 = vadd.f32 %v555_v9, %v259_v8 }
  0x20   : > { %v299_v20 = vadd.f32 %v555_v9, %v260_v10  ;;  %v300_v21 = vadd.f32 %v555_v9, %v261_v11  ;;  %v301_v24 = vadd.f32 %v555_v9, %v262_v12  ;;  %v302_v25 = vadd.f32 %v555_v9, %v263_v13 }
  0x21   : > { %v303_v26 = vadd.f32 %v555_v9, %v264_v14  ;;  %v304_v27 = vadd.f32 %v555_v9, %v265_v15  ;;  %329 = vst [vmem:[%s564_s25 + $0x80] sm:$0xff] %v297_v18  ;;  %330 = vst [vmem:[%s564_s25 + $0x88] sm:$0xff] %v298_v19  ;;  %v469_v30 = vunpack.c.l.bf16 %v491_v17  ;;  %v470_v31 = vunpack.c.h.bf16 %v491_v17 }
  0x22   : > { %331 = vst [vmem:[%s564_s25 + $0x90] sm:$0xff] %v299_v20  ;;  %332 = vst [vmem:[%s564_s25 + $0x98] sm:$0xff] %v300_v21  ;;  %v473_v32 = vunpack.c.l.bf16 %v492_v22  ;;  %v474_v33 = vunpack.c.h.bf16 %v492_v22  ;;  %v477_v34 = vunpack.c.l.bf16 %v493_v23  ;;  %v478_v35 = vunpack.c.h.bf16 %v493_v23 }
  0x23   : > { %333 = vst [vmem:[%s564_s25 + $0xa0] sm:$0xff] %v301_v24  ;;  %334 = vst [vmem:[%s564_s25 + $0xa8] sm:$0xff] %v302_v25  ;;  %v266_v36 = vmul.f32 %v465_v28, %v546_v0  ;;  %v267_v37 = vmul.f32 %v466_v29, %v546_v0  ;;  %v268_v38 = vmul.f32 %v469_v30, %v546_v0 }
  0x24   : > { %335 = vst [vmem:[%s564_s25 + $0xb0] sm:$0xff] %v303_v26  ;;  %336 = vst [vmem:[%s564_s25 + $0xb8] sm:$0xff] %v304_v27  ;;  %v269_v39 = vmul.f32 %v470_v31, %v546_v0  ;;  %v270_v40 = vmul.f32 %v473_v32, %v546_v0  ;;  %v271_v41 = vmul.f32 %v474_v33, %v546_v0 }
  0x25   : > { %v272_v42 = vmul.f32 %v477_v34, %v546_v0  ;;  %v273_v43 = vmul.f32 %v478_v35, %v546_v0  ;;  %v305_v44 = vadd.f32 %v555_v9, %v266_v36  ;;  %v306_v45 = vadd.f32 %v555_v9, %v267_v37 }
  0x26   : > { %v307_v46 = vadd.f32 %v555_v9, %v268_v38  ;;  %v308_v47 = vadd.f32 %v555_v9, %v269_v39  ;;  %v309_v48 = vadd.f32 %v555_v9, %v270_v40  ;;  %v310_v49 = vadd.f32 %v555_v9, %v271_v41 }
  0x27   : > { %v311_v50 = vadd.f32 %v555_v9, %v272_v42  ;;  %v312_v51 = vadd.f32 %v555_v9, %v273_v43  ;;  %337 = vst [vmem:[%s564_s25 + $0xc0] sm:$0xff] %v305_v44  ;;  %338 = vst [vmem:[%s564_s25 + $0xc8] sm:$0xff] %v306_v45 }
  0x28   : > { %339 = vst [vmem:[%s564_s25 + $0xd0] sm:$0xff] %v307_v46  ;;  %340 = vst [vmem:[%s564_s25 + $0xd8] sm:$0xff] %v308_v47 }
  0x29   : > { %341 = vst [vmem:[%s564_s25 + $0xe0] sm:$0xff] %v309_v48  ;;  %342 = vst [vmem:[%s564_s25 + $0xe8] sm:$0xff] %v310_v49 }
  0x2a   : > { %343 = vst [vmem:[%s564_s25 + $0xf0] sm:$0xff] %v311_v50  ;;  %344 = vst [vmem:[%s564_s25 + $0xf8] sm:$0xff] %v312_v51 }
  0x2b PF: > { %s13_s12 = sadd.s32 1, %s508_s12  }
  0x2c   : > { %p10_p4 = scmp.ge.s32.totalorder %s13_s12, 4  }
  0x2e   :  { %12 = sbr.rel (!%p10_p4) target bundleno = 1 (0x1), region = 62 }

// kernel: unet_innermost_block.3
= control target key start
LH: loop header
LB: loop body
LE: loop exit
PB: predicated region body
PF: predicated region fallthrough
CT: control target
= control target key end

     0   :  { %s4028_s9 = smov 0   ;;  %s4030_s10 = smov 0   ;;  %s4739_s0 = inlined_call_operand.vmem [shape: bf16[4,2,9,9,8], index: 0, kind: input, shape index: {}]   ;;  %s4740_s1 = inlined_call_operand.vmem [shape: bf16[4,2,2,8,128], index: 1, kind: input, shape index: {}]   ;;  %s4741_s2 = inlined_call_operand.vmem [shape: bf16[2,8,8,128], index: 2, kind: output, shape index: {}]  }
   0x1   :  { %s4032_s11 = smov 0  }
   0x2 LB: > { %s3329_s12 = sadd.s32 4294967295, %s4011_s11   ;;  %s4045_s13 = sadd.s32 1, %s4011_s11   ;;  %s4011_s11 = sphi %s4032_s11, %s4774_s11   ;;  %s4007_s10 = sphi %s4030_s10, %s4773_s10   ;;  %s4003_s9 = sphi %s4028_s9, %s4772_s9  }
   0x3   : > { %s16_s14 = ssub.s32 %s4011_s11, %s4045_s13  ;;  %s19_s15 = sadd.s32 1, %s4007_s10 }
   0x4   : > { %p17_p0 = scmp.eq.s32.totalorder %s16_s14, 0  ;;  %p26_p1 = scmp.ne.s32.totalorder %s4007_s10, %s4003_s9 }
   0x5   : > { %p27_p2 = scmp.eq.s32.totalorder %s4011_s11, 0  ;;  %p3332_p4 = scmp.ge.s32.totalorder %s4011_s11, 2 }
   0x6   : > { %s4054_s16 = scalar_select %p17_p0, %s4007_s10, %s19_s15  }
   0x7   : > { %p28_p3 = por %p27_p2, %p26_p1  ;;  %102 = sbr.rel (%p3332_p4) target bundleno = 35 (0x23), region = 20 }
   0xc   : > { %105 = sbr.rel (!%p28_p3) target bundleno = 35 (0x23), region = 24  ;;  %s107_s17 = sand.u32 (%p28_p3), 1, %s4007_s10  }
   0xd   : > { %s3931_s18 = smul.u32 (%p28_p3), 72, %s4011_s11 }
   0xe   : > { %s3930_s19 = smul.u32 (%p28_p3), 288, %s107_s17 }
   0xf   : > { %s4062_s22 = scalar_lea.vmem (%p28_p3), %s4739_s0, %s3931_s18 }
  0x10   : > { %v129_v0 = vld [vmem:[%s4062_s22] sm:$0xff] (%p28_p3)   ;;  %v133_v1 = vld [vmem:[%s4062_s22 + $0x8] sm:$0xff] (%p28_p3)   ;;  %v137_v2 = vld [vmem:[%s4062_s22 + $0x10] sm:$0xff] (%p28_p3)   ;;  %s4067_s23 = scalar_lea.vmem (%p28_p3), [#allocation2], %s3930_s19 }
  0x11   : > { %130 = vst [vmem:[%s4067_s23] sm:$0xff] %v129_v0   ;;  %134 = vst [vmem:[%s4067_s23 + $0x8] sm:$0xff] %v133_v1   ;;  %v141_v3 = vld [vmem:[%s4062_s22 + $0x18] sm:$0xff]   ;;  %v145_v4 = vld [vmem:[%s4062_s22 + $0x20] sm:$0xff]  }
  0x12   : > { %138 = vst [vmem:[%s4067_s23 + $0x10] sm:$0xff] %v137_v2   ;;  %v149_v5 = vld [vmem:[%s4062_s22 + $0x28] sm:$0xff]   ;;  %142 = vst [vmem:[%s4067_s23 + $0x18] sm:$0xff] %v141_v3   ;;  %v153_v6 = vld [vmem:[%s4062_s22 + $0x30] sm:$0xff]  }
  0x13   : > { %146 = vst [vmem:[%s4067_s23 + $0x20] sm:$0xff] %v145_v4   ;;  %150 = vst [vmem:[%s4067_s23 + $0x28] sm:$0xff] %v149_v5   ;;  %v157_v7 = vld [vmem:[%s4062_s22 + $0x38] sm:$0xff]   ;;  %v161_v8 = vld [vmem:[%s4062_s22 + $0x40] sm:$0xff]  }
  0x14   : > { %154 = vst [vmem:[%s4067_s23 + $0x30] sm:$0xff] %v153_v6   ;;  %158 = vst [vmem:[%s4067_s23 + $0x38] sm:$0xff] %v157_v7   ;;  %v165_v9 = vld [vmem:[%s4062_s22 + $0x90] sm:$0xff]   ;;  %v169_v10 = vld [vmem:[%s4062_s22 + $0x98] sm:$0xff]  }
  0x15   : > { %162 = vst [vmem:[%s4067_s23 + $0x40] sm:$0xff] %v161_v8   ;;  %v173_v11 = vld [vmem:[%s4062_s22 + $0xa0] sm:$0xff]   ;;  %166 = vst [vmem:[%s4067_s23 + $0x48] sm:$0xff] %v165_v9   ;;  %v177_v12 = vld [vmem:[%s4062_s22 + $0xa8] sm:$0xff]  }
  0x16   : > { %170 = vst [vmem:[%s4067_s23 + $0x50] sm:$0xff] %v169_v10   ;;  %174 = vst [vmem:[%s4067_s23 + $0x58] sm:$0xff] %v173_v11   ;;  %v181_v13 = vld [vmem:[%s4062_s22 + $0xb0] sm:$0xff]   ;;  %v185_v14 = vld [vmem:[%s4062_s22 + $0xb8] sm:$0xff]  }
  0x17   : > { %178 = vst [vmem:[%s4067_s23 + $0x60] sm:$0xff] %v177_v12   ;;  %182 = vst [vmem:[%s4067_s23 + $0x68] sm:$0xff] %v181_v13   ;;  %v189_v15 = vld [vmem:[%s4062_s22 + $0xc0] sm:$0xff]   ;;  %v193_v16 = vld [vmem:[%s4062_s22 + $0xc8] sm:$0xff]  }
  0x18   : > { %186 = vst [vmem:[%s4067_s23 + $0x70] sm:$0xff] %v185_v14   ;;  %v197_v17 = vld [vmem:[%s4062_s22 + $0xd0] sm:$0xff]   ;;  %190 = vst [vmem:[%s4067_s23 + $0x78] sm:$0xff] %v189_v15   ;;  %v201_v18 = vld [vmem:[%s4062_s22 + $0x120] sm:$0xff]  }
  0x19   : > { %194 = vst [vmem:[%s4067_s23 + $0x80] sm:$0xff] %v193_v16   ;;  %198 = vst [vmem:[%s4067_s23 + $0x88] sm:$0xff] %v197_v17   ;;  %v205_v19 = vld [vmem:[%s4062_s22 + $0x128] sm:$0xff]   ;;  %v209_v20 = vld [vmem:[%s4062_s22 + $0x130] sm:$0xff]  }
  0x1a   : > { %202 = vst [vmem:[%s4067_s23 + $0x90] sm:$0xff] %v201_v18   ;;  %206 = vst [vmem:[%s4067_s23 + $0x98] sm:$0xff] %v205_v19   ;;  %v213_v21 = vld [vmem:[%s4062_s22 + $0x138] sm:$0xff]   ;;  %v217_v22 = vld [vmem:[%s4062_s22 + $0x140] sm:$0xff]  }
  0x1b   : > { %210 = vst [vmem:[%s4067_s23 + $0xa0] sm:$0xff] %v209_v20   ;;  %v221_v23 = vld [vmem:[%s4062_s22 + $0x148] sm:$0xff]   ;;  %214 = vst [vmem:[%s4067_s23 + $0xa8] sm:$0xff] %v213_v21   ;;  %v225_v24 = vld [vmem:[%s4062_s22 + $0x150] sm:$0xff]  }
  0x1c   : > { %218 = vst [vmem:[%s4067_s23 + $0xb0] sm:$0xff] %v217_v22   ;;  %222 = vst [vmem:[%s4067_s23 + $0xb8] sm:$0xff] %v221_v23   ;;  %v229_v25 = vld [vmem:[%s4062_s22 + $0x158] sm:$0xff]   ;;  %v233_v26 = vld [vmem:[%s4062_s22 + $0x160] sm:$0xff]  }
  0x1d   : > { %226 = vst [vmem:[%s4067_s23 + $0xc0] sm:$0xff] %v225_v24   ;;  %230 = vst [vmem:[%s4067_s23 + $0xc8] sm:$0xff] %v229_v25   ;;  %v237_v27 = vld [vmem:[%s4062_s22 + $0x1b0] sm:$0xff]   ;;  %v241_v28 = vld [vmem:[%s4062_s22 + $0x1b8] sm:$0xff]  }
  0x1e   : > { %234 = vst [vmem:[%s4067_s23 + $0xd0] sm:$0xff] %v233_v26   ;;  %v245_v29 = vld [vmem:[%s4062_s22 + $0x1c0] sm:$0xff]   ;;  %238 = vst [vmem:[%s4067_s23 + $0xd8] sm:$0xff] %v237_v27   ;;  %v249_v30 = vld [vmem:[%s4062_s22 + $0x1c8] sm:$0xff]  }
  0x1f   : > { %242 = vst [vmem:[%s4067_s23 + $0xe0] sm:$0xff] %v241_v28   ;;  %246 = vst [vmem:[%s4067_s23 + $0xe8] sm:$0xff] %v245_v29   ;;  %v253_v31 = vld [vmem:[%s4062_s22 + $0x1d0] sm:$0xff]   ;;  %v257_v32 = vld [vmem:[%s4062_s22 + $0x1d8] sm:$0xff]  }
  0x20   : > { %250 = vst [vmem:[%s4067_s23 + $0xf0] sm:$0xff] %v249_v30   ;;  %254 = vst [vmem:[%s4067_s23 + $0xf8] sm:$0xff] %v253_v31   ;;  %v261_v33 = vld [vmem:[%s4062_s22 + $0x1e0] sm:$0xff]   ;;  %v265_v34 = vld [vmem:[%s4062_s22 + $0x1e8] sm:$0xff]  }
  0x21   : > { %258 = vst [vmem:[%s4067_s23 + $0x100] sm:$0xff] %v257_v32   ;;  %v269_v35 = vld [vmem:[%s4062_s22 + $0x1f0] sm:$0xff]   ;;  %262 = vst [vmem:[%s4067_s23 + $0x108] sm:$0xff] %v261_v33  }
  0x22   : > { %266 = vst [vmem:[%s4067_s23 + $0x110] sm:$0xff] %v265_v34   ;;  %270 = vst [vmem:[%s4067_s23 + $0x118] sm:$0xff] %v269_v35  }
  0x23 PF: > { %p3334_p5 = scmp.ge.s32.totalorder %s4011_s11, 1  ;;  %p439_p6 = scmp.lt.s32.totalorder %s4011_s11, 3 }
  0x25   : > { %p440_p7 = pnand %p3334_p5, %p439_p6 }
  0x27   : > { %443 = sbr.rel (%p440_p7) target bundleno = 417 (0x1a1), region = 65 }
  0x2c   : > { %v481_v36 = vld [vmem:[%s4740_s1] sm:$0xf]  ;;  %vm632_vm0 = vcmask 1043456   ;;  %v3337_v37 = vld [vmem:[%s4740_s1 + $0x4] sm:$0xf]  ;;  %s446_s28 = sand.u32 1, %s4003_s9  }
  0x2d   : > { %3915 = vmatprep.subr.msk.bf16.mxu1 %vm632_vm0, %v481_v36  ;;  %v734_v38 = vsel %vm632_vm0, %v481_v36, 0  ;;  %3914 = vmatprep.subr.msk.bf16.mxu0 %vm632_vm0, %v3337_v37  ;;  %s3932_s29 = smul.u32 288, %s446_s28  ;;  %v634_v39 = vsel %vm632_vm0, %v3337_v37, 0  ;;  %vm490_vm1 = vsmask.f32 3328  ;;  %vm619_vm2 = vcmask 64512  }
  0x2e   : > { %3765 = vmatpush3.bf16.msra.mxu1 %v734_v38  ;;  %3755 = vmatpush3.bf16.msra.mxu0 %v634_v39  ;;  %v3362_v40 = vld [vmem:[%s4740_s1 + $0x8] sm:$0xf]  ;;  %v3387_v41 = vld [vmem:[%s4740_s1 + $0xc] sm:$0xf]  ;;  %vm491_vm3 = vsmask.f32 7440 }
  0x2f   : > { %3916 = vmatprep.subr.msk.bf16.mxu0 %vm632_vm0, %v3362_v40  ;;  %v4159_v42 = vsel %vm632_vm0, %v3362_v40, 0  ;;  %3917 = vmatprep.subr.msk.bf16.mxu1 %vm632_vm0, %v3387_v41  ;;  %v1075_v43 = vsel %vm632_vm0, %v3387_v41, 0  ;;  %s4163_s6 = scalar_lea.vmem [#allocation2], %s3932_s29  ;;  %vm4176_vm4 = vmor %vm490_vm1, %vm491_vm3  ;;  %p467_p8 = scmp.lt.s32.totalorder %s3329_s12, 1 }
  0x30   : > { %v473_v44 = vld [vmem:[%s4163_s6] sm:$0xf]  ;;  %v474_v45 = vld [vmem:[%s4163_s6 + $0x8] sm:$0xf]  ;;  %v475_v46 = vld [vmem:[%s4163_s6 + $0x10] sm:$0xf] }
  0x31   : > { %v494_v47 = vshrl.u32 %v473_v44, 16  ;;  %v497_v48 = vshll.u32 %v473_v44, 16  ;;  %v508_v49 = vshrl.u32 %v474_v45, 16  ;;  %v511_v50 = vshll.u32 %v474_v45, 16  ;;  %v476_v51 = vld [vmem:[%s4163_s6 + $0x18] sm:$0xf] }
  0x32   : > { %v3346_v52 = vcombine.low %v473_v44, %v474_v45  ;;  %v522_v53 = vshrl.u32 %v475_v46, 16  ;;  %v525_v54 = vshll.u32 %v475_v46, 16  ;;  %v536_v55 = vshrl.u32 %v476_v51, 16  ;;  %v482_v56 = vld [vmem:[%s4163_s6 + $0x4] sm:$0x1]  ;;  %s4776_s12 = smov (!%p467_p8, %s3329_s12), 1 }
  0x33   : > { %v496_v57 = vrot.slane %v494_v47, 4  ;;  %v499_v58 = vrot.slane %v497_v48, 5  ;;  %v510_v59 = vrot.slane %v508_v49, 4  ;;  %v513_v60 = vrot.slane %v511_v50, 5  ;;  %v483_v61 = vld [vmem:[%s4163_s6 + $0xc] sm:$0x1] }
  0x34   : > { %3766 = vmatprep.mubr.msk.bf16.mxu1 %vm619_vm2, %v3346_v52  ;;  %v524_v62 = vrot.slane %v522_v53, 4  ;;  %v527_v63 = vrot.slane %v525_v54, 5  ;;  %v538_v0 = vrot.slane %v536_v55, 4  ;;  %v539_v1 = vshll.u32 %v476_v51, 16  ;;  %v484_v2 = vld [vmem:[%s4163_s6 + $0x14] sm:$0x1] }
  0x35   : > { %v3347_v3 = vcombine.low %v475_v46, %v476_v51  ;;  %v500_v4 = vor.u32 %v499_v58, %v496_v57  ;;  %v503_v5 = vshll.u32 %v482_v56, 16  ;;  %v514_v6 = vor.u32 %v513_v60, %v510_v59  ;;  %v485_v7 = vld [vmem:[%s4163_s6 + $0x1c] sm:$0x1]  ;;  %v477_v13 = vld [vmem:[%s4163_s6 + $0x20] sm:$0xf]  ;;  %s3650_s11 = sshll.u32 %s4776_s12, 5 }
  0x36   : > { %v541_v8 = vrot.slane %v539_v1, 5  ;;  %v517_v10 = vshll.u32 %v483_v61, 16  ;;  %v528_v11 = vor.u32 %v527_v63, %v524_v62  ;;  %v531_v12 = vshll.u32 %v484_v2, 16  ;;  %v478_v18 = vld [vmem:[%s4163_s6 + $0x28] sm:$0xf]  ;;  %s471_s14 = scalar_lea.vmem %s4741_s2, %s3650_s11 }
  0x37   : > { %3767 = vmatmul.mubr.msk.bf16.vlgmr.msra.gmra.mxu1 %vm619_vm2, %v3347_v3  ;;  %v501_v14 = vrot.slane %v500_v4, 4  ;;  %v505_v15 = vrot.slane %v503_v5, 5  ;;  %v515_v16 = vrot.slane %v514_v6, 4  ;;  %v545_v17 = vshll.u32 %v485_v7, 16  ;;  %v479_v27 = vld [vmem:[%s4163_s6 + $0x30] sm:$0xf] }
  0x38   : > { %v519_v19 = vrot.slane %v517_v10, 5  ;;  %v529_v20 = vrot.slane %v528_v11, 4  ;;  %v533_v21 = vrot.slane %v531_v12, 5  ;;  %v542_v22 = vor.u32 %v541_v8, %v538_v0  ;;  %3785 = vmatpush3.bf16.msra.mxu1 %v1075_v43  ;;  %v480_v32 = vld [vmem:[%s4163_s6 + $0x38] sm:$0xf] }
  0x39   : > { %v506_v23 = vsel %vm4176_vm4, %v501_v14, %v505_v15  ;;  %v547_v24 = vrot.slane %v545_v17, 5  ;;  %v550_v25 = vshrl.u32 %v477_v13, 16  ;;  %v553_v26 = vshll.u32 %v477_v13, 16  ;;  %v486_v41 = vld [vmem:[%s4163_s6 + $0x24] sm:$0x1] }
  0x3a   : > { %v520_v28 = vsel %vm4176_vm4, %v515_v16, %v519_v19  ;;  %v534_v29 = vsel %vm4176_vm4, %v529_v20, %v533_v21  ;;  %v543_v30 = vrot.slane %v542_v22, 4  ;;  %v564_v31 = vshrl.u32 %v478_v18, 16  ;;  %v487_v43 = vld [vmem:[%s4163_s6 + $0x2c] sm:$0x1]  ;;  %v4198_v44 = vld [vmem:[%s4740_s1 + $0x10] sm:$0xf] }
  0x3b   : > { %v3338_v33 = vcombine.low %v506_v23, %v520_v28  ;;  %v552_v34 = vrot.slane %v550_v25, 4  ;;  %v555_v35 = vrot.slane %v553_v26, 5  ;;  %v567_v36 = vshll.u32 %v478_v18, 16  ;;  %v488_v49 = vld [vmem:[%s4163_s6 + $0x34] sm:$0x1] }
  0x3c   : > { %v548_v37 = vsel %vm4176_vm4, %v543_v30, %v547_v24  ;;  %v566_v38 = vrot.slane %v564_v31, 4  ;;  %v3348_v39 = vcombine.low %v477_v13, %v478_v18  ;;  %v578_v40 = vshrl.u32 %v479_v27, 16  ;;  %v489_v54 = vld [vmem:[%s4163_s6 + $0x3c] sm:$0x1]  ;;  %v3371_v55 = vld [vmem:[%s4163_s6 + $0x8] sm:$0xf] }
  0x3d   : > { %3756 = vmatprep.mubr.msk.bf16.mxu0 %vm619_vm2, %v3338_v33  ;;  %v3339_v45 = vcombine.low %v534_v29, %v548_v37  ;;  %v569_v46 = vrot.slane %v567_v36, 5  ;;  %v581_v47 = vshll.u32 %v479_v27, 16  ;;  %v592_v48 = vshrl.u32 %v480_v32, 16  ;;  %v3372_v60 = vld [vmem:[%s4163_s6 + $0xc] sm:$0x1] }
  0x3e   : > { %3770 = vmatprep.mubr.msk.bf16.mxu1 %vm619_vm2, %v3348_v39  ;;  %v580_v50 = vrot.slane %v578_v40, 4  ;;  %v595_v51 = vshll.u32 %v480_v32, 16  ;;  %v3349_v52 = vcombine.low %v479_v27, %v480_v32  ;;  %v556_v53 = vor.u32 %v555_v35, %v552_v34  ;;  %v3373_v1 = vld [vmem:[%s4163_s6 + $0x10] sm:$0xf]  ;;  %v3374_v6 = vld [vmem:[%s4163_s6 + $0x14] sm:$0x1] }
  0x3f   : > { %3757 = vmatmul.mubr.msk.bf16.vlgmr.msra.gmra.mxu0 %vm619_vm2, %v3339_v45  ;;  %v583_v56 = vrot.slane %v581_v47, 5  ;;  %v594_v57 = vrot.slane %v592_v48, 4  ;;  %v559_v58 = vshll.u32 %v486_v41, 16  ;;  %v570_v59 = vor.u32 %v569_v46, %v566_v38  ;;  %v3375_v11 = vld [vmem:[%s4163_s6 + $0x18] sm:$0xf] }
  0x40   : > { %3775 = vmatpush3.bf16.msra.mxu0 %v4159_v42  ;;  %v597_v61 = vrot.slane %v595_v51, 5  ;;  %3771 = vmatmul.mubr.msk.bf16.gmra.mxu1 %vm619_vm2, %v3349_v52  ;;  %v557_v62 = vrot.slane %v556_v53, 4  ;;  %v573_v63 = vshll.u32 %v487_v43, 16  ;;  %v587_v0 = vshll.u32 %v488_v49, 16  ;;  %v3376_v16 = vld [vmem:[%s4163_s6 + $0x1c] sm:$0x1] }
  0x41   : > { %v561_v2 = vrot.slane %v559_v58, 5  ;;  %v571_v3 = vrot.slane %v570_v59, 4  ;;  %v584_v4 = vor.u32 %v583_v56, %v580_v50  ;;  %v601_v5 = vshll.u32 %v489_v54, 16  ;;  %3918 = vmatprep.subr.msk.bf16.mxu0 %vm632_vm0, %v4198_v44  ;;  %v3377_v21 = vld [vmem:[%s4163_s6 + $0x20] sm:$0xf] }
  0x42   : > { %v575_v7 = vrot.slane %v573_v63, 5  ;;  %v589_v42 = vrot.slane %v587_v0, 5  ;;  %v598_v8 = vor.u32 %v597_v61, %v594_v57  ;;  %v937_v10 = vshrl.u32 %v3371_v55, 16  ;;  %v3961_v30 = vld [vmem:[%s4163_s6 + $0x8] ss:$8 sps:$4 sm:$0xff]  }
  0x43   : > { %v562_v12 = vsel %vm4176_vm4, %v557_v62, %v561_v2  ;;  %v585_v13 = vrot.slane %v584_v4, 4  ;;  %v603_v14 = vrot.slane %v601_v5, 5  ;;  %v940_v15 = vshll.u32 %v3371_v55, 16  ;;  %v3378_v34 = vld [vmem:[%s4163_s6 + $0x24] sm:$0x1] }
  0x44   : > { %v576_v17 = vsel %vm4176_vm4, %v571_v3, %v575_v7  ;;  %v599_v18 = vrot.slane %v598_v8, 4  ;;  %v939_v19 = vrot.slane %v937_v10, 4  ;;  %v946_v20 = vshll.u32 %v3372_v60, 16  ;;  %v3429_v36 = vld [vmem:[%s4740_s1 + $0x14] sm:$0xf] }
  0x45   : > { %v3340_v22 = vcombine.low %v562_v12, %v576_v17  ;;  %v590_v23 = vsel %vm4176_vm4, %v585_v13, %v589_v42  ;;  %v942_v24 = vrot.slane %v940_v15, 5  ;;  %v951_v25 = vshrl.u32 %v3373_v1, 16  ;;  %3919 = vmatprep.subr.msk.bf16.mxu1 %vm632_vm0, %v3429_v36  ;;  %v3379_v47 = vld [vmem:[%s4163_s6 + $0x28] sm:$0xf]  ;;  %v3380_v52 = vld [vmem:[%s4163_s6 + $0x2c] sm:$0x1] }
  0x46   : > { %v604_v26 = vsel %vm4176_vm4, %v599_v18, %v603_v14  ;;  %v948_v27 = vrot.slane %v946_v20, 5  ;;  %v954_v28 = vshll.u32 %v3373_v1, 16  ;;  %v960_v29 = vshll.u32 %v3374_v6, 16  ;;  %v3962_v56 = vld [vmem:[%s4163_s6 + $0x18] ss:$8 sps:$4 sm:$0xff]  }
  0x47   : > { %3760 = vmatprep.mubr.msk.bf16.mxu0 %vm619_vm2, %v3340_v22  ;;  %v3341_v31 = vcombine.low %v590_v23, %v604_v26  ;;  %v943_v32 = vor.u32 %v942_v24, %v939_v19  ;;  %v953_v33 = vrot.slane %v951_v25, 4  ;;  %v965_v35 = vshrl.u32 %v3375_v11, 16  ;;  %v3381_v58 = vld [vmem:[%s4163_s6 + $0x30] sm:$0xf]  ;;  %v3382_v63 = vld [vmem:[%s4163_s6 + $0x34] sm:$0x1] }
  0x48   : > { %v956_v37 = vrot.slane %v954_v28, 5  ;;  %v962_v38 = vrot.slane %v960_v29, 5  ;;  %v968_v39 = vshll.u32 %v3375_v11, 16  ;;  %v974_v40 = vshll.u32 %v3376_v16, 16  ;;  %v3383_v0 = vld [vmem:[%s4163_s6 + $0x38] sm:$0xf] }
  0x49   : > { %3761 = vmatmul.mubr.msk.bf16.gmra.mxu0 %vm619_vm2, %v3341_v31  ;;  %v944_v41 = vrot.slane %v943_v32, 4  ;;  %v967_v43 = vrot.slane %v965_v35, 4  ;;  %v979_v45 = vshrl.u32 %v3377_v21, 16  ;;  %v982_v46 = vshll.u32 %v3377_v21, 16  ;;  %v3384_v5 = vld [vmem:[%s4163_s6 + $0x3c] sm:$0x1] }
  0x4a   : > { %v957_v48 = vor.u32 %v956_v37, %v953_v33  ;;  %v970_v49 = vrot.slane %v968_v39, 5  ;;  %v976_v50 = vrot.slane %v974_v40, 5  ;;  %v988_v51 = vshll.u32 %v3378_v34, 16  ;;  %3776 = vmatprep.mubr.msk.bf16.mxu0 %vm619_vm2, %v3961_v30  ;;  %v3385_v8 = vld [vmem:[%s4163_s6 + $0x40] sm:$0xf] }
  0x4b   : > { %v949_v53 = vsel %vm4176_vm4, %v944_v41, %v948_v27  ;;  %v981_v54 = vrot.slane %v979_v45, 4  ;;  %v984_v55 = vrot.slane %v982_v46, 5  ;;  %v1194_v57 = vsel %vm632_vm0, %v4198_v44, 0  ;;  %v3963_v22 = vld [vmem:[%s4163_s6 + $0x28] ss:$8 sps:$4 sm:$0xff]  }
  0x4c   : > { %v958_v59 = vrot.slane %v957_v48, 4  ;;  %v971_v60 = vor.u32 %v970_v49, %v967_v43  ;;  %v990_v61 = vrot.slane %v988_v51, 5  ;;  %v1424_v62 = vsel %vm632_vm0, %v3429_v36, 0  ;;  %v3386_v25 = vld [vmem:[%s4163_s6 + $0x44] sm:$0x1] }
  0x4d   : > { %v985_v1 = vor.u32 %v984_v55, %v981_v54  ;;  %v993_v2 = vshrl.u32 %v3379_v47, 16  ;;  %v996_v3 = vshll.u32 %v3379_v47, 16  ;;  %v1002_v4 = vshll.u32 %v3380_v52, 16  ;;  %v3964_v32 = vld [vmem:[%s4163_s6 + $0x38] ss:$8 sps:$4 sm:$0xff]  }
  0x4e   : > { %v963_v6 = vsel %vm4176_vm4, %v958_v59, %v962_v38  ;;  %v972_v7 = vrot.slane %v971_v60, 4  ;;  %v1007_v42 = vshrl.u32 %v3381_v58, 16  ;;  %v1010_v44 = vshll.u32 %v3381_v58, 16  ;;  %v3413_v33 = vld [vmem:[%s4163_s6 + $0x48] sm:$0xf] }
  0x4f   : > { %v3388_v10 = vcombine.low %v949_v53, %v963_v6  ;;  %v986_v11 = vrot.slane %v985_v1, 4  ;;  %v995_v12 = vrot.slane %v993_v2, 4  ;;  %v998_v13 = vrot.slane %v996_v3, 5  ;;  %v3414_v37 = vld [vmem:[%s4163_s6 + $0x4c] sm:$0x1] }
  0x50   : > { %v977_v14 = vsel %vm4176_vm4, %v972_v7, %v976_v50  ;;  %v1004_v15 = vrot.slane %v1002_v4, 5  ;;  %v1009_v16 = vrot.slane %v1007_v42, 4  ;;  %v1012_v17 = vrot.slane %v1010_v44, 5  ;;  %v3415_v43 = vld [vmem:[%s4163_s6 + $0x50] sm:$0xf] }
  0x51   : > { %3786 = vmatprep.mubr.msk.bf16.mxu1 %vm619_vm2, %v3388_v10  ;;  %v991_v18 = vsel %vm4176_vm4, %v986_v11, %v990_v61  ;;  %3777 = vmatmul.mubr.msk.bf16.vlgmr.msra.gmra.mxu0 %vm619_vm2, %v3962_v56  ;;  %v999_v19 = vor.u32 %v998_v13, %v995_v12  ;;  %v1016_v20 = vshll.u32 %v3382_v63, 16  ;;  %v1021_v21 = vshrl.u32 %v3383_v0, 16  ;;  %v3416_v48 = vld [vmem:[%s4163_s6 + $0x54] sm:$0x1]  ;;  %v3417_v50 = vld [vmem:[%s4163_s6 + $0x58] sm:$0xf] }
  0x52   : > { %v3389_v23 = vcombine.low %v977_v14, %v991_v18  ;;  %3795 = vmatpush3.bf16.msra.mxu0 %v1194_v57  ;;  %v1013_v24 = vor.u32 %v1012_v17, %v1009_v16  ;;  %v1024_v26 = vshll.u32 %v3383_v0, 16  ;;  %v1030_v27 = vshll.u32 %v3384_v5, 16  ;;  %3780 = vmatprep.mubr.msk.bf16.mxu0 %vm619_vm2, %v3963_v22  ;;  %v3418_v55 = vld [vmem:[%s4163_s6 + $0x5c] sm:$0x1]  ;;  %v3419_v60 = vld [vmem:[%s4163_s6 + $0x60] sm:$0xf] }
  0x53   : > { %v1000_v28 = vrot.slane %v999_v19, 4  ;;  %v1018_v29 = vrot.slane %v1016_v20, 5  ;;  %v1023_v30 = vrot.slane %v1021_v21, 4  ;;  %v1035_v31 = vshrl.u32 %v3385_v8, 16  ;;  %v3420_v1 = vld [vmem:[%s4163_s6 + $0x64] sm:$0x1] }
  0x54   : > { %3787 = vmatmul.mubr.msk.bf16.vlgmr.msra.gmra.mxu1 %vm619_vm2, %v3389_v23  ;;  %v1014_v34 = vrot.slane %v1013_v24, 4  ;;  %v1026_v35 = vrot.slane %v1024_v26, 5  ;;  %v1038_v36 = vshll.u32 %v3385_v8, 16  ;;  %v1032_v39 = vrot.slane %v1030_v27, 5  ;;  %v3965_v8 = vld [vmem:[%s4163_s6 + $0x48] ss:$8 sps:$4 sm:$0xff]  }
  0x55   : > { %3805 = vmatpush3.bf16.msra.mxu1 %v1424_v62  ;;  %v1005_v38 = vsel %vm4176_vm4, %v1000_v28, %v1004_v15  ;;  %v1037_v40 = vrot.slane %v1035_v31, 4  ;;  %v1044_v41 = vshll.u32 %v3386_v25, 16  ;;  %v1286_v49 = vshrl.u32 %v3413_v33, 16  ;;  %v3446_v14 = vld [vmem:[%s4740_s1 + $0x18] sm:$0xf] }
  0x56   : > { %v1019_v45 = vsel %vm4176_vm4, %v1014_v34, %v1018_v29  ;;  %v1027_v46 = vor.u32 %v1026_v35, %v1023_v30  ;;  %v1040_v47 = vrot.slane %v1038_v36, 5  ;;  %v1289_v53 = vshll.u32 %v3413_v33, 16  ;;  %3920 = vmatprep.subr.msk.bf16.mxu0 %vm632_vm0, %v3446_v14  ;;  %v3966_v23 = vld [vmem:[%s4163_s6 + $0x58] ss:$8 sps:$4 sm:$0xff]   ;;  %v3471_v28 = vld [vmem:[%s4740_s1 + $0x1c] sm:$0xf] }
  0x57   : > { %v3390_v51 = vcombine.low %v1005_v38, %v1019_v45  ;;  %v1046_v52 = vrot.slane %v1044_v41, 5  ;;  %v1295_v54 = vshll.u32 %v3414_v37, 16  ;;  %v1288_v58 = vrot.slane %v1286_v49, 4  ;;  %v3421_v29 = vld [vmem:[%s4163_s6 + $0x68] sm:$0xf]  ;;  %3921 = vmatprep.subr.msk.bf16.mxu1 %vm632_vm0, %v3471_v28 }
  0x58   : > { %v1028_v56 = vrot.slane %v1027_v46, 4  ;;  %v1041_v57 = vor.u32 %v1040_v47, %v1037_v40  ;;  %v1300_v59 = vshrl.u32 %v3415_v43, 16  ;;  %v1291_v61 = vrot.slane %v1289_v53, 5  ;;  %v3422_v33 = vld [vmem:[%s4163_s6 + $0x6c] sm:$0x1] }
  0x59   : > { %3790 = vmatprep.mubr.msk.bf16.mxu1 %vm619_vm2, %v3390_v51  ;;  %3781 = vmatmul.mubr.msk.bf16.gmra.mxu0 %vm619_vm2, %v3964_v32  ;;  %v1297_v62 = vrot.slane %v1295_v54, 5  ;;  %v1303_v63 = vshll.u32 %v3415_v43, 16  ;;  %v1309_v0 = vshll.u32 %v3416_v48, 16  ;;  %v1314_v5 = vshrl.u32 %v3417_v50, 16  ;;  %v3423_v37 = vld [vmem:[%s4163_s6 + $0x70] sm:$0xf] }
  0x5a   : > { %v1033_v2 = vsel %vm4176_vm4, %v1028_v56, %v1032_v39  ;;  %v1042_v3 = vrot.slane %v1041_v57, 4  ;;  %v1302_v4 = vrot.slane %v1300_v59, 4  ;;  %v1292_v6 = vor.u32 %v1291_v61, %v1288_v58  ;;  %3796 = vmatprep.mubr.msk.bf16.mxu0 %vm619_vm2, %v3965_v8  ;;  %v3424_v38 = vld [vmem:[%s4163_s6 + $0x74] sm:$0x1]  ;;  %v3425_v46 = vld [vmem:[%s4163_s6 + $0x78] sm:$0xf] }
  0x5b   : > { %v1305_v7 = vrot.slane %v1303_v63, 5  ;;  %v1311_v42 = vrot.slane %v1309_v0, 5  ;;  %v1317_v44 = vshll.u32 %v3417_v50, 16  ;;  %v1316_v11 = vrot.slane %v1314_v5, 4  ;;  %v3426_v47 = vld [vmem:[%s4163_s6 + $0x7c] sm:$0x1] }
  0x5c   : > { %v1047_v10 = vsel %vm4176_vm4, %v1042_v3, %v1046_v52  ;;  %v1323_v12 = vshll.u32 %v3418_v55, 16  ;;  %v1328_v13 = vshrl.u32 %v3419_v60, 16  ;;  %v1293_v16 = vrot.slane %v1292_v6, 4  ;;  %v3427_v52 = vld [vmem:[%s4163_s6 + $0x80] sm:$0xf] }
  0x5d   : > { %v3391_v15 = vcombine.low %v1033_v2, %v1047_v10  ;;  %v1306_v17 = vor.u32 %v1305_v7, %v1302_v4  ;;  %v1319_v18 = vrot.slane %v1317_v44, 5  ;;  %v1331_v21 = vshll.u32 %v3419_v60, 16  ;;  %v3428_v56 = vld [vmem:[%s4163_s6 + $0x84] sm:$0x1]  ;;  %v3967_v6 = vld [vmem:[%s4163_s6 + $0x68] ss:$8 sps:$4 sm:$0xff]  }
  0x5e   : > { %v1325_v19 = vrot.slane %v1323_v12, 5  ;;  %v1330_v20 = vrot.slane %v1328_v13, 4  ;;  %v1337_v22 = vshll.u32 %v3420_v1, 16  ;;  %v1298_v24 = vsel %vm4176_vm4, %v1293_v16, %v1297_v62  ;;  %v3968_v13 = vld [vmem:[%s4163_s6 + $0x78] ss:$8 sps:$4 sm:$0xff]  }
  0x5f   : > { %3791 = vmatmul.mubr.msk.bf16.gmra.mxu1 %vm619_vm2, %v3391_v15  ;;  %v1307_v25 = vrot.slane %v1306_v17, 4  ;;  %v1320_v26 = vor.u32 %v1319_v18, %v1316_v11  ;;  %v1543_v27 = vsel %vm632_vm0, %v3446_v14, 0  ;;  %v1333_v30 = vrot.slane %v1331_v21, 5  ;;  %v3455_v14 = vld [vmem:[%s4163_s6 + $0x50] sm:$0xf] }
  0x60   : > { %v1339_v31 = vrot.slane %v1337_v22, 5  ;;  %v1773_v32 = vsel %vm632_vm0, %v3471_v28, 0  ;;  %v1342_v34 = vshrl.u32 %v3421_v29, 16  ;;  %v1345_v39 = vshll.u32 %v3421_v29, 16  ;;  %v3456_v18 = vld [vmem:[%s4163_s6 + $0x54] sm:$0x1] }
  0x61   : > { %v1312_v35 = vsel %vm4176_vm4, %v1307_v25, %v1311_v42  ;;  %v1321_v36 = vrot.slane %v1320_v26, 4  ;;  %3797 = vmatmul.mubr.msk.bf16.vlgmr.msra.gmra.mxu0 %vm619_vm2, %v3966_v23  ;;  %v1334_v41 = vor.u32 %v1333_v30, %v1330_v20  ;;  %v1351_v45 = vshll.u32 %v3422_v33, 16  ;;  %v3457_v22 = vld [vmem:[%s4163_s6 + $0x58] sm:$0xf]  ;;  %v3458_v23 = vld [vmem:[%s4163_s6 + $0x5c] sm:$0x1] }
  0x62   : > { %v3430_v40 = vcombine.low %v1298_v24, %v1312_v35  ;;  %3815 = vmatpush3.bf16.msra.mxu0 %v1543_v27  ;;  %v1344_v43 = vrot.slane %v1342_v34, 4  ;;  %v1347_v49 = vrot.slane %v1345_v39, 5  ;;  %v1356_v50 = vshrl.u32 %v3423_v37, 16  ;;  %3800 = vmatprep.mubr.msk.bf16.mxu0 %vm619_vm2, %v3967_v6  ;;  %v3459_v29 = vld [vmem:[%s4163_s6 + $0x60] sm:$0xf] }
  0x63   : > { %v1326_v48 = vsel %vm4176_vm4, %v1321_v36, %v1325_v19  ;;  %v1359_v51 = vshll.u32 %v3423_v37, 16  ;;  %v1335_v53 = vrot.slane %v1334_v41, 4  ;;  %v1353_v54 = vrot.slane %v1351_v45, 5  ;;  %v3460_v30 = vld [vmem:[%s4163_s6 + $0x64] sm:$0x1] }
  0x64   : > { %3806 = vmatprep.mubr.msk.bf16.mxu1 %vm619_vm2, %v3430_v40  ;;  %v1365_v55 = vshll.u32 %v3424_v38, 16  ;;  %v1370_v57 = vshrl.u32 %v3425_v46, 16  ;;  %v1348_v58 = vor.u32 %v1347_v49, %v1344_v43  ;;  %v1358_v59 = vrot.slane %v1356_v50, 4  ;;  %v3461_v35 = vld [vmem:[%s4163_s6 + $0x68] sm:$0xf] }
  0x65   : > { %v1361_v60 = vrot.slane %v1359_v51, 5  ;;  %v1373_v61 = vshll.u32 %v3425_v46, 16  ;;  %v1340_v62 = vsel %vm4176_vm4, %v1335_v53, %v1339_v31  ;;  %v1379_v1 = vshll.u32 %v3426_v47, 16  ;;  %v3462_v39 = vld [vmem:[%s4163_s6 + $0x6c] sm:$0x1] }
  0x66   : > { %v1367_v63 = vrot.slane %v1365_v55, 5  ;;  %v1372_v0 = vrot.slane %v1370_v57, 4  ;;  %v3431_v2 = vcombine.low %v1326_v48, %v1340_v62  ;;  %v1349_v3 = vrot.slane %v1348_v58, 4  ;;  %v3969_v55 = vld [vmem:[%s4163_s6 + $0x50] ss:$8 sps:$4 sm:$0xff]  }
  0x67   : > { %v1362_v4 = vor.u32 %v1361_v60, %v1358_v59  ;;  %v1375_v5 = vrot.slane %v1373_v61, 5  ;;  %v1384_v7 = vshrl.u32 %v3427_v52, 16  ;;  %v1387_v42 = vshll.u32 %v3427_v52, 16 }
  0x68   : > { %v1393_v44 = vshll.u32 %v3428_v56, 16  ;;  %3807 = vmatmul.mubr.msk.bf16.vlgmr.msra.gmra.mxu1 %vm619_vm2, %v3431_v2  ;;  %v1354_v8 = vsel %vm4176_vm4, %v1349_v3, %v1353_v54  ;;  %v1381_v12 = vrot.slane %v1379_v1, 5  ;;  %v1635_v19 = vshrl.u32 %v3455_v14, 16  ;;  %v3488_v56 = vld [vmem:[%s4740_s1 + $0x20] sm:$0xf] }
  0x69   : > { %v1363_v10 = vrot.slane %v1362_v4, 4  ;;  %v1376_v11 = vor.u32 %v1375_v5, %v1372_v0  ;;  %3825 = vmatpush3.bf16.msra.mxu1 %v1773_v32  ;;  %v1386_v15 = vrot.slane %v1384_v7, 4  ;;  %v1389_v16 = vrot.slane %v1387_v42, 5  ;;  %3801 = vmatmul.mubr.msk.bf16.gmra.mxu0 %vm619_vm2, %v3968_v13  ;;  %v3970_v0 = vld [vmem:[%s4163_s6 + $0x60] ss:$8 sps:$4 sm:$0xff]  }
  0x6a   : > { %v1395_v17 = vrot.slane %v1393_v44, 5  ;;  %v1638_v24 = vshll.u32 %v3455_v14, 16  ;;  %v1637_v27 = vrot.slane %v1635_v19, 4  ;;  %v1644_v28 = vshll.u32 %v3456_v18, 16  ;;  %3922 = vmatprep.subr.msk.bf16.mxu0 %vm632_vm0, %v3488_v56  ;;  %3816 = vmatprep.mubr.msk.bf16.mxu0 %vm619_vm2, %v3969_v55  ;;  %v3513_v5 = vld [vmem:[%s4740_s1 + $0x24] sm:$0xf] }
  0x6b   : > { %v1368_v20 = vsel %vm4176_vm4, %v1363_v10, %v1367_v63  ;;  %v1377_v21 = vrot.slane %v1376_v11, 4  ;;  %v1390_v26 = vor.u32 %v1389_v16, %v1386_v15  ;;  %v1649_v33 = vshrl.u32 %v3457_v22, 16  ;;  %3923 = vmatprep.subr.msk.bf16.mxu1 %vm632_vm0, %v3513_v5  ;;  %v3463_v44 = vld [vmem:[%s4163_s6 + $0x70] sm:$0xf]  ;;  %v3466_v13 = vld [vmem:[%s4163_s6 + $0x7c] sm:$0x1] }
  0x6c   : > { %v3432_v25 = vcombine.low %v1354_v8, %v1368_v20  ;;  %v1640_v32 = vrot.slane %v1638_v24, 5  ;;  %v1652_v34 = vshll.u32 %v3457_v22, 16  ;;  %v1646_v37 = vrot.slane %v1644_v28, 5  ;;  %v3464_v8 = vld [vmem:[%s4163_s6 + $0x74] sm:$0x1] }
  0x6d   : > { %v1382_v31 = vsel %vm4176_vm4, %v1377_v21, %v1381_v12  ;;  %v1391_v36 = vrot.slane %v1390_v26, 4  ;;  %v1658_v38 = vshll.u32 %v3458_v23, 16  ;;  %v1663_v40 = vshrl.u32 %v3459_v29, 16  ;;  %v3465_v12 = vld [vmem:[%s4163_s6 + $0x78] sm:$0xf] }
  0x6e   : > { %3810 = vmatprep.mubr.msk.bf16.mxu1 %vm619_vm2, %v3432_v25  ;;  %v1641_v41 = vor.u32 %v1640_v32, %v1637_v27  ;;  %v1651_v43 = vrot.slane %v1649_v33, 4  ;;  %v1654_v45 = vrot.slane %v1652_v34, 5  ;;  %v1666_v46 = vshll.u32 %v3459_v29, 16  ;;  %v3467_v20 = vld [vmem:[%s4163_s6 + $0x80] sm:$0xf] }
  0x6f   : > { %v1396_v47 = vsel %vm4176_vm4, %v1391_v36, %v1395_v17  ;;  %v1660_v48 = vrot.slane %v1658_v38, 5  ;;  %v1665_v49 = vrot.slane %v1663_v40, 4  ;;  %v1672_v50 = vshll.u32 %v3460_v30, 16  ;;  %v3468_v25 = vld [vmem:[%s4163_s6 + $0x84] sm:$0x1] }
  0x70   : > { %v3433_v51 = vcombine.low %v1382_v31, %v1396_v47  ;;  %v1642_v52 = vrot.slane %v1641_v41, 4  ;;  %v1655_v53 = vor.u32 %v1654_v45, %v1651_v43  ;;  %v1668_v54 = vrot.slane %v1666_v46, 5  ;;  %v3469_v29 = vld [vmem:[%s4163_s6 + $0x88] sm:$0xf]  ;;  %v3470_v34 = vld [vmem:[%s4163_s6 + $0x8c] sm:$0x1] }
  0x71   : > { %v1674_v57 = vrot.slane %v1672_v50, 5  ;;  %v1677_v58 = vshrl.u32 %v3461_v35, 16  ;;  %v1680_v59 = vshll.u32 %v3461_v35, 16  ;;  %v1686_v60 = vshll.u32 %v3462_v39, 16  ;;  %3817 = vmatmul.mubr.msk.bf16.vlgmr.msra.gmra.mxu0 %vm619_vm2, %v3970_v0  ;;  %v3971_v40 = vld [vmem:[%s4163_s6 + $0x70] ss:$8 sps:$4 sm:$0xff]  }
  0x72   : > { %3811 = vmatmul.mubr.msk.bf16.gmra.mxu1 %vm619_vm2, %v3433_v51  ;;  %v1647_v61 = vsel %vm4176_vm4, %v1642_v52, %v1646_v37  ;;  %v1656_v62 = vrot.slane %v1655_v53, 4  ;;  %v1669_v63 = vor.u32 %v1668_v54, %v1665_v49  ;;  %v1892_v1 = vsel %vm632_vm0, %v3488_v56, 0  ;;  %3820 = vmatprep.mubr.msk.bf16.mxu0 %vm619_vm2, %v3971_v40  ;;  %v3972_v54 = vld [vmem:[%s4163_s6 + $0x80] ss:$8 sps:$4 sm:$0xff]   ;;  %v3497_v55 = vld [vmem:[%s4163_s6 + $0x90] sm:$0xf] }
  0x73   : > { %v1679_v2 = vrot.slane %v1677_v58, 4  ;;  %v1682_v3 = vrot.slane %v1680_v59, 5  ;;  %v1688_v4 = vrot.slane %v1686_v60, 5  ;;  %v2122_v42 = vsel %vm632_vm0, %v3513_v5, 0  ;;  %3835 = vmatpush3.bf16.msra.mxu0 %v1892_v1  ;;  %v3498_v58 = vld [vmem:[%s4163_s6 + $0x94] sm:$0x1] }
  0x74   : > { %v1661_v6 = vsel %vm4176_vm4, %v1656_v62, %v1660_v48  ;;  %v1670_v7 = vrot.slane %v1669_v63, 4  ;;  %v1691_v14 = vshrl.u32 %v3463_v44, 16  ;;  %v1694_v15 = vshll.u32 %v3463_v44, 16  ;;  %v3499_v59 = vld [vmem:[%s4163_s6 + $0x98] sm:$0xf] }
  0x75   : > { %v3472_v10 = vcombine.low %v1647_v61, %v1661_v6  ;;  %v1683_v11 = vor.u32 %v1682_v3, %v1679_v2  ;;  %v1700_v17 = vshll.u32 %v3464_v8, 16  ;;  %v1705_v18 = vshrl.u32 %v3465_v12, 16  ;;  %v3500_v0 = vld [vmem:[%s4163_s6 + $0x9c] sm:$0x1]  ;;  %v3501_v2 = vld [vmem:[%s4163_s6 + $0xa0] sm:$0xf] }
  0x76   : > { %v1675_v16 = vsel %vm4176_vm4, %v1670_v7, %v1674_v57  ;;  %v1708_v19 = vshll.u32 %v3465_v12, 16  ;;  %v1693_v22 = vrot.slane %v1691_v14, 4  ;;  %v1696_v23 = vrot.slane %v1694_v15, 5  ;;  %v3502_v7 = vld [vmem:[%s4163_s6 + $0xa4] sm:$0x1] }
  0x77   : > { %3826 = vmatprep.mubr.msk.bf16.mxu1 %vm619_vm2, %v3472_v10  ;;  %v1684_v21 = vrot.slane %v1683_v11, 4  ;;  %v1714_v24 = vshll.u32 %v3466_v13, 16  ;;  %v1702_v26 = vrot.slane %v1700_v17, 5  ;;  %v1707_v27 = vrot.slane %v1705_v18, 4  ;;  %v3503_v11 = vld [vmem:[%s4163_s6 + $0xa8] sm:$0xf] }
  0x78   : > { %v1710_v28 = vrot.slane %v1708_v19, 5  ;;  %v1719_v30 = vshrl.u32 %v3467_v20, 16  ;;  %v1697_v32 = vor.u32 %v1696_v23, %v1693_v22  ;;  %v1722_v35 = vshll.u32 %v3467_v20, 16  ;;  %v3504_v15 = vld [vmem:[%s4163_s6 + $0xac] sm:$0x1] }
  0x79   : > { %v1689_v31 = vsel %vm4176_vm4, %v1684_v21, %v1688_v4  ;;  %v1716_v33 = vrot.slane %v1714_v24, 5  ;;  %v1728_v39 = vshll.u32 %v3468_v25, 16  ;;  %v1733_v45 = vshrl.u32 %v3469_v29, 16  ;;  %3821 = vmatmul.mubr.msk.bf16.gmra.mxu0 %vm619_vm2, %v3972_v54  ;;  %v3973_v25 = vld [vmem:[%s4163_s6 + $0x90] ss:$8 sps:$4 sm:$0xff]  }
  0x7a   : > { %v3473_v36 = vcombine.low %v1675_v16, %v1689_v31  ;;  %v1711_v37 = vor.u32 %v1710_v28, %v1707_v27  ;;  %v1721_v38 = vrot.slane %v1719_v30, 4  ;;  %v1698_v41 = vrot.slane %v1697_v32, 4  ;;  %3836 = vmatprep.mubr.msk.bf16.mxu0 %vm619_vm2, %v3973_v25  ;;  %v3555_v40 = vld [vmem:[%s4740_s1 + $0x2c] sm:$0xf]  ;;  %v3976_v25 = vld [vmem:[%s4163_s6 + $0xc0] ss:$8 sps:$4 sm:$0xff]  }
  0x7b   : > { %v1724_v43 = vrot.slane %v1722_v35, 5  ;;  %v1736_v46 = vshll.u32 %v3469_v29, 16  ;;  %v1730_v48 = vrot.slane %v1728_v39, 5  ;;  %v1742_v49 = vshll.u32 %v3470_v34, 16  ;;  %v3974_v39 = vld [vmem:[%s4163_s6 + $0xa0] ss:$8 sps:$4 sm:$0xff]  }
  0x7c   : > { %3827 = vmatmul.mubr.msk.bf16.vlgmr.msra.gmra.mxu1 %vm619_vm2, %v3473_v36  ;;  %v1712_v47 = vrot.slane %v1711_v37, 4  ;;  %v1703_v50 = vsel %vm4176_vm4, %v1698_v41, %v1702_v26  ;;  %v1735_v52 = vrot.slane %v1733_v45, 4  ;;  %v1984_v60 = vshrl.u32 %v3497_v55, 16  ;;  %v3530_v26 = vld [vmem:[%s4740_s1 + $0x28] sm:$0xf] }
  0x7d   : > { %3845 = vmatpush3.bf16.msra.mxu1 %v2122_v42  ;;  %v1725_v51 = vor.u32 %v1724_v43, %v1721_v38  ;;  %v1738_v53 = vrot.slane %v1736_v46, 5  ;;  %v1744_v57 = vrot.slane %v1742_v49, 5  ;;  %v1987_v1 = vshll.u32 %v3497_v55, 16  ;;  %3924 = vmatprep.subr.msk.bf16.mxu0 %vm632_vm0, %v3530_v26  ;;  %v3505_v46 = vld [vmem:[%s4163_s6 + $0xb0] sm:$0xf] }
  0x7e   : > { %v1717_v56 = vsel %vm4176_vm4, %v1712_v47, %v1716_v33  ;;  %v1986_v3 = vrot.slane %v1984_v60, 4  ;;  %v1993_v4 = vshll.u32 %v3498_v58, 16  ;;  %v1998_v5 = vshrl.u32 %v3499_v59, 16  ;;  %3925 = vmatprep.subr.msk.bf16.mxu1 %vm632_vm0, %v3555_v40  ;;  %v3506_v47 = vld [vmem:[%s4163_s6 + $0xb4] sm:$0x1] }
  0x7f   : > { %v3474_v61 = vcombine.low %v1703_v50, %v1717_v56  ;;  %v1726_v62 = vrot.slane %v1725_v51, 4  ;;  %v1739_v63 = vor.u32 %v1738_v53, %v1735_v52  ;;  %v2001_v6 = vshll.u32 %v3499_v59, 16  ;;  %v3507_v51 = vld [vmem:[%s4163_s6 + $0xb8] sm:$0xf]  ;;  %v3508_v52 = vld [vmem:[%s4163_s6 + $0xbc] sm:$0x1] }
  0x80   : > { %v1989_v8 = vrot.slane %v1987_v1, 5  ;;  %v2007_v10 = vshll.u32 %v3500_v0, 16  ;;  %v1995_v12 = vrot.slane %v1993_v4, 5  ;;  %v2000_v13 = vrot.slane %v1998_v5, 4  ;;  %v3509_v58 = vld [vmem:[%s4163_s6 + $0xc0] sm:$0xf] }
  0x81   : > { %3830 = vmatprep.mubr.msk.bf16.mxu1 %vm619_vm2, %v3474_v61  ;;  %v1731_v42 = vsel %vm4176_vm4, %v1726_v62, %v1730_v48  ;;  %v1740_v44 = vrot.slane %v1739_v63, 4  ;;  %v2003_v14 = vrot.slane %v2001_v6, 5  ;;  %v2012_v16 = vshrl.u32 %v3501_v2, 16  ;;  %3837 = vmatmul.mubr.msk.bf16.vlgmr.msra.gmra.mxu0 %vm619_vm2, %v3974_v39  ;;  %v3510_v63 = vld [vmem:[%s4163_s6 + $0xc4] sm:$0x1] }
  0x82   : > { %v1990_v18 = vor.u32 %v1989_v8, %v1986_v3  ;;  %v2009_v19 = vrot.slane %v2007_v10, 5  ;;  %v2015_v20 = vshll.u32 %v3501_v2, 16  ;;  %v2021_v24 = vshll.u32 %v3502_v7, 16  ;;  %v3511_v4 = vld [vmem:[%s4163_s6 + $0xc8] sm:$0xf] }
  0x83   : > { %v1745_v17 = vsel %vm4176_vm4, %v1740_v44, %v1744_v57  ;;  %v2004_v22 = vor.u32 %v2003_v14, %v2000_v13  ;;  %v2014_v23 = vrot.slane %v2012_v16, 4  ;;  %v2026_v29 = vshrl.u32 %v3503_v11, 16  ;;  %v3512_v7 = vld [vmem:[%s4163_s6 + $0xcc] sm:$0x1] }
  0x84   : > { %v3475_v21 = vcombine.low %v1731_v42, %v1745_v17  ;;  %v1991_v27 = vrot.slane %v1990_v18, 4  ;;  %v2017_v28 = vrot.slane %v2015_v20, 5  ;;  %v2029_v30 = vshll.u32 %v3503_v11, 16  ;;  %v3975_v17 = vld [vmem:[%s4163_s6 + $0xb0] ss:$8 sps:$4 sm:$0xff]  }
  0x85   : > { %v2005_v31 = vrot.slane %v2004_v22, 4  ;;  %v2023_v32 = vrot.slane %v2021_v24, 5  ;;  %v2035_v33 = vshll.u32 %v3504_v15, 16  ;;  %v2241_v34 = vsel %vm632_vm0, %v3530_v26, 0  ;;  %3840 = vmatprep.mubr.msk.bf16.mxu0 %vm619_vm2, %v3975_v17 }
  0x86   : > { %3831 = vmatmul.mubr.msk.bf16.gmra.mxu1 %vm619_vm2, %v3475_v21  ;;  %v1996_v35 = vsel %vm4176_vm4, %v1991_v27, %v1995_v12  ;;  %v2018_v36 = vor.u32 %v2017_v28, %v2014_v23  ;;  %v2028_v37 = vrot.slane %v2026_v29, 4  ;;  %v2031_v38 = vrot.slane %v2029_v30, 5  ;;  %3855 = vmatpush3.bf16.msra.mxu0 %v2241_v34  ;;  %v3539_v29 = vld [vmem:[%s4163_s6 + $0x98] sm:$0xf]  ;;  %v3540_v30 = vld [vmem:[%s4163_s6 + $0x9c] sm:$0x1] }
  0x87   : > { %v2010_v41 = vsel %vm4176_vm4, %v2005_v31, %v2009_v19  ;;  %v2037_v43 = vrot.slane %v2035_v33, 5  ;;  %v2471_v45 = vsel %vm632_vm0, %v3555_v40, 0  ;;  %v2040_v53 = vshrl.u32 %v3505_v46, 16  ;;  %v3541_v34 = vld [vmem:[%s4163_s6 + $0xa0] sm:$0xf] }
  0x88   : > { %v3514_v48 = vcombine.low %v1996_v35, %v2010_v41  ;;  %v2019_v49 = vrot.slane %v2018_v36, 4  ;;  %v2032_v50 = vor.u32 %v2031_v38, %v2028_v37  ;;  %v2043_v54 = vshll.u32 %v3505_v46, 16  ;;  %v3542_v35 = vld [vmem:[%s4163_s6 + $0xa4] sm:$0x1]  ;;  %v3543_v41 = vld [vmem:[%s4163_s6 + $0xa8] sm:$0xf] }
  0x89   : > { %v2049_v55 = vshll.u32 %v3506_v47, 16  ;;  %v2054_v56 = vshrl.u32 %v3507_v51, 16  ;;  %v2057_v57 = vshll.u32 %v3507_v51, 16  ;;  %v2042_v61 = vrot.slane %v2040_v53, 4  ;;  %3841 = vmatmul.mubr.msk.bf16.gmra.mxu0 %vm619_vm2, %v3976_v25  ;;  %v3545_v53 = vld [vmem:[%s4163_s6 + $0xb0] sm:$0xf] }
  0x8a   : > { %3846 = vmatprep.mubr.msk.bf16.mxu1 %vm619_vm2, %v3514_v48  ;;  %v2024_v59 = vsel %vm4176_vm4, %v2019_v49, %v2023_v32  ;;  %v2033_v60 = vrot.slane %v2032_v50, 4  ;;  %v2063_v62 = vshll.u32 %v3508_v52, 16  ;;  %v2045_v0 = vrot.slane %v2043_v54, 5  ;;  %v3544_v48 = vld [vmem:[%s4163_s6 + $0xac] sm:$0x1] }
  0x8b   : > { %v2051_v1 = vrot.slane %v2049_v55, 5  ;;  %v2056_v2 = vrot.slane %v2054_v56, 4  ;;  %v2059_v3 = vrot.slane %v2057_v57, 5  ;;  %v2068_v42 = vshrl.u32 %v3509_v58, 16  ;;  %v3546_v56 = vld [vmem:[%s4163_s6 + $0xb4] sm:$0x1] }
  0x8c   : > { %v2038_v5 = vsel %vm4176_vm4, %v2033_v60, %v2037_v43  ;;  %v2065_v6 = vrot.slane %v2063_v62, 5  ;;  %v2071_v44 = vshll.u32 %v3509_v58, 16  ;;  %v2046_v10 = vor.u32 %v2045_v0, %v2042_v61 }
  0x8d   : > { %v3515_v8 = vcombine.low %v2024_v59, %v2038_v5  ;;  %v2060_v11 = vor.u32 %v2059_v3, %v2056_v2  ;;  %v2077_v12 = vshll.u32 %v3510_v63, 16  ;;  %v2070_v13 = vrot.slane %v2068_v42, 4  ;;  %v3977_v3 = vld [vmem:[%s4163_s6 + $0x98] ss:$8 sps:$4 sm:$0xff]   ;;  %v3572_v42 = vld [vmem:[%s4740_s1 + $0x30] sm:$0xf] }
  0x8e   : > { %v2073_v14 = vrot.slane %v2071_v44, 5  ;;  %v2082_v15 = vshrl.u32 %v3511_v4, 16  ;;  %v2085_v16 = vshll.u32 %v3511_v4, 16  ;;  %v2047_v18 = vrot.slane %v2046_v10, 4  ;;  %3856 = vmatprep.mubr.msk.bf16.mxu0 %vm619_vm2, %v3977_v3  ;;  %3926 = vmatprep.subr.msk.bf16.mxu0 %vm632_vm0, %v3572_v42  ;;  %v3581_v3 = vld [vmem:[%s4163_s6 + $0xd8] sm:$0xf] }
  0x8f   : > { %3847 = vmatmul.mubr.msk.bf16.vlgmr.msra.gmra.mxu1 %vm619_vm2, %v3515_v8  ;;  %v2061_v19 = vrot.slane %v2060_v11, 4  ;;  %v2079_v20 = vrot.slane %v2077_v12, 5  ;;  %v2091_v21 = vshll.u32 %v3512_v7, 16  ;;  %v2333_v36 = vshrl.u32 %v3539_v29, 16 }
  0x90   : > { %3865 = vmatpush3.bf16.msra.mxu1 %v2471_v45  ;;  %v2074_v22 = vor.u32 %v2073_v14, %v2070_v13  ;;  %v2084_v23 = vrot.slane %v2082_v15, 4  ;;  %v2087_v24 = vrot.slane %v2085_v16, 5  ;;  %v2052_v26 = vsel %vm4176_vm4, %v2047_v18, %v2051_v1  ;;  %v3978_v14 = vld [vmem:[%s4163_s6 + $0xa8] ss:$8 sps:$4 sm:$0xff]   ;;  %v3597_v16 = vld [vmem:[%s4740_s1 + $0x34] sm:$0xf] }
  0x91   : > { %v2066_v27 = vsel %vm4176_vm4, %v2061_v19, %v2065_v6  ;;  %v2093_v28 = vrot.slane %v2091_v21, 5  ;;  %v2336_v37 = vshll.u32 %v3539_v29, 16  ;;  %v2342_v38 = vshll.u32 %v3540_v30, 16  ;;  %3927 = vmatprep.subr.msk.bf16.mxu1 %vm632_vm0, %v3597_v16  ;;  %v3547_v21 = vld [vmem:[%s4163_s6 + $0xb8] sm:$0xf]  ;;  %3857 = vmatmul.mubr.msk.bf16.vlgmr.msra.gmra.mxu0 %vm619_vm2, %v3978_v14 }
  0x92   : > { %v3516_v31 = vcombine.low %v2052_v26, %v2066_v27  ;;  %v2075_v32 = vrot.slane %v2074_v22, 4  ;;  %v2088_v33 = vor.u32 %v2087_v24, %v2084_v23  ;;  %v2347_v39 = vshrl.u32 %v3541_v34, 16  ;;  %v3548_v22 = vld [vmem:[%s4163_s6 + $0xbc] sm:$0x1]  ;;  %v3549_v23 = vld [vmem:[%s4163_s6 + $0xc0] sm:$0xf] }
  0x93   : > { %v2350_v40 = vshll.u32 %v3541_v34, 16  ;;  %v2335_v46 = vrot.slane %v2333_v36, 4  ;;  %v2356_v47 = vshll.u32 %v3542_v35, 16  ;;  %v2338_v49 = vrot.slane %v2336_v37, 5  ;;  %v3550_v24 = vld [vmem:[%s4163_s6 + $0xc4] sm:$0x1] }
  0x94   : > { %3850 = vmatprep.mubr.msk.bf16.mxu1 %vm619_vm2, %v3516_v31  ;;  %v2080_v43 = vsel %vm4176_vm4, %v2075_v32, %v2079_v20  ;;  %v2089_v45 = vrot.slane %v2088_v33, 4  ;;  %v2344_v50 = vrot.slane %v2342_v38, 5  ;;  %v2349_v51 = vrot.slane %v2347_v39, 4  ;;  %v3551_v31 = vld [vmem:[%s4163_s6 + $0xc8] sm:$0xf] }
  0x95   : > { %v2352_v52 = vrot.slane %v2350_v40, 5  ;;  %v2358_v55 = vrot.slane %v2356_v47, 5  ;;  %v2361_v57 = vshrl.u32 %v3543_v41, 16  ;;  %v2364_v58 = vshll.u32 %v3543_v41, 16  ;;  %v3552_v36 = vld [vmem:[%s4163_s6 + $0xcc] sm:$0x1] }
  0x96   : > { %v2094_v54 = vsel %vm4176_vm4, %v2089_v45, %v2093_v28  ;;  %v2339_v60 = vor.u32 %v2338_v49, %v2335_v46  ;;  %v2370_v62 = vshll.u32 %v3544_v48, 16  ;;  %v2375_v1 = vshrl.u32 %v3545_v53, 16  ;;  %v3553_v40 = vld [vmem:[%s4163_s6 + $0xd0] sm:$0xf]  ;;  %v3554_v41 = vld [vmem:[%s4163_s6 + $0xd4] sm:$0x1] }
  0x97   : > { %v3517_v59 = vcombine.low %v2080_v43, %v2094_v54  ;;  %v2353_v61 = vor.u32 %v2352_v52, %v2349_v51  ;;  %v2363_v63 = vrot.slane %v2361_v57, 4  ;;  %v2366_v0 = vrot.slane %v2364_v58, 5  ;;  %v3979_v52 = vld [vmem:[%s4163_s6 + $0xb8] ss:$8 sps:$4 sm:$0xff]  }
  0x98   : > { %v2378_v2 = vshll.u32 %v3545_v53, 16  ;;  %v2340_v4 = vrot.slane %v2339_v60, 4  ;;  %v2372_v6 = vrot.slane %v2370_v62, 5  ;;  %v2384_v7 = vshll.u32 %v3546_v56, 16  ;;  %3860 = vmatprep.mubr.msk.bf16.mxu0 %vm619_vm2, %v3979_v52 }
  0x99   : > { %3851 = vmatmul.mubr.msk.bf16.gmra.mxu1 %vm619_vm2, %v3517_v59  ;;  %v2354_v5 = vrot.slane %v2353_v61, 4  ;;  %v2367_v44 = vor.u32 %v2366_v0, %v2363_v63  ;;  %v2377_v8 = vrot.slane %v2375_v1, 4  ;;  %v2590_v15 = vsel %vm632_vm0, %v3572_v42, 0  ;;  %v3980_v1 = vld [vmem:[%s4163_s6 + $0xc8] ss:$8 sps:$4 sm:$0xff]  }
  0x9a   : > { %v2380_v10 = vrot.slane %v2378_v2, 5  ;;  %v2345_v11 = vsel %vm4176_vm4, %v2340_v4, %v2344_v50  ;;  %v2386_v13 = vrot.slane %v2384_v7, 5  ;;  %v2820_v20 = vsel %vm632_vm0, %v3597_v16, 0  ;;  %3875 = vmatpush3.bf16.msra.mxu0 %v2590_v15  ;;  %v3582_v4 = vld [vmem:[%s4163_s6 + $0xdc] sm:$0x1] }
  0x9b   : > { %v2359_v12 = vsel %vm4176_vm4, %v2354_v5, %v2358_v55  ;;  %v2368_v18 = vrot.slane %v2367_v44, 4  ;;  %v2389_v25 = vshrl.u32 %v3547_v21, 16  ;;  %v2392_v26 = vshll.u32 %v3547_v21, 16  ;;  %v3583_v5 = vld [vmem:[%s4163_s6 + $0xe0] sm:$0xf]  ;;  %3861 = vmatmul.mubr.msk.bf16.gmra.mxu0 %vm619_vm2, %v3980_v1 }
  0x9c   : > { %v3556_v17 = vcombine.low %v2345_v11, %v2359_v12  ;;  %v2381_v19 = vor.u32 %v2380_v10, %v2377_v8  ;;  %v2398_v29 = vshll.u32 %v3548_v22, 16  ;;  %v2403_v30 = vshrl.u32 %v3549_v23, 16  ;;  %v3584_v42 = vld [vmem:[%s4163_s6 + $0xe4] sm:$0x1]  ;;  %v3585_v10 = vld [vmem:[%s4163_s6 + $0xe8] sm:$0xf] }
  0x9d   : > { %v2373_v27 = vsel %vm4176_vm4, %v2368_v18, %v2372_v6  ;;  %v2391_v32 = vrot.slane %v2389_v25, 4  ;;  %v2394_v33 = vrot.slane %v2392_v26, 5  ;;  %v2406_v34 = vshll.u32 %v3549_v23, 16  ;;  %v3586_v15 = vld [vmem:[%s4163_s6 + $0xec] sm:$0x1] }
  0x9e   : > { %3866 = vmatprep.mubr.msk.bf16.mxu1 %vm619_vm2, %v3556_v17  ;;  %v2382_v28 = vrot.slane %v2381_v19, 4  ;;  %v2412_v35 = vshll.u32 %v3550_v24, 16  ;;  %v2400_v38 = vrot.slane %v2398_v29, 5  ;;  %v2405_v39 = vrot.slane %v2403_v30, 4  ;;  %v3588_v25 = vld [vmem:[%s4163_s6 + $0xf4] sm:$0x1] }
  0x9f   : > { %v2395_v45 = vor.u32 %v2394_v33, %v2391_v32  ;;  %v2408_v46 = vrot.slane %v2406_v34, 5  ;;  %v2417_v48 = vshrl.u32 %v3551_v31, 16  ;;  %v2420_v49 = vshll.u32 %v3551_v31, 16  ;;  %v3981_v34 = vld [vmem:[%s4163_s6 + $0xd8] ss:$8 sps:$4 sm:$0xff]  }
  0xa0   : > { %v2387_v37 = vsel %vm4176_vm4, %v2382_v28, %v2386_v13  ;;  %v2414_v47 = vrot.slane %v2412_v35, 5  ;;  %v2426_v50 = vshll.u32 %v3552_v36, 16  ;;  %v2431_v51 = vshrl.u32 %v3553_v40, 16  ;;  %3876 = vmatprep.mubr.msk.bf16.mxu0 %vm619_vm2, %v3981_v34 }
  0xa1   : > { %v3557_v43 = vcombine.low %v2373_v27, %v2387_v37  ;;  %v2396_v53 = vrot.slane %v2395_v45, 4  ;;  %v2409_v54 = vor.u32 %v2408_v46, %v2405_v39  ;;  %v2434_v55 = vshll.u32 %v3553_v40, 16  ;;  %v3614_v39 = vld [vmem:[%s4740_s1 + $0x38] sm:$0xf] }
  0xa2   : > { %v2440_v56 = vshll.u32 %v3554_v41, 16  ;;  %v2419_v57 = vrot.slane %v2417_v48, 4  ;;  %v2422_v58 = vrot.slane %v2420_v49, 5  ;;  %v2428_v59 = vrot.slane %v2426_v50, 5  ;;  %3928 = vmatprep.subr.msk.bf16.mxu0 %vm632_vm0, %v3614_v39  ;;  %v3982_v48 = vld [vmem:[%s4163_s6 + $0xe8] ss:$8 sps:$4 sm:$0xff]  }
  0xa3   : > { %3867 = vmatmul.mubr.msk.bf16.vlgmr.msra.gmra.mxu1 %vm619_vm2, %v3557_v43  ;;  %v2433_v60 = vrot.slane %v2431_v51, 4  ;;  %v2401_v61 = vsel %vm4176_vm4, %v2396_v53, %v2400_v38  ;;  %v2410_v62 = vrot.slane %v2409_v54, 4  ;;  %v2436_v63 = vrot.slane %v2434_v55, 5  ;;  %v3639_v53 = vld [vmem:[%s4740_s1 + $0x3c] sm:$0xf]  ;;  %3877 = vmatmul.mubr.msk.bf16.vlgmr.msra.gmra.mxu0 %vm619_vm2, %v3982_v48 }
  0xa4   : > { %3885 = vmatpush3.bf16.msra.mxu1 %v2820_v20  ;;  %v2442_v0 = vrot.slane %v2440_v56, 5  ;;  %v2423_v2 = vor.u32 %v2422_v58, %v2419_v57  ;;  %v2682_v44 = vshrl.u32 %v3581_v3, 16  ;;  %v2685_v8 = vshll.u32 %v3581_v3, 16  ;;  %v3587_v20 = vld [vmem:[%s4163_s6 + $0xf0] sm:$0xf] }
  0xa5   : > { %v2415_v6 = vsel %vm4176_vm4, %v2410_v62, %v2414_v47  ;;  %v2437_v7 = vor.u32 %v2436_v63, %v2433_v60  ;;  %v2691_v13 = vshll.u32 %v3582_v4, 16  ;;  %v2696_v14 = vshrl.u32 %v3583_v5, 16  ;;  %3929 = vmatprep.subr.msk.bf16.mxu1 %vm632_vm0, %v3639_v53  ;;  %v3589_v57 = vld [vmem:[%s4163_s6 + $0xf8] sm:$0xf]  ;;  %v3590_v58 = vld [vmem:[%s4163_s6 + $0xfc] sm:$0x1] }
  0xa6   : > { %v3558_v11 = vcombine.low %v2401_v61, %v2415_v6  ;;  %v2424_v12 = vrot.slane %v2423_v2, 4  ;;  %v2684_v17 = vrot.slane %v2682_v44, 4  ;;  %v2687_v18 = vrot.slane %v2685_v8, 5  ;;  %v3591_v62 = vld [vmem:[%s4163_s6 + $0x100] sm:$0xf] }
  0xa7   : > { %v2438_v16 = vrot.slane %v2437_v7, 4  ;;  %v2699_v19 = vshll.u32 %v3583_v5, 16  ;;  %v2693_v22 = vrot.slane %v2691_v13, 5  ;;  %v2698_v23 = vrot.slane %v2696_v14, 4  ;;  %v3592_v63 = vld [vmem:[%s4163_s6 + $0x104] sm:$0x1] }
  0xa8   : > { %3870 = vmatprep.mubr.msk.bf16.mxu1 %vm619_vm2, %v3558_v11  ;;  %v2429_v21 = vsel %vm4176_vm4, %v2424_v12, %v2428_v59  ;;  %v2705_v24 = vshll.u32 %v3584_v42, 16  ;;  %v2688_v27 = vor.u32 %v2687_v18, %v2684_v17  ;;  %v2710_v29 = vshrl.u32 %v3585_v10, 16  ;;  %v3593_v5 = vld [vmem:[%s4163_s6 + $0x108] sm:$0xf]  ;;  %v3594_v8 = vld [vmem:[%s4163_s6 + $0x10c] sm:$0x1] }
  0xa9   : > { %v2443_v26 = vsel %vm4176_vm4, %v2438_v16, %v2442_v0  ;;  %v2701_v28 = vrot.slane %v2699_v19, 5  ;;  %v2713_v32 = vshll.u32 %v3585_v10, 16  ;;  %v2719_v33 = vshll.u32 %v3586_v15, 16  ;;  %v3595_v14 = vld [vmem:[%s4163_s6 + $0x110] sm:$0xf] }
  0xaa   : > { %v3559_v30 = vcombine.low %v2429_v21, %v2443_v26  ;;  %v2707_v31 = vrot.slane %v2705_v24, 5  ;;  %v2689_v35 = vrot.slane %v2688_v27, 4  ;;  %v2712_v37 = vrot.slane %v2710_v29, 4  ;;  %v3596_v17 = vld [vmem:[%s4163_s6 + $0x114] sm:$0x1] }
  0xab   : > { %v2702_v36 = vor.u32 %v2701_v28, %v2698_v23  ;;  %v2724_v38 = vshrl.u32 %v3587_v20, 16  ;;  %v2715_v40 = vrot.slane %v2713_v32, 5  ;;  %v2727_v41 = vshll.u32 %v3587_v20, 16  ;;  %v3983_v28 = vld [vmem:[%s4163_s6 + $0xf8] ss:$8 sps:$4 sm:$0xff]  }
  0xac   : > { %3871 = vmatmul.mubr.msk.bf16.gmra.mxu1 %vm619_vm2, %v3559_v30  ;;  %v2733_v43 = vshll.u32 %v3588_v25, 16  ;;  %v2694_v45 = vsel %vm4176_vm4, %v2689_v35, %v2693_v22  ;;  %v2721_v50 = vrot.slane %v2719_v33, 5  ;;  %v2939_v52 = vsel %vm632_vm0, %v3614_v39, 0  ;;  %3880 = vmatprep.mubr.msk.bf16.mxu0 %vm619_vm2, %v3983_v28  ;;  %v3626_v48 = vld [vmem:[%s4163_s6 + $0xec] sm:$0x1] }
  0xad   : > { %v2703_v46 = vrot.slane %v2702_v36, 4  ;;  %v2726_v47 = vrot.slane %v2724_v38, 4  ;;  %v2716_v49 = vor.u32 %v2715_v40, %v2712_v37  ;;  %v2729_v51 = vrot.slane %v2727_v41, 5  ;;  %3895 = vmatpush3.bf16.msra.mxu0 %v2939_v52  ;;  %v3984_v36 = vld [vmem:[%s4163_s6 + $0x108] ss:$8 sps:$4 sm:$0xff]  }
  0xae   : > { %v2735_v55 = vrot.slane %v2733_v43, 5  ;;  %v3169_v56 = vsel %vm632_vm0, %v3639_v53, 0  ;;  %v2738_v0 = vshrl.u32 %v3589_v57, 16  ;;  %v2741_v1 = vshll.u32 %v3589_v57, 16  ;;  %v3623_v40 = vld [vmem:[%s4163_s6 + $0xe0] sm:$0xf]  ;;  %3881 = vmatmul.mubr.msk.bf16.gmra.mxu0 %vm619_vm2, %v3984_v36 }
  0xaf   : > { %v2708_v54 = vsel %vm4176_vm4, %v2703_v46, %v2707_v31  ;;  %v2717_v60 = vrot.slane %v2716_v49, 4  ;;  %v2730_v61 = vor.u32 %v2729_v51, %v2726_v47  ;;  %v2747_v2 = vshll.u32 %v3590_v58, 16  ;;  %v3624_v41 = vld [vmem:[%s4163_s6 + $0xe4] sm:$0x1]  ;;  %v3625_v47 = vld [vmem:[%s4163_s6 + $0xe8] sm:$0xf] }
  0xb0   : > { %v3598_v59 = vcombine.low %v2694_v45, %v2708_v54  ;;  %v2752_v3 = vshrl.u32 %v3591_v62, 16  ;;  %v2755_v4 = vshll.u32 %v3591_v62, 16  ;;  %v2740_v42 = vrot.slane %v2738_v0, 4  ;;  %v3627_v54 = vld [vmem:[%s4163_s6 + $0xf0] sm:$0xf] }
  0xb1   : > { %v2722_v6 = vsel %vm4176_vm4, %v2717_v60, %v2721_v50  ;;  %v2731_v7 = vrot.slane %v2730_v61, 4  ;;  %v2761_v44 = vshll.u32 %v3592_v63, 16  ;;  %v2743_v10 = vrot.slane %v2741_v1, 5  ;;  %v3629_v0 = vld [vmem:[%s4163_s6 + $0xf8] sm:$0xf] }
  0xb2   : > { %3886 = vmatprep.mubr.msk.bf16.mxu1 %vm619_vm2, %v3598_v59  ;;  %v2749_v11 = vrot.slane %v2747_v2, 5  ;;  %v2754_v12 = vrot.slane %v2752_v3, 4  ;;  %v2757_v13 = vrot.slane %v2755_v4, 5  ;;  %v2766_v18 = vshrl.u32 %v3593_v5, 16  ;;  %v3628_v59 = vld [vmem:[%s4163_s6 + $0xf4] sm:$0x1] }
  0xb3   : > { %v2736_v15 = vsel %vm4176_vm4, %v2731_v7, %v2735_v55  ;;  %v2763_v16 = vrot.slane %v2761_v44, 5  ;;  %v2769_v19 = vshll.u32 %v3593_v5, 16  ;;  %v2744_v21 = vor.u32 %v2743_v10, %v2740_v42  ;;  %v3630_v3 = vld [vmem:[%s4163_s6 + $0xfc] sm:$0x1] }
  0xb4   : > { %v3599_v20 = vcombine.low %v2722_v6, %v2736_v15  ;;  %v2758_v22 = vor.u32 %v2757_v13, %v2754_v12  ;;  %v2775_v23 = vshll.u32 %v3594_v8, 16  ;;  %v2768_v24 = vrot.slane %v2766_v18, 4  ;;  %v3985_v13 = vld [vmem:[%s4163_s6 + $0xe0] ss:$8 sps:$4 sm:$0xff]  }
  0xb5   : > { %v2771_v25 = vrot.slane %v2769_v19, 5  ;;  %v2780_v26 = vshrl.u32 %v3595_v14, 16  ;;  %v2783_v27 = vshll.u32 %v3595_v14, 16  ;;  %v2745_v29 = vrot.slane %v2744_v21, 4  ;;  %3896 = vmatprep.mubr.msk.bf16.mxu0 %vm619_vm2, %v3985_v13  ;;  %v3986_v21 = vld [vmem:[%s4163_s6 + $0xf0] ss:$8 sps:$4 sm:$0xff]  }
  0xb6   : > { %3887 = vmatmul.mubr.msk.bf16.vlgmr.msra.gmra.mxu1 %vm619_vm2, %v3599_v20  ;;  %v2759_v30 = vrot.slane %v2758_v22, 4  ;;  %v2777_v31 = vrot.slane %v2775_v23, 5  ;;  %v2789_v32 = vshll.u32 %v3596_v17, 16  ;;  %v3031_v49 = vshrl.u32 %v3623_v40, 16  ;;  %3897 = vmatmul.mubr.msk.bf16.vlgmr.msra.gmra.mxu0 %vm619_vm2, %v3986_v21 }
  0xb7   : > { %3905 = vmatpush3.bf16.msra.mxu1 %v3169_v56  ;;  %v2772_v33 = vor.u32 %v2771_v25, %v2768_v24  ;;  %v2782_v34 = vrot.slane %v2780_v26, 4  ;;  %v2785_v35 = vrot.slane %v2783_v27, 5  ;;  %v2750_v37 = vsel %vm4176_vm4, %v2745_v29, %v2749_v11  ;;  %v3631_v25 = vld [vmem:[%s4163_s6 + $0x100] sm:$0xf]  ;;  %v3632_v26 = vld [vmem:[%s4163_s6 + $0x104] sm:$0x1] }
  0xb8   : > { %v2764_v38 = vsel %vm4176_vm4, %v2759_v30, %v2763_v16  ;;  %v2791_v39 = vrot.slane %v2789_v32, 5  ;;  %v3034_v50 = vshll.u32 %v3623_v40, 16  ;;  %v3040_v51 = vshll.u32 %v3624_v41, 16  ;;  %v3633_v30 = vld [vmem:[%s4163_s6 + $0x108] sm:$0xf] }
  0xb9   : > { %v3600_v43 = vcombine.low %v2750_v37, %v2764_v38  ;;  %v2773_v45 = vrot.slane %v2772_v33, 4  ;;  %v2786_v46 = vor.u32 %v2785_v35, %v2782_v34  ;;  %v3045_v52 = vshrl.u32 %v3625_v47, 16  ;;  %v3635_v37 = vld [vmem:[%s4163_s6 + $0x110] sm:$0xf] }
  0xba   : > { %v3048_v53 = vshll.u32 %v3625_v47, 16  ;;  %v3033_v57 = vrot.slane %v3031_v49, 4  ;;  %v3054_v58 = vshll.u32 %v3626_v48, 16  ;;  %v3036_v60 = vrot.slane %v3034_v50, 5  ;;  %v3637_v49 = vld [vmem:[%s4163_s6 + $0x118] sm:$0xf] }
  0xbb   : > { %3890 = vmatprep.mubr.msk.bf16.mxu1 %vm619_vm2, %v3600_v43  ;;  %v2778_v55 = vsel %vm4176_vm4, %v2773_v45, %v2777_v31  ;;  %v2787_v56 = vrot.slane %v2786_v46, 4  ;;  %v3042_v61 = vrot.slane %v3040_v51, 5  ;;  %v3047_v62 = vrot.slane %v3045_v52, 4  ;;  %v3634_v31 = vld [vmem:[%s4163_s6 + $0x10c] sm:$0x1] }
  0xbc   : > { %v3050_v63 = vrot.slane %v3048_v53, 5  ;;  %v3056_v2 = vrot.slane %v3054_v58, 5  ;;  %v3059_v4 = vshrl.u32 %v3627_v54, 16  ;;  %v3062_v5 = vshll.u32 %v3627_v54, 16  ;;  %v3636_v43 = vld [vmem:[%s4163_s6 + $0x114] sm:$0x1] }
  0xbd   : > { %v2792_v1 = vsel %vm4176_vm4, %v2787_v56, %v2791_v39  ;;  %v3037_v7 = vor.u32 %v3036_v60, %v3033_v57  ;;  %v3068_v44 = vshll.u32 %v3628_v59, 16  ;;  %v3073_v11 = vshrl.u32 %v3629_v0, 16  ;;  %v3638_v52 = vld [vmem:[%s4163_s6 + $0x11c] sm:$0x1] }
  0xbe   : > { %v3601_v6 = vcombine.low %v2778_v55, %v2792_v1  ;;  %v3051_v42 = vor.u32 %v3050_v63, %v3047_v62  ;;  %v3061_v8 = vrot.slane %v3059_v4, 4  ;;  %v3064_v10 = vrot.slane %v3062_v5, 5  ;;  %v3987_v63 = vld [vmem:[%s4163_s6 + $0x100] ss:$8 sps:$4 sm:$0xff]  }
  0xbf   : > { %v3076_v12 = vshll.u32 %v3629_v0, 16  ;;  %v3038_v14 = vrot.slane %v3037_v7, 4  ;;  %v3070_v16 = vrot.slane %v3068_v44, 5  ;;  %v3082_v17 = vshll.u32 %v3630_v3, 16  ;;  %3900 = vmatprep.mubr.msk.bf16.mxu0 %vm619_vm2, %v3987_v63  ;;  %v3988_v7 = vld [vmem:[%s4163_s6 + $0x110] ss:$8 sps:$4 sm:$0xff]  }
  0xc0   : > { %3891 = vmatmul.mubr.msk.bf16.gmra.mxu1 %vm619_vm2, %v3601_v6  ;;  %v3052_v15 = vrot.slane %v3051_v42, 4  ;;  %v3065_v18 = vor.u32 %v3064_v10, %v3061_v8  ;;  %v3075_v19 = vrot.slane %v3073_v11, 4  ;;  %v3087_v32 = vshrl.u32 %v3631_v25, 16  ;;  %3901 = vmatmul.mubr.msk.bf16.gmra.mxu0 %vm619_vm2, %v3988_v7 }
  0xc1   : > { %v3078_v20 = vrot.slane %v3076_v12, 5  ;;  %v3043_v22 = vsel %vm4176_vm4, %v3038_v14, %v3042_v61  ;;  %v3084_v24 = vrot.slane %v3082_v17, 5  ;;  %v3090_v33 = vshll.u32 %v3631_v25, 16 }
  0xc2   : > { %v3057_v23 = vsel %vm4176_vm4, %v3052_v15, %v3056_v2  ;;  %v3066_v28 = vrot.slane %v3065_v18, 4  ;;  %v3096_v34 = vshll.u32 %v3632_v26, 16  ;;  %v3101_v35 = vshrl.u32 %v3633_v30, 16 }
  0xc3   : > { %v3640_v27 = vcombine.low %v3043_v22, %v3057_v23  ;;  %v3079_v29 = vor.u32 %v3078_v20, %v3075_v19  ;;  %v3104_v36 = vshll.u32 %v3633_v30, 16  ;;  %v3089_v40 = vrot.slane %v3087_v32, 4 }
  0xc4   : > { %v3071_v38 = vsel %vm4176_vm4, %v3066_v28, %v3070_v16  ;;  %v3110_v41 = vshll.u32 %v3634_v31, 16  ;;  %v3092_v45 = vrot.slane %v3090_v33, 5  ;;  %v3098_v46 = vrot.slane %v3096_v34, 5 }
  0xc5   : > { %3906 = vmatprep.mubr.msk.bf16.mxu1 %vm619_vm2, %v3640_v27  ;;  %v3080_v39 = vrot.slane %v3079_v29, 4  ;;  %v3103_v47 = vrot.slane %v3101_v35, 4  ;;  %v3106_v48 = vrot.slane %v3104_v36, 5  ;;  %v3115_v53 = vshrl.u32 %v3635_v37, 16 }
  0xc6   : > { %v3112_v51 = vrot.slane %v3110_v41, 5  ;;  %v3118_v54 = vshll.u32 %v3635_v37, 16  ;;  %v3093_v56 = vor.u32 %v3092_v45, %v3089_v40  ;;  %v3124_v58 = vshll.u32 %v3636_v43, 16 }
  0xc7   : > { %v3085_v50 = vsel %vm4176_vm4, %v3080_v39, %v3084_v24  ;;  %v3107_v57 = vor.u32 %v3106_v48, %v3103_v47  ;;  %v3117_v59 = vrot.slane %v3115_v53, 4  ;;  %v3129_v61 = vshrl.u32 %v3637_v49, 16 }
  0xc8   : > { %v3641_v55 = vcombine.low %v3071_v38, %v3085_v50  ;;  %v3120_v60 = vrot.slane %v3118_v54, 5  ;;  %v3132_v62 = vshll.u32 %v3637_v49, 16  ;;  %v3094_v0 = vrot.slane %v3093_v56, 4 }
  0xc9   : > { %v3108_v1 = vrot.slane %v3107_v57, 4  ;;  %v3126_v2 = vrot.slane %v3124_v58, 5  ;;  %v3138_v3 = vshll.u32 %v3638_v52, 16  ;;  %v3131_v5 = vrot.slane %v3129_v61, 4 }
  0xca   : > { %3907 = vmatmul.mubr.msk.bf16.vlgmr.msra.gmra.mxu1 %vm619_vm2, %v3641_v55  ;;  %v3121_v4 = vor.u32 %v3120_v60, %v3117_v59  ;;  %v3134_v6 = vrot.slane %v3132_v62, 5  ;;  %v3099_v42 = vsel %vm4176_vm4, %v3094_v0, %v3098_v46 }
  0xcb   : > { %v3113_v44 = vsel %vm4176_vm4, %v3108_v1, %v3112_v51  ;;  %v3140_v12 = vrot.slane %v3138_v3, 5 }
  0xcc   : > { %v3642_v8 = vcombine.low %v3099_v42, %v3113_v44  ;;  %v3122_v10 = vrot.slane %v3121_v4, 4  ;;  %v3135_v11 = vor.u32 %v3134_v6, %v3131_v5 }
  0xce   : > { %3910 = vmatprep.mubr.msk.bf16.mxu1 %vm619_vm2, %v3642_v8  ;;  %v3127_v13 = vsel %vm4176_vm4, %v3122_v10, %v3126_v2  ;;  %v3136_v14 = vrot.slane %v3135_v11, 4 }
  0xd0   : > { %v3141_v15 = vsel %vm4176_vm4, %v3136_v14, %v3140_v12 }
  0xd1   : > { %v3643_v16 = vcombine.low %v3127_v13, %v3141_v15 }
  0xd3   : > { %3911 = vmatmul.mubr.msk.bf16.gmra.mxu1 %vm619_vm2, %v3643_v16 }
  0xf7   : > { %v3768_v17 = vpop.f32.mrf.mxu1 }
  0xf9   : > { %v770_v18 = vpop.f32.mrf.mxu1 }
  0xfb   : > { %v3769_v19 = vpop.f32.mrf.mxu1 }
  0xfd   : > { %v773_v21 = vpop.f32.mrf.mxu1 }
  0xff   : > { %v3758_v20 = vpop.f32.mrf.mxu0 }
 0x100   : > { %v779_v22 = vadd.f32 %v3768_v17, %v3758_v20  ;;  %v3772_v26 = vpop.f32.mrf.mxu1 }
 0x101   : > { %v670_v23 = vpop.f32.mrf.mxu0 }
 0x102   : > { %v771_v24 = vadd.f32 %v770_v18, %v670_v23  ;;  %v786_v30 = vpop.f32.mrf.mxu1 }
 0x103   : > { %v3759_v25 = vpop.f32.mrf.mxu0 }
 0x104   : > { %v782_v27 = vadd.f32 %v3769_v19, %v3759_v25  ;;  %v3773_v32 = vpop.f32.mrf.mxu1 }
 0x105   : > { %v673_v28 = vpop.f32.mrf.mxu0 }
 0x106   : > { %v774_v29 = vadd.f32 %v773_v21, %v673_v28  ;;  %v789_v37 = vpop.f32.mrf.mxu1 }
 0x109   : > { %v3762_v31 = vpop.f32.mrf.mxu0 }
 0x10a   : > { %v795_v9 = vadd.f32 %v3772_v26, %v3762_v31 }
 0x10b   : > { %v686_v33 = vpop.f32.mrf.mxu0 }
 0x10c   : > { %v787_v34 = vadd.f32 %v786_v30, %v686_v33 }
 0x10d   : > { %v3763_v35 = vpop.f32.mrf.mxu0 }
 0x10e   : > { %v798_v36 = vadd.f32 %v3773_v32, %v3763_v35 }
 0x10f   : > { %v689_v38 = vpop.f32.mrf.mxu0 }
 0x110   : > { %v790_v39 = vadd.f32 %v789_v37, %v689_v38 }
 0x111   : > { %v3778_v40 = vpop.f32.mrf.mxu0 }
 0x112   : > { %v914_v41 = vadd.f32 %v3778_v40, %v779_v22 }
 0x113   : > { %v881_v43 = vpop.f32.mrf.mxu0 }
 0x114   : > { %v3788_v45 = vpop.f32.mrf.mxu1  ;;  %v912_v46 = vadd.f32 %v881_v43, %v771_v24 }
 0x115   : > { %v3779_v47 = vpop.f32.mrf.mxu0  ;;  %v1144_v48 = vadd.f32 %v3788_v45, %v914_v41 }
 0x116   : > { %v1111_v49 = vpop.f32.mrf.mxu1  ;;  %v915_v50 = vadd.f32 %v3779_v47, %v782_v27 }
 0x117   : > { %v884_v51 = vpop.f32.mrf.mxu0  ;;  %v1142_v52 = vadd.f32 %v1111_v49, %v912_v46 }
 0x118   : > { %v3789_v53 = vpop.f32.mrf.mxu1  ;;  %v913_v54 = vadd.f32 %v884_v51, %v774_v29 }
 0x119   : > { %v3782_v55 = vpop.f32.mrf.mxu0  ;;  %v4584_v56 = vadd.f32 %v3789_v53, %v915_v50 }
 0x11a   : > { %v1114_v57 = vpop.f32.mrf.mxu1  ;;  %v918_v58 = vadd.f32 %v3782_v55, %v795_v9 }
 0x11b   : > { %v897_v59 = vpop.f32.mrf.mxu0  ;;  %v4586_v60 = vadd.f32 %v1114_v57, %v913_v54 }
 0x11c   : > { %v916_v61 = vadd.f32 %v897_v59, %v787_v34 }
 0x11d   : > { %v3783_v62 = vpop.f32.mrf.mxu0 }
 0x11e   : > { %v919_v63 = vadd.f32 %v3783_v62, %v798_v36 }
 0x11f   : > { %v3792_v0 = vpop.f32.mrf.mxu1  ;;  %v900_v1 = vpop.f32.mrf.mxu0 }
 0x120   : > { %v917_v2 = vadd.f32 %v900_v1, %v790_v39  ;;  %v1148_v3 = vadd.f32 %v3792_v0, %v918_v58 }
 0x121   : > { %v1127_v4 = vpop.f32.mrf.mxu1  ;;  %v3798_v5 = vpop.f32.mrf.mxu0 }
 0x122   : > { %v1263_v6 = vadd.f32 %v3798_v5, %v1144_v48  ;;  %v1146_v7 = vadd.f32 %v1127_v4, %v916_v61 }
 0x123   : > { %v3793_v42 = vpop.f32.mrf.mxu1  ;;  %v1230_v44 = vpop.f32.mrf.mxu0 }
 0x124   : > { %v1261_v8 = vadd.f32 %v1230_v44, %v1142_v52  ;;  %v4588_v10 = vadd.f32 %v3793_v42, %v919_v63 }
 0x125   : > { %v1130_v11 = vpop.f32.mrf.mxu1  ;;  %v4590_v12 = vpop.f32.mrf.mxu0 }
 0x126   : > { %v4592_v13 = vadd.f32 %v1130_v11, %v917_v2 }
 0x127   : > { %v4594_v14 = vpop.f32.mrf.mxu0 }
 0x128   : > { %v3808_v15 = vpop.f32.mrf.mxu1 }
 0x129   : > { %v4596_v16 = vadd.f32 %v3808_v15, %v1263_v6  ;;  %v3802_v18 = vpop.f32.mrf.mxu0 }
 0x12a   : > { %v1460_v17 = vpop.f32.mrf.mxu1  ;;  %v1267_v19 = vadd.f32 %v3802_v18, %v1148_v3 }
 0x12b   : > { %v4598_v20 = vadd.f32 %v1460_v17, %v1261_v8  ;;  %v1246_v22 = vpop.f32.mrf.mxu0 }
 0x12c   : > { %v4600_v21 = vpop.f32.mrf.mxu1  ;;  %v1265_v23 = vadd.f32 %v1246_v22, %v1146_v7 }
 0x12d   : > { %v4604_v25 = vpop.f32.mrf.mxu0 }
 0x12e   : > { %v4602_v24 = vpop.f32.mrf.mxu1 }
 0x12f   : > { %v4606_v26 = vpop.f32.mrf.mxu0 }
 0x131   : > { %v3818_v30 = vpop.f32.mrf.mxu0 }
 0x132   : > { %v3812_v27 = vpop.f32.mrf.mxu1 }
 0x133   : > { %v4608_v28 = vadd.f32 %v3812_v27, %v1267_v19  ;;  %v1579_v32 = vpop.f32.mrf.mxu0 }
 0x134   : > { %v1476_v29 = vpop.f32.mrf.mxu1 }
 0x135   : > { %v4610_v31 = vadd.f32 %v1476_v29, %v1265_v23  ;;  %v3819_v34 = vpop.f32.mrf.mxu0  ;;  %v1264_v23 = vadd.f32 %v4590_v12, %v4584_v56 }
 0x136   : > { %v4612_v9 = vpop.f32.mrf.mxu1 }
 0x137   : > { %v1582_v35 = vpop.f32.mrf.mxu0 }
 0x138   : > { %v4614_v33 = vpop.f32.mrf.mxu1 }
 0x139   : > { %v4616_v38 = vpop.f32.mrf.mxu0 }
 0x13b   : > { %v4618_v40 = vpop.f32.mrf.mxu0 }
 0x13c   : > { %v3828_v36 = vpop.f32.mrf.mxu1 }
 0x13d   : > { %v4620_v43 = vpop.f32.mrf.mxu0 }
 0x13e   : > { %v1809_v37 = vpop.f32.mrf.mxu1 }
 0x13f   : > { %v4622_v45 = vpop.f32.mrf.mxu0 }
 0x140   : > { %v3829_v39 = vpop.f32.mrf.mxu1 }
 0x141   : > { %v3838_v48 = vpop.f32.mrf.mxu0 }
 0x142   : > { %v1812_v41 = vpop.f32.mrf.mxu1 }
 0x143   : > { %v1928_v50 = vpop.f32.mrf.mxu0 }
 0x145   : > { %v3839_v52 = vpop.f32.mrf.mxu0 }
 0x146   : > { %v4624_v46 = vpop.f32.mrf.mxu1 }
 0x147   : > { %v1931_v53 = vpop.f32.mrf.mxu0 }
 0x148   : > { %v4626_v47 = vpop.f32.mrf.mxu1 }
 0x149   : > { %v4632_v57 = vpop.f32.mrf.mxu0 }
 0x14a   : > { %v4628_v49 = vpop.f32.mrf.mxu1 }
 0x14b   : > { %v4634_v59 = vpop.f32.mrf.mxu0 }
 0x14c   : > { %v4630_v51 = vpop.f32.mrf.mxu1 }
 0x14d   : > { %v4638_v62 = vpop.f32.mrf.mxu0 }
 0x14f   : > { %v3848_v54 = vpop.f32.mrf.mxu1  ;;  %v4642_v0 = vpop.f32.mrf.mxu0 }
 0x150   : > { %4745 = vst [vmem:[#allocation4_spill] sm:$0xff] %v4642_v0 }
 0x151   : > { %v2158_v55 = vpop.f32.mrf.mxu1  ;;  %v3858_v3 = vpop.f32.mrf.mxu0 }
 0x153   : > { %v3849_v58 = vpop.f32.mrf.mxu1  ;;  %v2277_v5 = vpop.f32.mrf.mxu0 }
 0x155   : > { %v4636_v61 = vpop.f32.mrf.mxu1  ;;  %v3859_v6 = vpop.f32.mrf.mxu0 }
 0x157   : > { %v2280_v42 = vpop.f32.mrf.mxu0 }
 0x159   : > { %v4640_v63 = vpop.f32.mrf.mxu1 }
 0x15a   : > { %4744 = vst [vmem:[#allocation3_spill] sm:$0xff] %v4640_v63 }
 0x15b   : > { %v4644_v1 = vpop.f32.mrf.mxu1  ;;  %v4654_v11 = vpop.f32.mrf.mxu0 }
 0x15c   : > { %4746 = vst [vmem:[#allocation5_spill] sm:$0xff] %v4644_v1  ;;  %4749 = vst [vmem:[#allocation8_spill] sm:$0xff] %v4654_v11 }
 0x15d   : > { %v4646_v2 = vpop.f32.mrf.mxu1  ;;  %v4656_v15 = vpop.f32.mrf.mxu0 }
 0x15e   : > { %4747 = vst [vmem:[#allocation6_spill] sm:$0xff] %v4646_v2  ;;  %4750 = vst [vmem:[#allocation9_spill] sm:$0xff] %v4656_v15  ;;  %v1612_v2 = vadd.f32 %v3818_v30, %v4596_v16 }
 0x15f   : > { %v4648_v4 = vpop.f32.mrf.mxu1  ;;  %v4660_v18 = vpop.f32.mrf.mxu0 }
 0x160   : > { %4748 = vst [vmem:[#allocation7_spill] sm:$0xff] %v4648_v4  ;;  %4752 = vst [vmem:[#allocation11_spill] sm:$0xff] %v4660_v18  ;;  %v1262_v4 = vadd.f32 %v4594_v14, %v4586_v60  ;;  %v1494_v18 = vadd.f32 %v4600_v21, %v1264_v23  ;;  %v1268_v60 = vadd.f32 %v4604_v25, %v4588_v10 }
 0x161   : > { %v4662_v19 = vpop.f32.mrf.mxu0  ;;  %v1266_v21 = vadd.f32 %v4606_v26, %v4592_v13 }
 0x162   : > { %4753 = vst [vmem:[#allocation12_spill] sm:$0xff] %v4662_v19  ;;  %v1492_v56 = vadd.f32 %v4602_v24, %v1262_v4  ;;  %v1498_v24 = vadd.f32 %v4612_v9, %v1268_v60 }
 0x163   : > { %v3868_v7 = vpop.f32.mrf.mxu1  ;;  %v3878_v29 = vpop.f32.mrf.mxu0  ;;  %v1496_v26 = vadd.f32 %v4614_v33, %v1266_v21 }
 0x164   : > { %v1611_v12 = vadd.f32 %v1582_v35, %v1492_v56  ;;  %v1616_v35 = vadd.f32 %v4616_v38, %v4608_v28  ;;  %v1617_v13 = vadd.f32 %v4620_v43, %v1498_v24 }
 0x165   : > { %v4650_v44 = vpop.f32.mrf.mxu1  ;;  %v2626_v15 = vpop.f32.mrf.mxu0 }
 0x166   : > { %v1846_v28 = vadd.f32 %v4624_v46, %v1616_v35 }
 0x167   : > { %v4652_v8 = vpop.f32.mrf.mxu1  ;;  %v3879_v19 = vpop.f32.mrf.mxu0 }
 0x168   : > { %v1965_v33 = vadd.f32 %v4632_v57, %v1846_v28  ;;  %v4759_v57 = vld [vmem:[#allocation3_spill] sm:$0xff] }
 0x169   : > { %v4658_v17 = vpop.f32.mrf.mxu1  ;;  %v2629_v63 = vpop.f32.mrf.mxu0 }
 0x16a   : > { %4751 = vst [vmem:[#allocation10_spill] sm:$0xff] %v4658_v17  ;;  %v1613_v17 = vadd.f32 %v3819_v34, %v1494_v18  ;;  %v4761_v18 = vld [vmem:[#allocation5_spill] sm:$0xff] }
 0x16c   : > { %v4664_v22 = vpop.f32.mrf.mxu1  ;;  %v1843_v16 = vadd.f32 %v3829_v39, %v1613_v17 }
 0x16d   : > { %4754 = vst [vmem:[#allocation13_spill] sm:$0xff] %v4664_v22  ;;  %v1610_v22 = vadd.f32 %v1579_v32, %v4598_v20  ;;  %v1841_v20 = vadd.f32 %v1812_v41, %v1611_v12 }
 0x16e   : > { %v4668_v27 = vpop.f32.mrf.mxu1  ;;  %v4684_v32 = vpop.f32.mrf.mxu0 }
 0x16f   : > { %4755 = vst [vmem:[#allocation14_spill] sm:$0xff] %v4668_v27  ;;  %v1842_v27 = vadd.f32 %v3828_v36, %v1612_v2  ;;  %v1840_v0 = vadd.f32 %v1809_v37, %v1610_v22  ;;  %v1960_v10 = vadd.f32 %v1931_v53, %v1841_v20  ;;  %v1614_v37 = vadd.f32 %v4618_v40, %v4610_v31  ;;  %v4762_v22 = vld [vmem:[#allocation6_spill] sm:$0xff] }
 0x170   : > { %v4672_v11 = vpop.f32.mrf.mxu1  ;;  %v4689_v36 = vpop.f32.mrf.mxu0  ;;  %v1847_v40 = vadd.f32 %v4628_v49, %v1617_v13  ;;  %v4758_v49 = vld [vmem:[#allocation4_spill] sm:$0xff] }
 0x171   : > { %4756 = vst [vmem:[#allocation15_spill] sm:$0xff] %v4672_v11  ;;  %v1961_v11 = vadd.f32 %v3838_v48, %v1842_v27  ;;  %v1959_v23 = vadd.f32 %v1928_v50, %v1840_v0  ;;  %v1844_v31 = vadd.f32 %v4626_v47, %v1614_v37  ;;  %v4767_v37 = vld [vmem:[#allocation12_spill] sm:$0xff] }
 0x172   : > { %v4676_v1 = vpop.f32.mrf.mxu1  ;;  %v3883_v9 = vpop.f32.mrf.mxu0 }
 0x173   : > { %4757 = vst [vmem:[#allocation16_spill] sm:$0xff] %v4676_v1  ;;  %v1962_v1 = vadd.f32 %v3839_v52, %v1843_v16  ;;  %v2191_v25 = vadd.f32 %v3848_v54, %v1961_v11  ;;  %v2189_v48 = vadd.f32 %v2158_v55, %v1959_v23  ;;  %v1615_v52 = vadd.f32 %v4622_v45, %v1496_v26  ;;  %v4764_v16 = vld [vmem:[#allocation9_spill] sm:$0xff]  ;;  %v4766_v23 = vld [vmem:[#allocation7_spill] sm:$0xff] }
 0x174   : > { %v2190_v54 = vadd.f32 %v4636_v61, %v1960_v10  ;;  %v2645_v0 = vpop.f32.mrf.mxu0  ;;  %v1966_v45 = vadd.f32 %v4638_v62, %v1847_v40 }
 0x175   : > { %v2310_v41 = vadd.f32 %v3858_v3, %v2191_v25  ;;  %v2192_v50 = vadd.f32 %v3849_v58, %v1962_v1  ;;  %v2308_v38 = vadd.f32 %v2277_v5, %v2189_v48  ;;  %v1963_v58 = vadd.f32 %v4634_v59, %v1844_v31  ;;  %v4760_v59 = vld [vmem:[#allocation10_spill] sm:$0xff] }
 0x176   : > { %v3888_v14 = vpop.f32.mrf.mxu1  ;;  %v2309_v2 = vadd.f32 %v2280_v42, %v2190_v54  ;;  %v1845_v46 = vadd.f32 %v4630_v51, %v1615_v52  ;;  %v3898_v4 = vpop.f32.mrf.mxu0  ;;  %v2195_v42 = vadd.f32 %v4759_v57, %v1965_v33  ;;  %v2196_v27 = vadd.f32 %v4762_v22, %v1966_v45  ;;  %v4769_v52 = vld [vmem:[#allocation14_spill] sm:$0xff] }
 0x177   : > { %v2311_v53 = vadd.f32 %v3859_v6, %v2192_v50  ;;  %v2540_v55 = vadd.f32 %v3868_v7, %v2310_v41  ;;  %v2538_v61 = vadd.f32 %v4650_v44, %v2308_v38  ;;  %v2193_v51 = vadd.f32 %v4761_v18, %v1963_v58  ;;  %v4763_v44 = vld [vmem:[#allocation8_spill] sm:$0xff]  ;;  %v4768_v41 = vld [vmem:[#allocation13_spill] sm:$0xff] }
 0x178   : > { %v2856_v30 = vpop.f32.mrf.mxu1  ;;  %v1964_v5 = vadd.f32 %v4758_v49, %v1845_v46  ;;  %v2539_v17 = vadd.f32 %v4760_v59, %v2309_v2  ;;  %v2975_v62 = vpop.f32.mrf.mxu0  ;;  %v2314_v56 = vadd.f32 %v4763_v44, %v2195_v42  ;;  %v4770_v38 = vld [vmem:[#allocation15_spill] sm:$0xff] }
 0x179   : > { %v2659_v3 = vadd.f32 %v3878_v29, %v2540_v55  ;;  %v2541_v47 = vadd.f32 %v4652_v8, %v2311_v53  ;;  %v2657_v7 = vadd.f32 %v2626_v15, %v2538_v61  ;;  %v2312_v21 = vadd.f32 %v4764_v16, %v2193_v51  ;;  %v4765_v15 = vld [vmem:[#allocation11_spill] sm:$0xff] }
 0x17a   : > { %v3889_v34 = vpop.f32.mrf.mxu1  ;;  %v2658_v8 = vadd.f32 %v2629_v63, %v2539_v17  ;;  %v3899_v60 = vpop.f32.mrf.mxu0  ;;  %v2194_v20 = vadd.f32 %v4766_v23, %v1964_v5  ;;  %v2544_v48 = vadd.f32 %v4768_v41, %v2314_v56  ;;  %v4771_v55 = vld [vmem:[#allocation16_spill] sm:$0xff] }
 0x17b   : > { %v2660_v11 = vadd.f32 %v3879_v19, %v2541_v47  ;;  %v2889_v12 = vadd.f32 %v3888_v14, %v2659_v3  ;;  %v2315_v19 = vadd.f32 %v4765_v15, %v2196_v27  ;;  %v2887_v35 = vadd.f32 %v2856_v30, %v2657_v7 }
 0x17c   : > { %v2859_v39 = vpop.f32.mrf.mxu1  ;;  %v2978_v25 = vpop.f32.mrf.mxu0  ;;  %v2313_v13 = vadd.f32 %v4767_v37, %v2194_v20  ;;  %v2542_v28 = vadd.f32 %v4769_v52, %v2312_v21  ;;  %v2663_v31 = vadd.f32 %v4684_v32, %v2544_v48 }
 0x17d   : > { %v3008_v24 = vadd.f32 %v3898_v4, %v2889_v12  ;;  %v2890_v10 = vadd.f32 %v3889_v34, %v2660_v11  ;;  %v3006_v63 = vadd.f32 %v2975_v62, %v2887_v35  ;;  %v2888_v50 = vadd.f32 %v2859_v39, %v2658_v8 }
 0x17e   : > { %v2545_v53 = vadd.f32 %v4770_v38, %v2315_v19  ;;  %v2661_v33 = vadd.f32 %v4689_v36, %v2542_v28  ;;  %v2543_v58 = vadd.f32 %v4771_v55, %v2313_v13 }
 0x17f   : > { %v3009_v14 = vadd.f32 %v3899_v60, %v2890_v10  ;;  %v3007_v34 = vadd.f32 %v2978_v25, %v2888_v50 }
 0x180   : > { %v3892_v43 = vpop.f32.mrf.mxu1  ;;  %v3902_v40 = vpop.f32.mrf.mxu0  ;;  %v2664_v2 = vadd.f32 %v3883_v9, %v2545_v53  ;;  %v2662_v61 = vadd.f32 %v2645_v0, %v2543_v58 }
 0x181   : > { %v2893_v57 = vadd.f32 %v3892_v43, %v2663_v31 }
 0x182   : > { %v2872_v1 = vpop.f32.mrf.mxu1  ;;  %v2991_v39 = vpop.f32.mrf.mxu0 }
 0x183   : > { %v2891_v36 = vadd.f32 %v2872_v1, %v2661_v33  ;;  %v3012_v59 = vadd.f32 %v3902_v40, %v2893_v57 }
 0x184   : > { %v3893_v6 = vpop.f32.mrf.mxu1  ;;  %v3903_v32 = vpop.f32.mrf.mxu0 }
 0x185   : > { %v2894_v9 = vadd.f32 %v3893_v6, %v2664_v2  ;;  %v3010_v18 = vadd.f32 %v2991_v39, %v2891_v36 }
 0x186   : > { %v2875_v29 = vpop.f32.mrf.mxu1  ;;  %v2994_v62 = vpop.f32.mrf.mxu0 }
 0x187   : > { %v3013_v51 = vadd.f32 %v3903_v32, %v2894_v9  ;;  %v2892_v22 = vadd.f32 %v2875_v29, %v2662_v61 }
 0x189   : > { %v3011_v44 = vadd.f32 %v2994_v62, %v2892_v22 }
 0x18a   : > { %v3908_v26 = vpop.f32.mrf.mxu1 }
 0x18b   : > { %v3238_v30 = vadd.f32 %v3908_v26, %v3008_v24 }
 0x18c   : > { %v3205_v54 = vpop.f32.mrf.mxu1 }
 0x18d   : > { %v3236_v46 = vadd.f32 %v3205_v54, %v3006_v63  ;;  %v3246_v4 = vmax.f32 %v3238_v30, 0.0 }
 0x18e   : > { %v3909_v45 = vpop.f32.mrf.mxu1 }
 0x18f   : > { %v3239_v3 = vadd.f32 %v3909_v45, %v3009_v14  ;;  %v3244_v42 = vmax.f32 %v3236_v46, 0.0 }
 0x190   : > { %v3208_v47 = vpop.f32.mrf.mxu1 }
 0x191   : > { %v3247_v49 = vmax.f32 %v3239_v3, 0.0  ;;  %v3237_v5 = vadd.f32 %v3208_v47, %v3007_v34 }
 0x193   : > { %v3659_v7 = vpack.c.bf16 %v3247_v49, %v3246_v4  ;;  %v3245_v11 = vmax.f32 %v3237_v5, 0.0  ;;  %v3912_v17 = vpop.f32.mrf.mxu1 }
 0x194   : > { %v3242_v43 = vadd.f32 %v3912_v17, %v3012_v59 }
 0x195   : > { %3671 = vst [vmem:[%s471_s14 + $0x8] sm:$0xff] %v3659_v7   ;;  %v3654_v0 = vpack.c.bf16 %v3245_v11, %v3244_v42  ;;  %v3221_v27 = vpop.f32.mrf.mxu1 }
 0x196   : > { %v3240_v8 = vadd.f32 %v3221_v27, %v3010_v18  ;;  %v3250_v6 = vmax.f32 %v3242_v43, 0.0 }
 0x197   : > { %3655 = vst [vmem:[%s471_s14] sm:$0xff] %v3654_v0   ;;  %v3913_v56 = vpop.f32.mrf.mxu1 }
 0x198   : > { %v3243_v12 = vadd.f32 %v3913_v56, %v3013_v51  ;;  %v3248_v21 = vmax.f32 %v3240_v8, 0.0 }
 0x199   : > { %v3224_v1 = vpop.f32.mrf.mxu1 }
 0x19a   : > { %v3251_v60 = vmax.f32 %v3243_v12, 0.0  ;;  %v3241_v16 = vadd.f32 %v3224_v1, %v3011_v44 }
 0x19c   : > { %v3669_v15 = vpack.c.bf16 %v3251_v60, %v3250_v6  ;;  %v3249_v19 = vmax.f32 %v3241_v16, 0.0 }
 0x19e   : > { %3673 = vst [vmem:[%s471_s14 + $0x18] sm:$0xff] %v3669_v15   ;;  %v3664_v23 = vpack.c.bf16 %v3249_v19, %v3248_v21 }
 0x1a0   : > { %3672 = vst [vmem:[%s471_s14 + $0x10] sm:$0xff] %v3664_v23  }
 0x1a1 PF: > { %p9_p9 = scmp.ge.s32.totalorder %s4045_s13, 4   ;;  %s4772_s9 = smov %s4007_s10 }
 0x1a2   : > { %s4773_s10 = smov %s4054_s16  ;;  %s4774_s11 = smov %s4045_s13 }
 0x1a3   :  { %11 = sbr.rel (!%p9_p9) target bundleno = 2 (0x2), region = 126 }

// kernel: unet_innermost_block.4
= control target key start
LH: loop header
LB: loop body
LE: loop exit
PB: predicated region body
PF: predicated region fallthrough
CT: control target
= control target key end

     0   :  { %s5729_s15 = smov 0   ;;  %s6628_s0 = inlined_call_operand.vmem [shape: bf16[2,10,10,128], index: 0, kind: input, shape index: {}]   ;;  %s6629_s1 = inlined_call_operand.vmem [shape: bf16[4,2,2,128,128], index: 1, kind: input, shape index: {}]   ;;  %s6630_s2 = inlined_call_operand.vmem [shape: bf16[2,4,8,8,128], index: 2, kind: output, shape index: {0}]   ;;  %s6631_s3 = inlined_call_operand.vmem [shape: f32[2,1,128], index: 3, kind: output, shape index: {1}]   ;;  %s6632_s4 = inlined_call_operand.vmem [shape: f32[2,1,128], index: 4, kind: output, shape index: {2}]  }
   0x1 LB: > { %s4237_s16 = sadd.s32 4294967295, %s5702_s15   ;;  %p4241_p0 = scmp.ge.s32.totalorder %s5702_s15, 1  ;;  %s5702_s15 = sphi %s5729_s15, %s15_s15  }
   0x2   : > { %p167_p1 = scmp.lt.s32.totalorder %s5702_s15, 3 }
   0x4   : > { %p168_p2 = pnand %p4241_p0, %p167_p1 }
   0x5   : > { %p199_p3 = scmp.lt.s32.totalorder (!%p168_p2), %s4237_s16, 1 }
   0x6   : > { %171 = sbr.rel (%p168_p2) target bundleno = 513 (0x201), region = 28 }
   0xb   : > { %v5552_v0 = vld [vmem:[%s6629_s1 + $0x78] sm:$0xff]   ;;  %v5554_v2 = vld [vmem:[%s6629_s1 + $0x70] sm:$0xff]   ;;  %v5556_v4 = vld [vmem:[%s6629_s1 + $0x68] sm:$0xff]   ;;  %s6638_s16 = smov (!%p199_p3, %s4237_s16), 1  ;;  %vm248_vm0 = vsmask.f32 3328 }
   0xc   : > { %v5553_v1 = vld [vmem:[%s6629_s1 + $0x38] sm:$0xff]   ;;  %5159 = vmatprep.subr.bf16.mxu0 %v5552_v0  ;;  %v5555_v3 = vld [vmem:[%s6629_s1 + $0x30] sm:$0xff]   ;;  %v5557_v5 = vld [vmem:[%s6629_s1 + $0x28] sm:$0xff]   ;;  %s5543_s7 = smul.u32 80, %s6638_s16  ;;  %vm249_vm1 = vsmask.f32 7440  ;;  %s211_s28 = scalar_lea.vmem %s6631_s3, %s6638_s16 }
   0xd   : > { %5183 = vmatprep.subr.bf16.mxu1 %v5553_v1  ;;  %5160 = vmatpush3.bf16.msra.mxu0 %v5552_v0  ;;  %v5558_v6 = vld [vmem:[%s6629_s1 + $0x60] sm:$0xff]   ;;  %v5560_v8 = vld [vmem:[%s6629_s1 + $0x58] sm:$0xff]   ;;  %v5562_v10 = vld [vmem:[%s6629_s1 + $0x50] sm:$0xff]   ;;  %vm1320_vm3 = vcmask 1042432   ;;  %vm1321_vm4 = vcmask 1046532   ;;  %s4871_s23 = sshll.u32 %s6638_s16, 7  ;;  %s214_s5 = scalar_lea.vmem %s6632_s4, %s6638_s16 }
   0xe   : > { %5184 = vmatpush3.bf16.msra.mxu1 %v5553_v1  ;;  %5161 = vmatprep.subr.bf16.mxu0 %v5554_v2  ;;  %v5559_v7 = vld [vmem:[%s6629_s1 + $0x20] sm:$0xff]   ;;  %v5561_v9 = vld [vmem:[%s6629_s1 + $0x18] sm:$0xff]   ;;  %s5773_s14 = scalar_lea.vmem %s6628_s0, %s5543_s7  ;;  %v5563_v11 = vld [vmem:[%s6629_s1 + $0x10] sm:$0xff]   ;;  %s6556_s26 = scalar_lea.vmem %s6630_s2, %s4871_s23 }
   0xf   : > { %5185 = vmatprep.subr.bf16.mxu1 %v5555_v3  ;;  %v216_v12 = vld [vmem:[%s5773_s14] sm:$0xf]  ;;  %v217_v13 = vld [vmem:[%s5773_s14 + $0x8] sm:$0xf]  ;;  %v240_v14 = vld [vmem:[%s5773_s14 + $0x4] sm:$0x1] }
  0x10   : > { %v241_v15 = vld [vmem:[%s5773_s14 + $0xc] sm:$0x1]  ;;  %v4273_v16 = vcombine.low %v216_v12, %v217_v13  ;;  %v252_v18 = vshrl.u32 %v216_v12, 16  ;;  %v255_v19 = vshll.u32 %v216_v12, 16  ;;  %v261_v20 = vshll.u32 %v240_v14, 16  ;;  %v5566_v41 = vld [vmem:[%s6629_s1 + $0x40] sm:$0xff]   ;;  %vm5808_vm2 = vmor %vm248_vm0, %vm249_vm1 }
  0x11   : > { %5162 = vmatpush3.bf16.msra.mxu0 %v5554_v2  ;;  %v5564_v17 = vld [vmem:[%s6629_s1 + $0x48] sm:$0xff]   ;;  %v266_v21 = vshrl.u32 %v217_v13, 16  ;;  %v5789_v22 = vld [vmem:[%s5773_s14 + $0x10] sm:$0xf]  ;;  %v269_v24 = vshll.u32 %v217_v13, 16  ;;  %v275_v25 = vshll.u32 %v241_v15, 16  ;;  %vm5949_vm5 = vmor %vm1320_vm3, %vm1321_vm4 }
  0x12   : > { %5186 = vmatpush3.bf16.msra.mxu1 %v5555_v3  ;;  %5163 = vmatprep.subr.bf16.mxu0 %v5556_v4  ;;  %v5565_v23 = vld [vmem:[%s6629_s1 + $0x8] sm:$0xff]   ;;  %v5795_v26 = vld [vmem:[%s5773_s14 + $0x18] sm:$0xf]  ;;  %v242_v27 = vld [vmem:[%s5773_s14 + $0x14] sm:$0x1]  ;;  %v254_v28 = vrot.slane %v252_v18, 4 }
  0x13   : > { %5187 = vmatprep.subr.bf16.mxu1 %v5557_v5  ;;  %5199 = vmatprep.mubr.bf16.mxu1 %v4273_v16  ;;  %v257_v29 = vrot.slane %v255_v19, 5  ;;  %v263_v30 = vrot.slane %v261_v20, 5  ;;  %v268_v31 = vrot.slane %v266_v21, 4  ;;  %v243_v32 = vld [vmem:[%s5773_s14 + $0x1c] sm:$0x1]  ;;  %v271_v33 = vrot.slane %v269_v24, 5 }
  0x14   : > { %v277_v34 = vrot.slane %v275_v25, 5  ;;  %v280_v35 = vshrl.u32 %v5789_v22, 16  ;;  %v283_v36 = vshll.u32 %v5789_v22, 16  ;;  %v289_v38 = vshll.u32 %v242_v27, 16  ;;  %v5567_v47 = vld [vmem:[%s6629_s1] sm:$0xff]   ;;  %v5570_v61 = vld [vmem:[%s6629_s1 + $0xb8] sm:$0xff]  }
  0x15   : > { %5164 = vmatpush3.bf16.msra.mxu0 %v5556_v4  ;;  %v258_v37 = vor.u32 %v257_v29, %v254_v28  ;;  %v294_v39 = vshrl.u32 %v5795_v26, 16  ;;  %v297_v40 = vshll.u32 %v5795_v26, 16  ;;  %v272_v43 = vor.u32 %v271_v33, %v268_v31  ;;  %v5571_v63 = vld [vmem:[%s6629_s1 + $0xf8] sm:$0xff]   ;;  %v5572_v3 = vld [vmem:[%s6629_s1 + $0xb0] sm:$0xff]   ;;  %v5575_v13 = vld [vmem:[%s6629_s1 + $0xe8] sm:$0xff]  }
  0x16   : > { %5188 = vmatpush3.bf16.msra.mxu1 %v5557_v5  ;;  %5165 = vmatprep.subr.bf16.mxu0 %v5558_v6  ;;  %v282_v44 = vrot.slane %v280_v35, 4  ;;  %v285_v45 = vrot.slane %v283_v36, 5  ;;  %v303_v46 = vshll.u32 %v243_v32, 16  ;;  %v291_v53 = vrot.slane %v289_v38, 5  ;;  %v5573_v4 = vld [vmem:[%s6629_s1 + $0xf0] sm:$0xff]   ;;  %v5576_v36 = vld [vmem:[%s6629_s1 + $0xa0] sm:$0xff]  }
  0x17   : > { %5189 = vmatprep.subr.bf16.mxu1 %v5559_v7  ;;  %v259_v48 = vrot.slane %v258_v37, 4  ;;  %v296_v49 = vrot.slane %v294_v39, 4  ;;  %v299_v50 = vrot.slane %v297_v40, 5  ;;  %v273_v51 = vrot.slane %v272_v43, 4  ;;  %v220_v5 = vld [vmem:[%s5773_s14 + $0x20] sm:$0xf] }
  0x18   : > { %v286_v52 = vor.u32 %v285_v45, %v282_v44  ;;  %v305_v56 = vrot.slane %v303_v46, 5  ;;  %v4274_v2 = vcombine.low %v5789_v22, %v5795_v26  ;;  %v222_v18 = vld [vmem:[%s5773_s14 + $0x30] sm:$0xf]  ;;  %v223_v21 = vld [vmem:[%s5773_s14 + $0x38] sm:$0xf]  ;;  %v5577_v40 = vld [vmem:[%s6629_s1 + $0xe0] sm:$0xff]  }
  0x19   : > { %5166 = vmatpush3.bf16.msra.mxu0 %v5558_v6  ;;  %v264_v54 = vsel %vm5808_vm2, %v259_v48, %v263_v30  ;;  %v300_v55 = vor.u32 %v299_v50, %v296_v49  ;;  %v278_v57 = vsel %vm5808_vm2, %v273_v51, %v277_v34  ;;  %v221_v6 = vld [vmem:[%s5773_s14 + $0x28] sm:$0xf]  ;;  %v246_v22 = vld [vmem:[%s5773_s14 + $0x34] sm:$0x1]  ;;  %v247_v27 = vld [vmem:[%s5773_s14 + $0x3c] sm:$0x1]  ;;  %v4276_v48 = vcombine.low %v222_v18, %v223_v21 }
  0x1a   : > { %5190 = vmatpush3.bf16.msra.mxu1 %v5559_v7  ;;  %5167 = vmatprep.subr.bf16.mxu0 %v5560_v8  ;;  %v287_v58 = vrot.slane %v286_v52, 4  ;;  %v4261_v59 = vcombine.low %v264_v54, %v278_v57  ;;  %v5574_v7 = vld [vmem:[%s6629_s1 + $0xa8] sm:$0xff]   ;;  %v4275_v12 = vcombine.low %v220_v5, %v221_v6  ;;  %v322_v15 = vshrl.u32 %v221_v6, 16  ;;  %v5578_v52 = vld [vmem:[%s6629_s1 + $0x98] sm:$0xff]  }
  0x1b   : > { %5191 = vmatprep.subr.bf16.mxu1 %v5561_v9  ;;  %v301_v60 = vrot.slane %v300_v55, 4  ;;  %v325_v16 = vshll.u32 %v221_v6, 16  ;;  %v336_v29 = vshrl.u32 %v222_v18, 16  ;;  %v339_v30 = vshll.u32 %v222_v18, 16  ;;  %v5579_v55 = vld [vmem:[%s6629_s1 + $0xd8] sm:$0xff]  }
  0x1c   : > { %v292_v62 = vsel %vm5808_vm2, %v287_v58, %v291_v53  ;;  %5175 = vmatprep.mubr.bf16.mxu0 %v4261_v59  ;;  %v324_v24 = vrot.slane %v322_v15, 4  ;;  %v345_v31 = vshll.u32 %v246_v22, 16  ;;  %v350_v33 = vshrl.u32 %v223_v21, 16  ;;  %v5588_v58 = vld [vmem:[%s5773_s14 + $0x8] ss:$8 sps:$4 sm:$0xff]  }
  0x1d   : > { %5168 = vmatpush3.bf16.msra.mxu0 %v5560_v8  ;;  %v306_v0 = vsel %vm5808_vm2, %v301_v60, %v305_v56  ;;  %v244_v8 = vld [vmem:[%s5773_s14 + $0x24] sm:$0x1]  ;;  %v327_v25 = vrot.slane %v325_v16, 5  ;;  %v353_v34 = vshll.u32 %v223_v21, 16  ;;  %v359_v35 = vshll.u32 %v247_v27, 16 }
  0x1e   : > { %5192 = vmatpush3.bf16.msra.mxu1 %v5561_v9  ;;  %5169 = vmatprep.subr.bf16.mxu0 %v5562_v10  ;;  %v4262_v1 = vcombine.low %v292_v62, %v306_v0  ;;  %v245_v9 = vld [vmem:[%s5773_s14 + $0x2c] sm:$0x1]  ;;  %v317_v14 = vshll.u32 %v244_v8, 16  ;;  %v338_v38 = vrot.slane %v336_v29, 4  ;;  %v341_v39 = vrot.slane %v339_v30, 5  ;;  %v5582_v0 = vld [vmem:[%s6629_s1 + $0x90] sm:$0xff]  }
  0x1f   : > { %5193 = vmatprep.subr.bf16.mxu1 %v5563_v11  ;;  %v328_v32 = vor.u32 %v327_v25, %v324_v24  ;;  %v352_v43 = vrot.slane %v350_v33, 4  ;;  %v355_v44 = vrot.slane %v353_v34, 5  ;;  %v361_v51 = vrot.slane %v359_v35, 5  ;;  %v4321_v60 = vld [vmem:[%s5773_s14 + $0x8] sm:$0xf]  ;;  %v5587_v35 = vld [vmem:[%s6629_s1 + $0xc0] sm:$0xff]  }
  0x20   : > { %v342_v46 = vor.u32 %v341_v39, %v338_v38  ;;  %v4323_v62 = vld [vmem:[%s5773_s14 + $0x10] sm:$0xf]  ;;  %v4326_v18 = vld [vmem:[%s5773_s14 + $0x1c] sm:$0x1]  ;;  %v4328_v22 = vld [vmem:[%s5773_s14 + $0x24] sm:$0x1] }
  0x21   : > { %5170 = vmatpush3.bf16.msra.mxu0 %v5562_v10  ;;  %v308_v10 = vshrl.u32 %v220_v5, 16  ;;  %v356_v50 = vor.u32 %v355_v44, %v352_v43  ;;  %v848_v6 = vshrl.u32 %v4323_v62, 16  ;;  %v871_v25 = vshll.u32 %v4326_v18, 16 }
  0x22   : > { %5194 = vmatpush3.bf16.msra.mxu1 %v5563_v11  ;;  %5171 = vmatprep.subr.bf16.mxu0 %v5564_v17  ;;  %v311_v11 = vshll.u32 %v220_v5, 16  ;;  %v343_v54 = vrot.slane %v342_v46, 4  ;;  %v5583_v5 = vld [vmem:[%s6629_s1 + $0xd0] sm:$0xff]   ;;  %v885_v30 = vshll.u32 %v4328_v22, 16  ;;  %v5590_v46 = vld [vmem:[%s6629_s1 + $0x178] sm:$0xff]  }
  0x23   : > { %5195 = vmatprep.subr.bf16.mxu1 %v5565_v23  ;;  %v310_v19 = vrot.slane %v308_v10, 4  ;;  %v357_v56 = vrot.slane %v356_v50, 4  ;;  %v873_v34 = vrot.slane %v871_v25, 5 }
  0x24   : > { %v313_v20 = vrot.slane %v311_v11, 5  ;;  %v5584_v11 = vld [vmem:[%s6629_s1 + $0x88] sm:$0xff]   ;;  %v887_v39 = vrot.slane %v885_v30, 5 }
  0x25   : > { %5172 = vmatpush3.bf16.msra.mxu0 %v5564_v17  ;;  %v331_v17 = vshll.u32 %v245_v9, 16  ;;  %v362_v59 = vsel %vm5808_vm2, %v357_v56, %v361_v51  ;;  %v5594_v56 = vld [vmem:[%s5773_s14 + $0x28] ss:$8 sps:$4 sm:$0xff]  }
  0x26   : > { %5196 = vmatpush3.bf16.msra.mxu1 %v5565_v23  ;;  %5173 = vmatprep.subr.bf16.mxu0 %v5566_v41  ;;  %v319_v23 = vrot.slane %v317_v14, 5  ;;  %v314_v28 = vor.u32 %v313_v20, %v310_v19  ;;  %v4327_v19 = vld [vmem:[%s5773_s14 + $0x20] sm:$0xf]  ;;  %v5585_v20 = vld [vmem:[%s6629_s1 + $0xc8] sm:$0xff]  }
  0x27   : > { %5197 = vmatprep.subr.bf16.mxu1 %v5567_v47  ;;  %v333_v26 = vrot.slane %v331_v17, 5  ;;  %v4325_v17 = vld [vmem:[%s5773_s14 + $0x18] sm:$0xf]  ;;  %v879_v29 = vshll.u32 %v4327_v19, 16 }
  0x28   : > { %v315_v37 = vrot.slane %v314_v28, 4  ;;  %v865_v24 = vshll.u32 %v4325_v17, 16  ;;  %v876_v28 = vshrl.u32 %v4327_v19, 16 }
  0x29   : > { %5174 = vmatpush3.bf16.msra.mxu0 %v5566_v41  ;;  %v329_v41 = vrot.slane %v328_v32, 4  ;;  %v881_v38 = vrot.slane %v879_v29, 5 }
  0x2a   : > { %5198 = vmatpush3.bf16.msra.mxu1 %v5567_v47  ;;  %5207 = vmatprep.subr.bf16.mxu0 %v5570_v61  ;;  %v320_v45 = vsel %vm5808_vm2, %v315_v37, %v319_v23  ;;  %v347_v47 = vrot.slane %v345_v31, 5  ;;  %v862_v23 = vshrl.u32 %v4325_v17, 16  ;;  %v867_v33 = vrot.slane %v865_v24, 5 }
  0x2b   : > { %5231 = vmatprep.subr.bf16.mxu1 %v5571_v63  ;;  %v334_v49 = vsel %vm5808_vm2, %v329_v41, %v333_v26  ;;  %v5586_v26 = vld [vmem:[%s6629_s1 + $0x80] sm:$0xff]   ;;  %v878_v37 = vrot.slane %v876_v28, 4 }
  0x2c   : > { %5176 = vmatmul.mubr.bf16.vlgmr.msra.gmra.mxu0 %v4262_v1  ;;  %v4263_v53 = vcombine.low %v320_v45, %v334_v49  ;;  %v348_v57 = vsel %vm5808_vm2, %v343_v54, %v347_v47  ;;  %v4324_v1 = vld [vmem:[%s5773_s14 + $0x14] sm:$0x1]  ;;  %v864_v32 = vrot.slane %v862_v23, 4  ;;  %v5589_v49 = vld [vmem:[%s5773_s14 + $0x18] ss:$8 sps:$4 sm:$0xff]  }
  0x2d   : > { %5200 = vmatmul.mubr.bf16.vlgmr.msra.gmra.mxu1 %v4274_v2  ;;  %5208 = vmatpush3.bf16.msra.mxu0 %v5570_v61  ;;  %v4322_v61 = vld [vmem:[%s5773_s14 + $0xc] sm:$0x1]  ;;  %v834_v2 = vshrl.u32 %v4321_v60, 16  ;;  %v857_v8 = vshll.u32 %v4324_v1, 16  ;;  %v882_v44 = vor.u32 %v881_v38, %v878_v37  ;;  %v5599_v37 = vld [vmem:[%s6629_s1 + $0x120] sm:$0xff]  }
  0x2e   : > { %5232 = vmatpush3.bf16.msra.mxu1 %v5571_v63  ;;  %5209 = vmatprep.subr.bf16.mxu0 %v5572_v3  ;;  %v4264_v63 = vcombine.low %v348_v57, %v362_v59  ;;  %v868_v41 = vor.u32 %v867_v33, %v864_v32  ;;  %v4330_v57 = vld [vmem:[%s5773_s14 + $0x2c] sm:$0x1]  ;;  %v4332_v59 = vld [vmem:[%s5773_s14 + $0x34] sm:$0x1]  ;;  %v5598_v32 = vld [vmem:[%s6629_s1 + $0x160] sm:$0xff]  }
  0x2f   : > { %5233 = vmatprep.subr.bf16.mxu1 %v5573_v4  ;;  %5203 = vmatprep.mubr.bf16.mxu1 %v4275_v12  ;;  %v836_v9 = vrot.slane %v834_v2, 4  ;;  %v859_v15 = vrot.slane %v857_v8, 5  ;;  %v883_v47 = vrot.slane %v882_v44, 4  ;;  %v913_v2 = vshll.u32 %v4332_v59, 16  ;;  %v5600_v44 = vld [vmem:[%s6629_s1 + $0x158] sm:$0xff]  }
  0x30   : > { %5179 = vmatprep.mubr.bf16.mxu0 %v4263_v53  ;;  %v869_v45 = vrot.slane %v868_v41, 4  ;;  %v4329_v53 = vld [vmem:[%s5773_s14 + $0x28] sm:$0xf] }
  0x31   : > { %5210 = vmatpush3.bf16.msra.mxu0 %v5572_v3  ;;  %v837_v3 = vshll.u32 %v4321_v60, 16  ;;  %v888_v51 = vsel %vm5808_vm2, %v883_v47, %v887_v39  ;;  %v890_v60 = vshrl.u32 %v4329_v53, 16  ;;  %v5602_v47 = vld [vmem:[%s6629_s1 + $0x150] sm:$0xff]  }
  0x32   : > { %5234 = vmatpush3.bf16.msra.mxu1 %v5573_v4  ;;  %5211 = vmatprep.subr.bf16.mxu0 %v5574_v7  ;;  %v843_v4 = vshll.u32 %v4322_v61, 16  ;;  %v874_v50 = vsel %vm5808_vm2, %v869_v45, %v873_v34  ;;  %v893_v61 = vshll.u32 %v4329_v53, 16 }
  0x33   : > { %5235 = vmatprep.subr.bf16.mxu1 %v5575_v13  ;;  %v839_v10 = vrot.slane %v837_v3, 5  ;;  %v4354_v54 = vcombine.low %v874_v50, %v888_v51  ;;  %v4334_v3 = vld [vmem:[%s5773_s14 + $0x3c] sm:$0x1]  ;;  %v1154_v50 = vld [vmem:[%s5773_s14 + $0xc] sm:$0x1] }
  0x34   : > { %5180 = vmatmul.mubr.bf16.gmra.mxu0 %v4264_v63  ;;  %v845_v12 = vrot.slane %v843_v4, 5  ;;  %v4335_v4 = vld [vmem:[%s5773_s14 + $0x40] sm:$0xf]  ;;  %v927_v17 = vshll.u32 %v4334_v3, 16  ;;  %v1156_v3 = vld [vmem:[%s5773_s14 + $0x14] sm:$0x1] }
  0x35   : > { %5212 = vmatpush3.bf16.msra.mxu0 %v5574_v7  ;;  %5204 = vmatmul.mubr.bf16.gmra.mxu1 %v4276_v48  ;;  %v851_v7 = vshll.u32 %v4323_v62, 16  ;;  %v840_v16 = vor.u32 %v839_v10, %v836_v9  ;;  %v5591_v48 = vld [vmem:[%s6629_s1 + $0x138] sm:$0xff]   ;;  %v899_v62 = vshll.u32 %v4330_v57, 16  ;;  %v4336_v9 = vld [vmem:[%s5773_s14 + $0x44] sm:$0x1]  ;;  %v932_v18 = vshrl.u32 %v4335_v4, 16 }
  0x36   : > { %5236 = vmatpush3.bf16.msra.mxu1 %v5575_v13  ;;  %5213 = vmatprep.subr.bf16.mxu0 %v5576_v36  ;;  %v850_v13 = vrot.slane %v848_v6, 4  ;;  %v895_v6 = vrot.slane %v893_v61, 5  ;;  %v935_v19 = vshll.u32 %v4335_v4, 16  ;;  %v941_v24 = vshll.u32 %v4336_v9, 16  ;;  %v1296_v51 = vld [vmem:[%s5773_s14] sm:$0xe] }
  0x37   : > { %5237 = vmatprep.subr.bf16.mxu1 %v5577_v40  ;;  %5223 = vmatprep.mubr.bf16.mxu0 %v5588_v58  ;;  %v853_v14 = vrot.slane %v851_v7, 5  ;;  %v841_v27 = vrot.slane %v840_v16, 4  ;;  %v4331_v58 = vld [vmem:[%s5773_s14 + $0x30] sm:$0xf]  ;;  %v901_v7 = vrot.slane %v899_v62, 5  ;;  %v4381_v53 = vrot.slane %v1296_v51, 9 }
  0x38   : > { %v904_v63 = vshrl.u32 %v4331_v58, 16  ;;  %v907_v1 = vshll.u32 %v4331_v58, 16  ;;  %v937_v28 = vrot.slane %v935_v19, 5  ;;  %v1151_v57 = vld [vmem:[%s5773_s14] sm:$0xf]  ;;  %v1191_v62 = vshll.u32 %v1154_v50, 16 }
  0x39   : > { %5214 = vmatpush3.bf16.msra.mxu0 %v5576_v36  ;;  %v854_v21 = vor.u32 %v853_v14, %v850_v13  ;;  %v846_v36 = vsel %vm5808_vm2, %v841_v27, %v845_v12  ;;  %v5595_v14 = vld [vmem:[%s5773_s14 + $0x38] ss:$8 sps:$4 sm:$0xff]   ;;  %v934_v27 = vrot.slane %v932_v18, 4  ;;  %v1153_v58 = vld [vmem:[%s5773_s14 + $0x8] sm:$0xf]  ;;  %v1168_v59 = vshrl.u32 %v1151_v57, 16 }
  0x3a   : > { %5238 = vmatpush3.bf16.msra.mxu1 %v5577_v40  ;;  %5215 = vmatprep.subr.bf16.mxu0 %v5578_v52  ;;  %v906_v8 = vrot.slane %v904_v63, 4  ;;  %v909_v10 = vrot.slane %v907_v1, 5  ;;  %v1182_v1 = vshrl.u32 %v1153_v58, 16  ;;  %v1158_v4 = vld [vmem:[%s5773_s14 + $0x1c] sm:$0x1]  ;;  %v1333_v18 = vrot.slane %v1156_v3, 5 }
  0x3b   : > { %5239 = vmatprep.subr.bf16.mxu1 %v5579_v55  ;;  %v855_v31 = vrot.slane %v854_v21, 4  ;;  %v938_v34 = vor.u32 %v937_v28, %v934_v27 }
  0x3c   : > { %v910_v21 = vor.u32 %v909_v10, %v906_v8  ;;  %v1298_v10 = vld [vmem:[%s5773_s14 + $0x10] sm:$0xe] }
  0x3d   : > { %5216 = vmatpush3.bf16.msra.mxu0 %v5578_v52  ;;  %v860_v40 = vsel %vm5808_vm2, %v855_v31, %v859_v15  ;;  %v5592_v52 = vld [vmem:[%s6629_s1 + $0x170] sm:$0xff]   ;;  %v5596_v15 = vld [vmem:[%s6629_s1 + $0x168] sm:$0xff]   ;;  %v943_v31 = vrot.slane %v941_v24, 5  ;;  %v939_v39 = vrot.slane %v938_v34, 4 }
  0x3e   : > { %5240 = vmatpush3.bf16.msra.mxu1 %v5579_v55  ;;  %5217 = vmatprep.subr.bf16.mxu0 %v5582_v0  ;;  %v4353_v43 = vcombine.low %v846_v36, %v860_v40  ;;  %v5593_v55 = vld [vmem:[%s6629_s1 + $0x130] sm:$0xff]   ;;  %v911_v29 = vrot.slane %v910_v21, 4 }
  0x3f   : > { %5241 = vmatprep.subr.bf16.mxu1 %v5583_v5  ;;  %v1155_v21 = vld [vmem:[%s5773_s14 + $0x10] sm:$0xf] }
  0x40   : > { %5247 = vmatprep.mubr.bf16.mxu1 %v4353_v43  ;;  %v944_v43 = vsel %vm5808_vm2, %v939_v39, %v943_v31  ;;  %v1196_v24 = vshrl.u32 %v1155_v21, 16 }
  0x41   : > { %5218 = vmatpush3.bf16.msra.mxu0 %v5582_v0  ;;  %v4333_v0 = vld [vmem:[%s5773_s14 + $0x38] sm:$0xf] }
  0x42   : > { %5242 = vmatpush3.bf16.msra.mxu1 %v5583_v5  ;;  %5219 = vmatprep.subr.bf16.mxu0 %v5584_v11  ;;  %v892_v5 = vrot.slane %v890_v60, 4  ;;  %v918_v12 = vshrl.u32 %v4333_v0, 16  ;;  %v921_v13 = vshll.u32 %v4333_v0, 16  ;;  %v1171_v60 = vshll.u32 %v1151_v57, 16  ;;  %v5611_v57 = vld [vmem:[%s6629_s1 + $0x1f0] sm:$0xff]  }
  0x43   : > { %5243 = vmatprep.subr.bf16.mxu1 %v5585_v20  ;;  %v1198_v31 = vrot.slane %v1196_v24, 4 }
  0x44   : > { %v896_v16 = vor.u32 %v895_v6, %v892_v5  ;;  %v920_v22 = vrot.slane %v918_v12, 4  ;;  %v923_v23 = vrot.slane %v921_v13, 5  ;;  %v5604_v5 = vld [vmem:[%s6629_s1 + $0x148] sm:$0xff]   ;;  %v1173_v8 = vrot.slane %v1171_v60, 5 }
  0x45   : > { %5220 = vmatpush3.bf16.msra.mxu0 %v5584_v11  ;;  %v915_v11 = vrot.slane %v913_v2, 5  ;;  %v1185_v2 = vshll.u32 %v1153_v58, 16  ;;  %v1193_v13 = vrot.slane %v1191_v62, 5  ;;  %v1160_v58 = vld [vmem:[%s5773_s14 + $0x24] sm:$0x1] }
  0x46   : > { %5244 = vmatpush3.bf16.msra.mxu1 %v5585_v20  ;;  %5221 = vmatprep.subr.bf16.mxu0 %v5586_v26  ;;  %v5597_v20 = vld [vmem:[%s6629_s1 + $0x128] sm:$0xff]   ;;  %v897_v25 = vrot.slane %v896_v16, 4  ;;  %v924_v30 = vor.u32 %v923_v23, %v920_v22  ;;  %v1157_v23 = vld [vmem:[%s5773_s14 + $0x18] sm:$0xf]  ;;  %v1300_v62 = vld [vmem:[%s5773_s14 + $0x20] sm:$0xe] }
  0x47   : > { %5245 = vmatprep.subr.bf16.mxu1 %v5587_v35  ;;  %v1187_v12 = vrot.slane %v1185_v2, 5  ;;  %v5605_v16 = vld [vmem:[%s6629_s1 + $0x108] sm:$0xff]   ;;  %v1210_v28 = vshrl.u32 %v1157_v23, 16  ;;  %v4385_v2 = vrot.slane %v1300_v62, 9 }
  0x48   : > { %v902_v33 = vsel %vm5808_vm2, %v897_v25, %v901_v7  ;;  %v925_v36 = vrot.slane %v924_v30, 4  ;;  %v1170_v7 = vrot.slane %v1168_v59, 4  ;;  %v1199_v25 = vshll.u32 %v1155_v21, 16  ;;  %v1162_v59 = vld [vmem:[%s5773_s14 + $0x2c] sm:$0x1] }
  0x49   : > { %5222 = vmatpush3.bf16.msra.mxu0 %v5586_v26  ;;  %v929_v26 = vrot.slane %v927_v17, 5 }
  0x4a   : > { %5246 = vmatpush3.bf16.msra.mxu1 %v5587_v35  ;;  %5255 = vmatprep.subr.bf16.mxu0 %v5590_v46  ;;  %v916_v35 = vsel %vm5808_vm2, %v911_v29, %v915_v11  ;;  %v1184_v11 = vrot.slane %v1182_v1, 4  ;;  %v1174_v17 = vor.u32 %v1173_v8, %v1170_v7  ;;  %v5606_v29 = vld [vmem:[%s6629_s1 + $0x140] sm:$0xff]   ;;  %v1345_v1 = vrot.slane %v1162_v59, 5 }
  0x4b   : > { %5279 = vmatprep.subr.bf16.mxu1 %v5591_v48  ;;  %v4355_v38 = vcombine.low %v902_v33, %v916_v35  ;;  %v930_v40 = vsel %vm5808_vm2, %v925_v36, %v929_v26  ;;  %v1205_v26 = vshll.u32 %v1156_v3, 16  ;;  %v5607_v33 = vld [vmem:[%s6629_s1 + $0x100] sm:$0xff]   ;;  %v1212_v35 = vrot.slane %v1210_v28, 4 }
  0x4c   : > { %5224 = vmatmul.mubr.bf16.vlgmr.msra.gmra.mxu0 %v5589_v49  ;;  %v4356_v45 = vcombine.low %v930_v40, %v944_v43  ;;  %v5603_v49 = vld [vmem:[%s6629_s1 + $0x110] sm:$0xff]   ;;  %v1188_v22 = vor.u32 %v1187_v12, %v1184_v11  ;;  %v1175_v27 = vrot.slane %v1174_v17, 4  ;;  %v1213_v36 = vshll.u32 %v1157_v23, 16  ;;  %v5608_v43 = vld [vmem:[%s6629_s1 + $0x1b8] sm:$0xff]   ;;  %v5613_v17 = vld [vmem:[%s6629_s1 + $0x1e8] sm:$0xff]  }
  0x4d   : > { %5248 = vmatmul.mubr.bf16.vlgmr.msra.gmra.mxu1 %v4354_v54  ;;  %5256 = vmatpush3.bf16.msra.mxu0 %v5590_v46  ;;  %v5601_v46 = vld [vmem:[%s6629_s1 + $0x118] sm:$0xff]   ;;  %v1219_v40 = vshll.u32 %v1158_v4, 16  ;;  %v1233_v8 = vshll.u32 %v1160_v58, 16  ;;  %v5614_v28 = vld [vmem:[%s6629_s1 + $0x1a0] sm:$0xff]  }
  0x4e   : > { %5280 = vmatpush3.bf16.msra.mxu1 %v5591_v48  ;;  %5257 = vmatprep.subr.bf16.mxu0 %v5592_v52  ;;  %v1152_v48 = vld [vmem:[%s5773_s14 + $0x4] sm:$0x1]  ;;  %v1189_v30 = vrot.slane %v1188_v22, 4  ;;  %v1303_v22 = vld [vmem:[%s5773_s14 + $0x38] sm:$0xe] }
  0x4f   : > { %5281 = vmatprep.subr.bf16.mxu1 %v5593_v55  ;;  %5227 = vmatprep.mubr.bf16.mxu0 %v5594_v56  ;;  %v1325_v54 = vrot.slane %v1152_v48, 5  ;;  %v1329_v56 = vrot.slane %v1154_v50, 5  ;;  %v1177_v61 = vshll.u32 %v1152_v48, 16  ;;  %v5609_v48 = vld [vmem:[%s6629_s1 + $0x1f8] sm:$0xff]   ;;  %v1221_v50 = vrot.slane %v1219_v40, 5 }
  0x50   : > { %5251 = vmatprep.mubr.bf16.mxu1 %v4355_v38  ;;  %v1235_v21 = vrot.slane %v1233_v8, 5 }
  0x51   : > { %5258 = vmatpush3.bf16.msra.mxu0 %v5592_v52  ;;  %v1297_v52 = vld [vmem:[%s5773_s14 + $0x8] sm:$0xe]  ;;  %v1326_v63 = vsel %vm5949_vm5, %v4381_v53, %v1325_v54  ;;  %v1179_v9 = vrot.slane %v1177_v61, 5 }
  0x52   : > { %5282 = vmatpush3.bf16.msra.mxu1 %v5593_v55  ;;  %5259 = vmatprep.subr.bf16.mxu0 %v5596_v15  ;;  %v4382_v55 = vrot.slane %v1297_v52, 9  ;;  %v5612_v61 = vld [vmem:[%s6629_s1 + $0x1a8] sm:$0xff]  }
  0x53   : > { %5283 = vmatprep.subr.bf16.mxu1 %v5597_v20  ;;  %v1180_v34 = vsel %vm5808_vm2, %v1175_v27, %v1179_v9  ;;  %v1163_v27 = vld [vmem:[%s5773_s14 + $0x30] sm:$0xf] }
  0x54   : > { %5228 = vmatmul.mubr.bf16.gmra.mxu0 %v5595_v14  ;;  %v1330_v0 = vsel %vm5949_vm5, %v4382_v55, %v1329_v56  ;;  %v1299_v14 = vld [vmem:[%s5773_s14 + $0x18] sm:$0xe]  ;;  %v5610_v55 = vld [vmem:[%s6629_s1 + $0x1b0] sm:$0xff]  }
  0x55   : > { %5260 = vmatpush3.bf16.msra.mxu0 %v5596_v15  ;;  %5252 = vmatmul.mubr.bf16.gmra.mxu1 %v4356_v45  ;;  %v4405_v6 = vcombine.low %v1326_v63, %v1330_v0  ;;  %v4383_v15 = vrot.slane %v1298_v10, 9  ;;  %v4384_v19 = vrot.slane %v1299_v14, 9  ;;  %v1301_v63 = vld [vmem:[%s5773_s14 + $0x28] sm:$0xe]  ;;  %v1341_v0 = vrot.slane %v1160_v58, 5 }
  0x56   : > { %5284 = vmatpush3.bf16.msra.mxu1 %v5597_v20  ;;  %5261 = vmatprep.subr.bf16.mxu0 %v5598_v32  ;;  %v1337_v20 = vrot.slane %v1158_v4, 5  ;;  %v4386_v3 = vrot.slane %v1301_v63, 9  ;;  %v1159_v4 = vld [vmem:[%s5773_s14 + $0x20] sm:$0xf]  ;;  %v1164_v10 = vld [vmem:[%s5773_s14 + $0x34] sm:$0x1] }
  0x57   : > { %5285 = vmatprep.subr.bf16.mxu1 %v5599_v37  ;;  %5271 = vmatprep.mubr.bf16.mxu0 %v4405_v6  ;;  %v1334_v38 = vsel %vm5949_vm5, %v4383_v15, %v1333_v18  ;;  %v1224_v6 = vshrl.u32 %v1159_v4, 16  ;;  %v1227_v7 = vshll.u32 %v1159_v4, 16  ;;  %v1342_v11 = vsel %vm5949_vm5, %v4385_v2, %v1341_v0  ;;  %v1166_v15 = vld [vmem:[%s5773_s14 + $0x3c] sm:$0x1]  ;;  %v5619_v0 = vld [vmem:[%s6629_s1 + $0x1d0] sm:$0xff]  }
  0x58   : > { %v1338_v45 = vsel %vm5949_vm5, %v4384_v19, %v1337_v20  ;;  %v1346_v12 = vsel %vm5949_vm5, %v4386_v3, %v1345_v1  ;;  %v1247_v14 = vshll.u32 %v1162_v59, 16  ;;  %v4429_v1 = vld [vmem:[%s5773_s14 + $0x8] sm:$0xf]  ;;  %v4430_v2 = vld [vmem:[%s5773_s14 + $0xc] sm:$0x1] }
  0x59   : > { %5262 = vmatpush3.bf16.msra.mxu0 %v5598_v32  ;;  %v1201_v32 = vrot.slane %v1199_v25, 5  ;;  %v4406_v52 = vcombine.low %v1334_v38, %v1338_v45  ;;  %v4407_v18 = vcombine.low %v1342_v11, %v1346_v12  ;;  %v1226_v19 = vrot.slane %v1224_v6, 4  ;;  %v4431_v4 = vld [vmem:[%s5773_s14 + $0x10] sm:$0xf]  ;;  %v4473_v12 = vld [vmem:[%s5773_s14 + $0x8] sm:$0xe] }
  0x5a   : > { %5286 = vmatpush3.bf16.msra.mxu1 %v5599_v37  ;;  %5263 = vmatprep.subr.bf16.mxu0 %v5600_v44  ;;  %v1194_v37 = vsel %vm5808_vm2, %v1189_v30, %v1193_v13  ;;  %v1229_v20 = vrot.slane %v1227_v7, 5  ;;  %v1249_v25 = vrot.slane %v1247_v14, 5  ;;  %v1349_v30 = vrot.slane %v1164_v10, 5 }
  0x5b   : > { %5287 = vmatprep.subr.bf16.mxu1 %v5601_v46  ;;  %v1202_v39 = vor.u32 %v1201_v32, %v1198_v31  ;;  %v4388_v31 = vrot.slane %v1303_v22, 9  ;;  %v1353_v32 = vrot.slane %v1166_v15, 5  ;;  %v1261_v38 = vshll.u32 %v1164_v10, 16 }
  0x5c   : > { %v1647_v6 = vshrl.u32 %v4429_v1, 16  ;;  %v1650_v7 = vshll.u32 %v4429_v1, 16  ;;  %v1661_v10 = vshrl.u32 %v4431_v4, 16  ;;  %v1664_v11 = vshll.u32 %v4431_v4, 16 }
  0x5d   : > { %5264 = vmatpush3.bf16.msra.mxu0 %v5600_v44  ;;  %v4417_v44 = vcombine.low %v1180_v34, %v1194_v37  ;;  %v5615_v34 = vld [vmem:[%s6629_s1 + $0x1e0] sm:$0xff]   ;;  %v1255_v37 = vshll.u32 %v1163_v27, 16 }
  0x5e   : > { %5288 = vmatpush3.bf16.msra.mxu1 %v5601_v46  ;;  %5265 = vmatprep.subr.bf16.mxu0 %v5602_v47  ;;  %v1207_v46 = vrot.slane %v1205_v26, 5  ;;  %v1652_v14 = vrot.slane %v1650_v7, 5  ;;  %v1666_v22 = vrot.slane %v1664_v11, 5 }
  0x5f   : > { %5289 = vmatprep.subr.bf16.mxu1 %v5603_v49  ;;  %5295 = vmatprep.mubr.bf16.mxu1 %v4417_v44 }
  0x61   : > { %5266 = vmatpush3.bf16.msra.mxu0 %v5602_v47  ;;  %v1215_v47 = vrot.slane %v1213_v36, 5  ;;  %v1252_v36 = vshrl.u32 %v1163_v27, 16  ;;  %v1938_v27 = vrot.slane %v4430_v2, 5 }
  0x62   : > { %5290 = vmatpush3.bf16.msra.mxu1 %v5603_v49  ;;  %5267 = vmatprep.subr.bf16.mxu0 %v5604_v5  ;;  %v1203_v49 = vrot.slane %v1202_v39, 4 }
  0x63   : > { %5291 = vmatprep.subr.bf16.mxu1 %v5605_v16  ;;  %v1216_v51 = vor.u32 %v1215_v47, %v1212_v35  ;;  %v1254_v47 = vrot.slane %v1252_v36, 4  ;;  %v5622_v36 = vld [vmem:[%s6629_s1 + $0x180] sm:$0xff]  }
  0x64   : > { %v1208_v53 = vsel %vm5808_vm2, %v1203_v49, %v1207_v46  ;;  %v5616_v49 = vld [vmem:[%s6629_s1 + $0x198] sm:$0xff]  }
  0x65   : > { %5268 = vmatpush3.bf16.msra.mxu0 %v5604_v5  ;;  %v1217_v54 = vrot.slane %v1216_v51, 4  ;;  %v1161_v5 = vld [vmem:[%s5773_s14 + $0x28] sm:$0xf] }
  0x66   : > { %5292 = vmatpush3.bf16.msra.mxu1 %v5605_v16  ;;  %5269 = vmatprep.subr.bf16.mxu0 %v5606_v29  ;;  %v1238_v9 = vshrl.u32 %v1161_v5, 16  ;;  %v1241_v13 = vshll.u32 %v1161_v5, 16  ;;  %v1302_v16 = vld [vmem:[%s5773_s14 + $0x30] sm:$0xe]  ;;  %v4432_v5 = vld [vmem:[%s5773_s14 + $0x14] sm:$0x1] }
  0x67   : > { %5293 = vmatprep.subr.bf16.mxu1 %v5607_v33  ;;  %v1222_v56 = vsel %vm5808_vm2, %v1217_v54, %v1221_v50  ;;  %v4387_v26 = vrot.slane %v1302_v16, 9  ;;  %v5617_v50 = vld [vmem:[%s6629_s1 + $0x1d8] sm:$0xff]   ;;  %v4474_v16 = vld [vmem:[%s5773_s14 + $0x10] sm:$0xe] }
  0x68   : > { %v4418_v60 = vcombine.low %v1208_v53, %v1222_v56  ;;  %v1240_v23 = vrot.slane %v1238_v9, 4  ;;  %v1243_v24 = vrot.slane %v1241_v13, 5  ;;  %v1263_v56 = vrot.slane %v1261_v38, 5 }
  0x69   : > { %5270 = vmatpush3.bf16.msra.mxu0 %v5606_v29  ;;  %v1230_v29 = vor.u32 %v1229_v20, %v1226_v19  ;;  %v1350_v40 = vsel %vm5949_vm5, %v4387_v26, %v1349_v30  ;;  %v1656_v9 = vshll.u32 %v4430_v2, 16  ;;  %v1649_v13 = vrot.slane %v1647_v6, 4  ;;  %v5620_v19 = vld [vmem:[%s6629_s1 + $0x188] sm:$0xff]   ;;  %v5625_v2 = vld [vmem:[%s6629_s1 + $0x238] sm:$0xff]  }
  0x6a   : > { %5294 = vmatpush3.bf16.msra.mxu1 %v5607_v33  ;;  %5303 = vmatprep.subr.bf16.mxu0 %v5608_v43  ;;  %v1165_v33 = vld [vmem:[%s5773_s14 + $0x38] sm:$0xf]  ;;  %v1244_v35 = vor.u32 %v1243_v24, %v1240_v23  ;;  %v5621_v30 = vld [vmem:[%s6629_s1 + $0x1c8] sm:$0xff]  }
  0x6b   : > { %5327 = vmatprep.subr.bf16.mxu1 %v5609_v48  ;;  %v1231_v39 = vrot.slane %v1230_v29, 4  ;;  %v1266_v44 = vshrl.u32 %v1165_v33, 16  ;;  %v1269_v53 = vshll.u32 %v1165_v33, 16  ;;  %v1658_v20 = vrot.slane %v1656_v9, 5  ;;  %v4433_v23 = vld [vmem:[%s5773_s14 + $0x18] sm:$0xf] }
  0x6c   : > { %5272 = vmatmul.mubr.bf16.vlgmr.msra.gmra.mxu0 %v4406_v52  ;;  %v1245_v45 = vrot.slane %v1244_v35, 4  ;;  %v4435_v29 = vld [vmem:[%s5773_s14 + $0x20] sm:$0xf]  ;;  %v1942_v33 = vrot.slane %v4432_v5, 5  ;;  %v1675_v35 = vshrl.u32 %v4433_v23, 16 }
  0x6d   : > { %5304 = vmatpush3.bf16.msra.mxu0 %v5608_v43  ;;  %5296 = vmatmul.mubr.bf16.vlgmr.msra.gmra.mxu1 %v4418_v60  ;;  %v1354_v43 = vsel %vm5949_vm5, %v4388_v31, %v1353_v32  ;;  %v1236_v51 = vsel %vm5808_vm2, %v1231_v39, %v1235_v21  ;;  %v1268_v52 = vrot.slane %v1266_v44, 4  ;;  %v1271_v59 = vrot.slane %v1269_v53, 5  ;;  %v5618_v60 = vld [vmem:[%s6629_s1 + $0x190] sm:$0xff]   ;;  %v5623_v44 = vld [vmem:[%s6629_s1 + $0x1c0] sm:$0xff]   ;;  %v6117_v9 = vld [vmem:[%s5773_s14 + $0x2c] sm:$0x1] }
  0x6e   : > { %5305 = vmatprep.subr.bf16.mxu0 %v5610_v55  ;;  %5328 = vmatpush3.bf16.msra.mxu1 %v5609_v48  ;;  %v4408_v46 = vcombine.low %v1350_v40, %v1354_v43  ;;  %v1257_v48 = vrot.slane %v1255_v37, 5  ;;  %v1250_v54 = vsel %vm5808_vm2, %v1245_v45, %v1249_v25  ;;  %v1663_v21 = vrot.slane %v1661_v10, 4  ;;  %v4475_v43 = vld [vmem:[%s5773_s14 + $0x18] sm:$0xe]  ;;  %v4439_v10 = vld [vmem:[%s5773_s14 + $0x30] sm:$0xf] }
  0x6f   : > { %5329 = vmatprep.subr.bf16.mxu1 %v5611_v57  ;;  %5275 = vmatprep.mubr.bf16.mxu0 %v4407_v18  ;;  %v4419_v58 = vcombine.low %v1236_v51, %v1250_v54  ;;  %v1272_v63 = vor.u32 %v1271_v59, %v1268_v52  ;;  %v1653_v25 = vor.u32 %v1652_v14, %v1649_v13  ;;  %v4482_v32 = vrot.slane %v4474_v16, 9  ;;  %v6123_v13 = vld [vmem:[%s5773_s14 + $0x34] sm:$0x1]  ;;  %v4441_v16 = vld [vmem:[%s5773_s14 + $0x38] sm:$0xf] }
  0x70   : > { %v1667_v31 = vor.u32 %v1666_v22, %v1663_v21  ;;  %v1678_v39 = vshll.u32 %v4433_v23, 16  ;;  %v6129_v21 = vld [vmem:[%s5773_s14 + $0x3c] sm:$0x1]  ;;  %v5626_v22 = vld [vmem:[%s6629_s1 + $0x270] sm:$0xff]  }
  0x71   : > { %5306 = vmatpush3.bf16.msra.mxu0 %v5610_v55  ;;  %v1258_v55 = vor.u32 %v1257_v48, %v1254_v47  ;;  %5299 = vmatprep.mubr.bf16.mxu1 %v4419_v58  ;;  %v1273_v8 = vrot.slane %v1272_v63, 4  ;;  %v1654_v37 = vrot.slane %v1653_v25, 4  ;;  %v1677_v47 = vrot.slane %v1675_v35, 4  ;;  %v6106_v58 = vld [vmem:[%s6629_s1 + $0x278] sm:$0xff]  }
  0x72   : > { %5307 = vmatprep.subr.bf16.mxu0 %v5612_v61  ;;  %5330 = vmatpush3.bf16.msra.mxu1 %v5611_v57  ;;  %v1275_v57 = vshll.u32 %v1166_v15, 16  ;;  %v1670_v15 = vshll.u32 %v4432_v5, 16  ;;  %v1668_v45 = vrot.slane %v1667_v31, 4  ;;  %v1689_v48 = vshrl.u32 %v4435_v29, 16 }
  0x73   : > { %5331 = vmatprep.subr.bf16.mxu1 %v5613_v17  ;;  %v1680_v52 = vrot.slane %v1678_v39, 5  ;;  %v1726_v25 = vshll.u32 %v6123_v13, 16  ;;  %v1734_v39 = vshll.u32 %v4441_v16, 16 }
  0x74   : > { %5276 = vmatmul.mubr.bf16.gmra.mxu0 %v4408_v46  ;;  %v1277_v62 = vrot.slane %v1275_v57, 5  ;;  %v1672_v26 = vrot.slane %v1670_v15, 5  ;;  %v1943_v46 = vsel %vm5949_vm5, %v4482_v32, %v1942_v33  ;;  %v6142_v33 = vld [vmem:[%s5773_s14 + $0x44] sm:$0x1] }
  0x75   : > { %5308 = vmatpush3.bf16.msra.mxu0 %v5612_v61  ;;  %v1259_v61 = vrot.slane %v1258_v55, 4  ;;  %v1691_v55 = vrot.slane %v1689_v48, 4  ;;  %v1954_v48 = vrot.slane %v6117_v9, 5 }
  0x76   : > { %5309 = vmatprep.subr.bf16.mxu0 %v5614_v28  ;;  %5332 = vmatpush3.bf16.msra.mxu1 %v5613_v17  ;;  %v4481_v17 = vrot.slane %v4473_v12, 9  ;;  %v1278_v18 = vsel %vm5808_vm2, %v1273_v8, %v1277_v62  ;;  %v1673_v54 = vsel %vm5808_vm2, %v1668_v45, %v1672_v26  ;;  %v4437_v8 = vld [vmem:[%s5773_s14 + $0x28] sm:$0xf]  ;;  %v4443_v26 = vld [vmem:[%s5773_s14 + $0x40] sm:$0xf] }
  0x77   : > { %5333 = vmatprep.subr.bf16.mxu1 %v5615_v34  ;;  %v1264_v3 = vsel %vm5808_vm2, %v1259_v61, %v1263_v56  ;;  %v1692_v56 = vshll.u32 %v4435_v29, 16  ;;  %v4483_v61 = vrot.slane %v4475_v43, 9  ;;  %v1703_v14 = vshrl.u32 %v4437_v8, 16  ;;  %v5627_v29 = vld [vmem:[%s6629_s1 + $0x230] sm:$0xff]  }
  0x78   : > { %v4420_v24 = vcombine.low %v1264_v3, %v1278_v18  ;;  %v1939_v38 = vsel %vm5949_vm5, %v4481_v17, %v1938_v27  ;;  %v1706_v15 = vshll.u32 %v4437_v8, 16  ;;  %v1712_v18 = vshll.u32 %v6117_v9, 16 }
  0x79   : > { %5310 = vmatpush3.bf16.msra.mxu0 %v5614_v28  ;;  %v4434_v28 = vld [vmem:[%s5773_s14 + $0x1c] sm:$0x1]  ;;  %v4505_v51 = vcombine.low %v1939_v38, %v1943_v46  ;;  %v1694_v63 = vrot.slane %v1692_v56, 5  ;;  %v1705_v23 = vrot.slane %v1703_v14, 4  ;;  %v1731_v27 = vshrl.u32 %v4441_v16, 16 }
  0x7a   : > { %5311 = vmatprep.subr.bf16.mxu0 %v5616_v49  ;;  %5334 = vmatpush3.bf16.msra.mxu1 %v5615_v34  ;;  %v4436_v34 = vld [vmem:[%s5773_s14 + $0x24] sm:$0x1]  ;;  %v1684_v40 = vshll.u32 %v4434_v28, 16  ;;  %v1946_v62 = vrot.slane %v4434_v28, 5  ;;  %v1745_v43 = vshrl.u32 %v4443_v26, 16  ;;  %v1748_v46 = vshll.u32 %v4443_v26, 16 }
  0x7b   : > { %5335 = vmatprep.subr.bf16.mxu1 %v5617_v50  ;;  %5300 = vmatmul.mubr.bf16.gmra.mxu1 %v4420_v24  ;;  %v1698_v57 = vshll.u32 %v4436_v34, 16  ;;  %v1950_v1 = vrot.slane %v4436_v34, 5  ;;  %v1695_v6 = vor.u32 %v1694_v63, %v1691_v55  ;;  %v1708_v24 = vrot.slane %v1706_v15, 5  ;;  %v4526_v26 = vld [vmem:[%s5773_s14 + $0x10] sm:$0xf] }
  0x7c   : > { %v1686_v53 = vrot.slane %v1684_v40, 5  ;;  %5343 = vmatprep.mubr.bf16.mxu1 %v4505_v51  ;;  %v1947_v5 = vsel %vm5949_vm5, %v4483_v61, %v1946_v62  ;;  %v1740_v40 = vshll.u32 %v6129_v21, 16  ;;  %v1750_v55 = vrot.slane %v1748_v46, 5 }
  0x7d   : > { %5312 = vmatpush3.bf16.msra.mxu0 %v5616_v49  ;;  %v4476_v49 = vld [vmem:[%s5773_s14 + $0x20] sm:$0xe]  ;;  %v1700_v4 = vrot.slane %v1698_v57, 5  ;;  %v1696_v17 = vrot.slane %v1695_v6, 4  ;;  %v1709_v35 = vor.u32 %v1708_v24, %v1705_v23  ;;  %v5628_v57 = vld [vmem:[%s6629_s1 + $0x268] sm:$0xff]   ;;  %v1958_v63 = vrot.slane %v6123_v13, 5 }
  0x7e   : > { %5313 = vmatprep.subr.bf16.mxu0 %v5618_v60  ;;  %5336 = vmatpush3.bf16.msra.mxu1 %v5617_v50  ;;  %v1659_v50 = vsel %vm5808_vm2, %v1654_v37, %v1658_v20  ;;  %v1720_v20 = vshll.u32 %v4439_v10, 16  ;;  %v1733_v37 = vrot.slane %v1731_v27, 4  ;;  %v1742_v51 = vrot.slane %v1740_v40, 5  ;;  %v5630_v6 = vld [vmem:[%s6629_s1 + $0x260] sm:$0xff]   ;;  %v5634_v23 = vld [vmem:[%s6629_s1 + $0x250] sm:$0xff]  }
  0x7f   : > { %5337 = vmatprep.subr.bf16.mxu1 %v5619_v0  ;;  %v4461_v59 = vcombine.low %v1659_v50, %v1673_v54  ;;  %v1701_v28 = vsel %vm5808_vm2, %v1696_v17, %v1700_v4  ;;  %v1710_v45 = vrot.slane %v1709_v35, 4  ;;  %v1736_v50 = vrot.slane %v1734_v39, 5  ;;  %v5633_v17 = vld [vmem:[%s6629_s1 + $0x218] sm:$0xff]   ;;  %v5635_v24 = vld [vmem:[%s6629_s1 + $0x210] sm:$0xff]   ;;  %v4549_v27 = vld [vmem:[%s5773_s14 + $0xc] sm:$0x1] }
  0x80   : > { %v1722_v32 = vrot.slane %v1720_v20, 5  ;;  %v1962_v9 = vrot.slane %v6129_v21, 5  ;;  %v1966_v14 = vrot.slane %v6142_v33, 5  ;;  %v2226_v35 = vshll.u32 %v4526_v26, 16  ;;  %v4528_v40 = vld [vmem:[%s5773_s14 + $0x20] sm:$0xf] }
  0x81   : > { %5314 = vmatpush3.bf16.msra.mxu0 %v5618_v60  ;;  %v1681_v60 = vor.u32 %v1680_v52, %v1677_v47  ;;  %5319 = vmatprep.mubr.bf16.mxu0 %v4461_v59  ;;  %v1754_v47 = vshll.u32 %v6142_v33, 16  ;;  %v1747_v52 = vrot.slane %v1745_v43, 4  ;;  %v4478_v59 = vld [vmem:[%s5773_s14 + $0x30] sm:$0xe]  ;;  %v1737_v61 = vor.u32 %v1736_v50, %v1733_v37  ;;  %v6203_v37 = vld [vmem:[%s5773_s14 + $0x18] sm:$0xf] }
  0x82   : > { %5315 = vmatprep.subr.bf16.mxu0 %v5620_v19  ;;  %5338 = vmatpush3.bf16.msra.mxu1 %v5619_v0  ;;  %v4484_v0 = vrot.slane %v4476_v49, 9  ;;  %v4486_v62 = vrot.slane %v4478_v59, 9  ;;  %v2218_v33 = vshll.u32 %v4549_v27, 16  ;;  %v4551_v43 = vld [vmem:[%s5773_s14 + $0x1c] sm:$0x1]  ;;  %v2228_v46 = vrot.slane %v2226_v35, 5 }
  0x83   : > { %5339 = vmatprep.subr.bf16.mxu1 %v5621_v30  ;;  %v1682_v3 = vrot.slane %v1681_v60, 4  ;;  %v1756_v56 = vrot.slane %v1754_v47, 5 }
  0x84   : > { %v1951_v7 = vsel %vm5949_vm5, %v4484_v0, %v1950_v1  ;;  %v4479_v0 = vld [vmem:[%s5773_s14 + $0x38] sm:$0xe]  ;;  %v4480_v1 = vld [vmem:[%s5773_s14 + $0x40] sm:$0xe]  ;;  %v1959_v8 = vsel %vm5949_vm5, %v4486_v62, %v1958_v63 }
  0x85   : > { %5316 = vmatpush3.bf16.msra.mxu0 %v5620_v19  ;;  %v1687_v11 = vsel %vm5808_vm2, %v1682_v3, %v1686_v53  ;;  %v4506_v12 = vcombine.low %v1947_v5, %v1951_v7  ;;  %v1717_v19 = vshrl.u32 %v4439_v10, 16  ;;  %v4477_v53 = vld [vmem:[%s5773_s14 + $0x28] sm:$0xe]  ;;  %v1751_v3 = vor.u32 %v1750_v55, %v1747_v52 }
  0x86   : > { %5317 = vmatprep.subr.bf16.mxu0 %v5622_v36  ;;  %5340 = vmatpush3.bf16.msra.mxu1 %v5621_v30  ;;  %v1714_v30 = vrot.slane %v1712_v18, 5  ;;  %v4462_v34 = vcombine.low %v1687_v11, %v1701_v28  ;;  %v4487_v5 = vrot.slane %v4479_v0, 9  ;;  %v1738_v7 = vrot.slane %v1737_v61, 4  ;;  %v5631_v11 = vld [vmem:[%s6629_s1 + $0x220] sm:$0xff]   ;;  %v4550_v28 = vld [vmem:[%s5773_s14 + $0x14] sm:$0x1] }
  0x87   : > { %5341 = vmatprep.subr.bf16.mxu1 %v5623_v44  ;;  %v1719_v31 = vrot.slane %v1717_v19, 4  ;;  %v4488_v10 = vrot.slane %v4480_v1, 9  ;;  %v2240_v52 = vshll.u32 %v6203_v37, 16  ;;  %v2251_v55 = vshrl.u32 %v4528_v40, 16  ;;  %v5639_v61 = vld [vmem:[%s6629_s1 + $0x200] sm:$0xff]  }
  0x88   : > { %v1715_v54 = vsel %vm5808_vm2, %v1710_v45, %v1714_v30  ;;  %v1743_v15 = vsel %vm5808_vm2, %v1738_v7, %v1742_v51  ;;  %v1963_v16 = vsel %vm5949_vm5, %v4487_v5, %v1962_v9  ;;  %v2237_v51 = vshrl.u32 %v6203_v37, 16  ;;  %v5638_v1 = vld [vmem:[%s6629_s1 + $0x240] sm:$0xff]  }
  0x89   : > { %5318 = vmatpush3.bf16.msra.mxu0 %v5622_v36  ;;  %v1728_v36 = vrot.slane %v1726_v25, 5  ;;  %v1723_v38 = vor.u32 %v1722_v32, %v1719_v31  ;;  %v1967_v19 = vsel %vm5949_vm5, %v4488_v10, %v1966_v14  ;;  %v4525_v25 = vld [vmem:[%s5773_s14 + $0x8] sm:$0xf]  ;;  %v2253_v63 = vrot.slane %v2251_v55, 4  ;;  %v5649_v55 = vld [vmem:[%s6629_s1 + $0x2e0] sm:$0xff]  }
  0x8a   : > { %5351 = vmatprep.subr.bf16.mxu0 %v6106_v58  ;;  %5342 = vmatpush3.bf16.msra.mxu1 %v5623_v44  ;;  %v5629_v44 = vld [vmem:[%s6629_s1 + $0x228] sm:$0xff]   ;;  %v4508_v21 = vcombine.low %v1963_v16, %v1967_v19  ;;  %v2212_v30 = vshll.u32 %v4525_v25, 16  ;;  %v4585_v31 = vcombine.low %v4525_v25, %v4526_v26 }
  0x8b   : > { %5375 = vmatprep.subr.bf16.mxu1 %v5625_v2  ;;  %v1724_v49 = vrot.slane %v1723_v38, 4  ;;  %v5637_v32 = vld [vmem:[%s6629_s1 + $0x208] sm:$0xff]  }
  0x8c   : > { %5320 = vmatmul.mubr.bf16.vlgmr.msra.gmra.mxu0 %v4462_v34  ;;  %v2223_v34 = vshrl.u32 %v4526_v26, 16  ;;  %v2214_v39 = vrot.slane %v2212_v30, 5  ;;  %v4529_v19 = vld [vmem:[%s5773_s14 + $0x28] sm:$0xf] }
  0x8d   : > { %5344 = vmatmul.mubr.bf16.vlgmr.msra.gmra.mxu1 %v4506_v12  ;;  %5352 = vmatpush3.bf16.msra.mxu0 %v6106_v58  ;;  %v4485_v58 = vrot.slane %v4477_v53, 9  ;;  %v1729_v60 = vsel %vm5808_vm2, %v1724_v49, %v1728_v36  ;;  %v1752_v12 = vrot.slane %v1751_v3, 4  ;;  %v2232_v36 = vshll.u32 %v4550_v28, 16  ;;  %v5636_v49 = vld [vmem:[%s6629_s1 + $0x248] sm:$0xff]  }
  0x8e   : > { %5376 = vmatpush3.bf16.msra.mxu1 %v5625_v2  ;;  %5353 = vmatprep.subr.bf16.mxu0 %v5626_v22  ;;  %v4463_v2 = vcombine.low %v1715_v54, %v1729_v60  ;;  %v2225_v45 = vrot.slane %v2223_v34, 4  ;;  %v2246_v53 = vshll.u32 %v4551_v43, 16  ;;  %v2242_v60 = vrot.slane %v2240_v52, 5  ;;  %v5646_v28 = vld [vmem:[%s6629_s1 + $0x2a8] sm:$0xff]   ;;  %v4556_v43 = vld [vmem:[%s5773_s14 + $0x44] sm:$0x1] }
  0x8f   : > { %5377 = vmatprep.subr.bf16.mxu1 %v5627_v29  ;;  %v1955_v4 = vsel %vm5949_vm5, %v4485_v58, %v1954_v48  ;;  %v1757_v18 = vsel %vm5808_vm2, %v1752_v12, %v1756_v56  ;;  %v2234_v47 = vrot.slane %v2232_v36, 5  ;;  %v4552_v48 = vld [vmem:[%s5773_s14 + $0x24] sm:$0x1]  ;;  %v2254_v56 = vshll.u32 %v4528_v40, 16 }
  0x90   : > { %5323 = vmatprep.mubr.bf16.mxu0 %v4463_v2  ;;  %v4507_v13 = vcombine.low %v1955_v4, %v1959_v8  ;;  %v4464_v20 = vcombine.low %v1743_v15, %v1757_v18  ;;  %v2229_v54 = vor.u32 %v2228_v46, %v2225_v45  ;;  %v2239_v58 = vrot.slane %v2237_v51, 4  ;;  %v5645_v18 = vld [vmem:[%s6629_s1 + $0x2f0] sm:$0xff]  }
  0x91   : > { %5354 = vmatpush3.bf16.msra.mxu0 %v5626_v22  ;;  %v5632_v22 = vld [vmem:[%s6629_s1 + $0x258] sm:$0xff]   ;;  %v2256_v0 = vrot.slane %v2254_v56, 5  ;;  %v2248_v4 = vrot.slane %v2246_v53, 5  ;;  %v4586_v15 = vcombine.low %v6203_v37, %v4528_v40 }
  0x92   : > { %5378 = vmatpush3.bf16.msra.mxu1 %v5627_v29  ;;  %5355 = vmatprep.subr.bf16.mxu0 %v5628_v57  ;;  %v2209_v29 = vshrl.u32 %v4525_v25, 16  ;;  %v2230_v62 = vrot.slane %v2229_v54, 4  ;;  %v2243_v3 = vor.u32 %v2242_v60, %v2239_v58  ;;  %v2268_v25 = vshll.u32 %v4529_v19, 16 }
  0x93   : > { %5379 = vmatprep.subr.bf16.mxu1 %v5629_v44  ;;  %5347 = vmatprep.mubr.bf16.mxu1 %v4507_v13  ;;  %v5642_v13 = vld [vmem:[%s6629_s1 + $0x2b8] sm:$0xff]   ;;  %v2316_v54 = vshll.u32 %v4556_v43, 16 }
  0x94   : > { %5324 = vmatmul.mubr.bf16.gmra.mxu0 %v4464_v20  ;;  %v2211_v38 = vrot.slane %v2209_v29, 4  ;;  %v2235_v5 = vsel %vm5808_vm2, %v2230_v62, %v2234_v47  ;;  %v2244_v9 = vrot.slane %v2243_v3, 4  ;;  %v4530_v20 = vld [vmem:[%s5773_s14 + $0x30] sm:$0xf]  ;;  %v2270_v35 = vrot.slane %v2268_v25, 5 }
  0x95   : > { %5356 = vmatpush3.bf16.msra.mxu0 %v5628_v57  ;;  %5348 = vmatmul.mubr.bf16.gmra.mxu1 %v4508_v21  ;;  %v2260_v57 = vshll.u32 %v4552_v48, 16  ;;  %v4553_v21 = vld [vmem:[%s5773_s14 + $0x2c] sm:$0x1]  ;;  %v2279_v27 = vshrl.u32 %v4530_v20, 16  ;;  %v2282_v29 = vshll.u32 %v4530_v20, 16 }
  0x96   : > { %5380 = vmatpush3.bf16.msra.mxu1 %v5629_v44  ;;  %5357 = vmatprep.subr.bf16.mxu0 %v5630_v6  ;;  %v2220_v44 = vrot.slane %v2218_v33, 5  ;;  %v2215_v50 = vor.u32 %v2214_v39, %v2211_v38  ;;  %v2249_v12 = vsel %vm5808_vm2, %v2244_v9, %v2248_v4  ;;  %v2274_v26 = vshll.u32 %v4553_v21, 16  ;;  %v4532_v33 = vld [vmem:[%s5773_s14 + $0x40] sm:$0xf]  ;;  %v4555_v38 = vld [vmem:[%s5773_s14 + $0x3c] sm:$0x1] }
  0x97   : > { %5381 = vmatprep.subr.bf16.mxu1 %v5631_v11  ;;  %5391 = vmatprep.mubr.bf16.mxu1 %v4585_v31  ;;  %v2262_v7 = vrot.slane %v2260_v57, 5  ;;  %v4587_v31 = vcombine.low %v4529_v19, %v4530_v20  ;;  %v2281_v37 = vrot.slane %v2279_v27, 4  ;;  %v2284_v39 = vrot.slane %v2282_v29, 5  ;;  %v5651_v4 = vld [vmem:[%s6629_s1 + $0x2d8] sm:$0xff]   ;;  %v5654_v21 = vld [vmem:[%s6629_s1 + $0x290] sm:$0xff]  }
  0x98   : > { %v2216_v59 = vrot.slane %v2215_v50, 4  ;;  %v2276_v36 = vrot.slane %v2274_v26, 5  ;;  %v2302_v47 = vshll.u32 %v4555_v38, 16  ;;  %v2307_v48 = vshrl.u32 %v4532_v33, 16  ;;  %v5648_v50 = vld [vmem:[%s6629_s1 + $0x2a0] sm:$0xff]  }
  0x99   : > { %5358 = vmatpush3.bf16.msra.mxu0 %v5630_v6  ;;  %v2257_v6 = vor.u32 %v2256_v0, %v2253_v63  ;;  %v2285_v51 = vor.u32 %v2284_v39, %v2281_v37  ;;  %v5656_v39 = vld [vmem:[%s6629_s1 + $0x288] sm:$0xff]  }
  0x9a   : > { %5382 = vmatpush3.bf16.msra.mxu1 %v5631_v11  ;;  %5359 = vmatprep.subr.bf16.mxu0 %v5632_v22  ;;  %v2221_v2 = vsel %vm5808_vm2, %v2216_v59, %v2220_v44  ;;  %v5643_v11 = vld [vmem:[%s6629_s1 + $0x2f8] sm:$0xff]   ;;  %v2309_v57 = vrot.slane %v2307_v48, 4 }
  0x9b   : > { %5383 = vmatprep.subr.bf16.mxu1 %v5633_v17  ;;  %v4573_v8 = vcombine.low %v2221_v2, %v2235_v5  ;;  %v2258_v10 = vrot.slane %v2257_v6, 4  ;;  %v2286_v58 = vrot.slane %v2285_v51, 4 }
  0x9d   : > { %5360 = vmatpush3.bf16.msra.mxu0 %v5632_v22  ;;  %5367 = vmatprep.mubr.bf16.mxu0 %v4573_v8  ;;  %v2263_v14 = vsel %vm5808_vm2, %v2258_v10, %v2262_v7  ;;  %v5647_v22 = vld [vmem:[%s6629_s1 + $0x2e8] sm:$0xff]   ;;  %v5650_v7 = vld [vmem:[%s6629_s1 + $0x298] sm:$0xff]   ;;  %v5655_v10 = vld [vmem:[%s6629_s1 + $0x2d0] sm:$0xff]  }
  0x9e   : > { %5384 = vmatpush3.bf16.msra.mxu1 %v5633_v17  ;;  %5361 = vmatprep.subr.bf16.mxu0 %v5634_v23  ;;  %v4574_v16 = vcombine.low %v2249_v12, %v2263_v14  ;;  %v5644_v17 = vld [vmem:[%s6629_s1 + $0x2b0] sm:$0xff]  }
  0x9f   : > { %5385 = vmatprep.subr.bf16.mxu1 %v5635_v24  ;;  %v4633_v12 = vld [vmem:[%s5773_s14 + $0x10] sm:$0xf]  ;;  %v4634_v14 = vld [vmem:[%s5773_s14 + $0x14] sm:$0x1] }
  0xa1   : > { %5362 = vmatpush3.bf16.msra.mxu0 %v5634_v23  ;;  %v4554_v23 = vld [vmem:[%s5773_s14 + $0x34] sm:$0x1] }
  0xa2   : > { %5386 = vmatpush3.bf16.msra.mxu1 %v5635_v24  ;;  %5363 = vmatprep.subr.bf16.mxu0 %v5636_v49  ;;  %v2265_v24 = vshrl.u32 %v4529_v19, 16  ;;  %v2288_v30 = vshll.u32 %v4554_v23, 16  ;;  %v2800_v19 = vshll.u32 %v4634_v14, 16 }
  0xa3   : > { %5387 = vmatprep.subr.bf16.mxu1 %v5637_v32 }
  0xa4   : > { %v2267_v34 = vrot.slane %v2265_v24, 4  ;;  %v2290_v40 = vrot.slane %v2288_v30, 5  ;;  %v2802_v26 = vrot.slane %v2800_v19, 5 }
  0xa5   : > { %5364 = vmatpush3.bf16.msra.mxu0 %v5636_v49  ;;  %v2310_v49 = vshll.u32 %v4532_v33, 16 }
  0xa6   : > { %5388 = vmatpush3.bf16.msra.mxu1 %v5637_v32  ;;  %5365 = vmatprep.subr.bf16.mxu0 %v5638_v1  ;;  %v4531_v32 = vld [vmem:[%s5773_s14 + $0x38] sm:$0xf]  ;;  %v2271_v46 = vor.u32 %v2270_v35, %v2267_v34  ;;  %v2291_v2 = vsel %vm5808_vm2, %v2286_v58, %v2290_v40  ;;  %v4640_v35 = vld [vmem:[%s5773_s14 + $0x2c] sm:$0x1] }
  0xa7   : > { %5389 = vmatprep.subr.bf16.mxu1 %v5639_v61  ;;  %v2293_v44 = vshrl.u32 %v4531_v32, 16  ;;  %v2296_v45 = vshll.u32 %v4531_v32, 16  ;;  %v2312_v59 = vrot.slane %v2310_v49, 5  ;;  %v4588_v62 = vcombine.low %v4531_v32, %v4532_v33  ;;  %v4639_v32 = vld [vmem:[%s5773_s14 + $0x28] sm:$0xf] }
  0xa8   : > { %v2272_v56 = vrot.slane %v2271_v46, 4  ;;  %v5657_v33 = vld [vmem:[%s6629_s1 + $0x2c8] sm:$0xff]   ;;  %v2833_v43 = vshrl.u32 %v4639_v32, 16  ;;  %v5659_v46 = vld [vmem:[%s6629_s1 + $0x2c0] sm:$0xff]  }
  0xa9   : > { %5366 = vmatpush3.bf16.msra.mxu0 %v5638_v1  ;;  %v2295_v52 = vrot.slane %v2293_v44, 4  ;;  %v2298_v53 = vrot.slane %v2296_v45, 5  ;;  %v2313_v0 = vor.u32 %v2312_v59, %v2309_v57  ;;  %v2318_v1 = vrot.slane %v2316_v54, 5 }
  0xaa   : > { %5390 = vmatpush3.bf16.msra.mxu1 %v5639_v61  ;;  %5399 = vmatprep.subr.bf16.mxu0 %v5642_v13  ;;  %v2304_v61 = vrot.slane %v2302_v47, 5  ;;  %v2277_v63 = vsel %vm5808_vm2, %v2272_v56, %v2276_v36  ;;  %v2836_v44 = vshll.u32 %v4639_v32, 16  ;;  %v2842_v45 = vshll.u32 %v4640_v35, 16  ;;  %v5658_v56 = vld [vmem:[%s6629_s1 + $0x280] sm:$0xff]   ;;  %v5669_v32 = vld [vmem:[%s6629_s1 + $0x328] sm:$0xff]  }
  0xab   : > { %5423 = vmatprep.subr.bf16.mxu1 %v5643_v11  ;;  %v2299_v60 = vor.u32 %v2298_v53, %v2295_v52  ;;  %v4575_v5 = vcombine.low %v2277_v63, %v2291_v2  ;;  %v2314_v6 = vrot.slane %v2313_v0, 4  ;;  %v2835_v52 = vrot.slane %v2833_v43, 4  ;;  %v5662_v63 = vld [vmem:[%s6629_s1 + $0x378] sm:$0xff]   ;;  %v5661_v2 = vld [vmem:[%s5773_s14 + $0x20] ss:$8 sps:$4 sm:$0xff]  }
  0xac   : > { %5368 = vmatmul.mubr.bf16.vlgmr.msra.gmra.mxu0 %v4574_v16  ;;  %v4636_v16 = vld [vmem:[%s5773_s14 + $0x1c] sm:$0x1]  ;;  %v2838_v53 = vrot.slane %v2836_v44, 5  ;;  %v2844_v58 = vrot.slane %v2842_v45, 5 }
  0xad   : > { %5392 = vmatmul.mubr.bf16.vlgmr.msra.gmra.mxu1 %v4586_v15  ;;  %5400 = vmatpush3.bf16.msra.mxu0 %v5642_v13  ;;  %v2300_v3 = vrot.slane %v2299_v60, 4  ;;  %v2319_v9 = vsel %vm5808_vm2, %v2314_v6, %v2318_v1  ;;  %v4635_v15 = vld [vmem:[%s5773_s14 + $0x18] sm:$0xf]  ;;  %v2814_v23 = vshll.u32 %v4636_v16, 16  ;;  %v4641_v6 = vld [vmem:[%s5773_s14 + $0x30] sm:$0xf] }
  0xae   : > { %5424 = vmatpush3.bf16.msra.mxu1 %v5643_v11  ;;  %5401 = vmatprep.subr.bf16.mxu0 %v5644_v17  ;;  %v5660_v11 = vld [vmem:[%s5773_s14 + $0x10] ss:$8 sps:$4 sm:$0xff]   ;;  %v2805_v20 = vshrl.u32 %v4635_v15, 16  ;;  %v2839_v59 = vor.u32 %v2838_v53, %v2835_v52  ;;  %v5670_v53 = vld [vmem:[%s6629_s1 + $0x360] sm:$0xff]  }
  0xaf   : > { %5425 = vmatprep.subr.bf16.mxu1 %v5645_v18  ;;  %5395 = vmatprep.mubr.bf16.mxu1 %v4587_v31  ;;  %v2305_v8 = vsel %vm5808_vm2, %v2300_v3, %v2304_v61  ;;  %v2816_v30 = vrot.slane %v2814_v23, 5  ;;  %v4638_v31 = vld [vmem:[%s5773_s14 + $0x24] sm:$0x1]  ;;  %v5663_v1 = vld [vmem:[%s6629_s1 + $0x338] sm:$0xff]  }
  0xb0   : > { %5371 = vmatprep.mubr.bf16.mxu0 %v4575_v5  ;;  %v4576_v13 = vcombine.low %v2305_v8, %v2319_v9  ;;  %v2807_v27 = vrot.slane %v2805_v20, 4  ;;  %v2828_v38 = vshll.u32 %v4638_v31, 16  ;;  %v5665_v5 = vld [vmem:[%s6629_s1 + $0x330] sm:$0xff]  }
  0xb1   : > { %5402 = vmatpush3.bf16.msra.mxu0 %v5644_v17  ;;  %v2791_v17 = vshrl.u32 %v4633_v12, 16  ;;  %v5664_v8 = vld [vmem:[%s6629_s1 + $0x370] sm:$0xff]  }
  0xb2   : > { %5426 = vmatpush3.bf16.msra.mxu1 %v5645_v18  ;;  %5403 = vmatprep.subr.bf16.mxu0 %v5646_v28  ;;  %v2794_v18 = vshll.u32 %v4633_v12, 16  ;;  %v2830_v51 = vrot.slane %v2828_v38, 5  ;;  %v5666_v9 = vld [vmem:[%s5773_s14 + $0x30] ss:$8 sps:$4 sm:$0xff]   ;;  %v2847_v12 = vshrl.u32 %v4641_v6, 16  ;;  %v5668_v38 = vld [vmem:[%s6629_s1 + $0x368] sm:$0xff]  }
  0xb3   : > { %5427 = vmatprep.subr.bf16.mxu1 %v5647_v22  ;;  %v2793_v24 = vrot.slane %v2791_v17, 4 }
  0xb4   : > { %5372 = vmatmul.mubr.bf16.gmra.mxu0 %v4576_v13  ;;  %v2796_v25 = vrot.slane %v2794_v18, 5  ;;  %v2850_v13 = vshll.u32 %v4641_v6, 16  ;;  %v4645_v18 = vld [vmem:[%s5773_s14 + $0x40] sm:$0xf]  ;;  %v2849_v19 = vrot.slane %v2847_v12, 4 }
  0xb5   : > { %5404 = vmatpush3.bf16.msra.mxu0 %v5646_v28  ;;  %5396 = vmatmul.mubr.bf16.gmra.mxu1 %v4588_v62  ;;  %v4637_v28 = vld [vmem:[%s5773_s14 + $0x20] sm:$0xf]  ;;  %v2840_v62 = vrot.slane %v2839_v59, 4 }
  0xb6   : > { %5428 = vmatpush3.bf16.msra.mxu1 %v5647_v22  ;;  %5405 = vmatprep.subr.bf16.mxu0 %v5648_v50  ;;  %v2808_v22 = vshll.u32 %v4635_v15, 16  ;;  %v2797_v34 = vor.u32 %v2796_v25, %v2793_v24  ;;  %v2819_v36 = vshrl.u32 %v4637_v28, 16  ;;  %v2822_v37 = vshll.u32 %v4637_v28, 16 }
  0xb7   : > { %5429 = vmatprep.subr.bf16.mxu1 %v5649_v55  ;;  %5415 = vmatprep.mubr.bf16.mxu0 %v5660_v11  ;;  %v2845_v3 = vsel %vm5808_vm2, %v2840_v62, %v2844_v58  ;;  %v4644_v11 = vld [vmem:[%s5773_s14 + $0x3c] sm:$0x1]  ;;  %v2852_v20 = vrot.slane %v2850_v13, 5 }
  0xb8   : > { %v2810_v29 = vrot.slane %v2808_v22, 5  ;;  %v2798_v47 = vrot.slane %v2797_v34, 4  ;;  %v2821_v48 = vrot.slane %v2819_v36, 4  ;;  %v2824_v49 = vrot.slane %v2822_v37, 5  ;;  %v4647_v22 = vld [vmem:[%s5773_s14 + $0x48] sm:$0xf] }
  0xb9   : > { %5406 = vmatpush3.bf16.msra.mxu0 %v5648_v50  ;;  %v2870_v17 = vshll.u32 %v4644_v11, 16  ;;  %v2853_v28 = vor.u32 %v2852_v20, %v2849_v19  ;;  %v2889_v34 = vshrl.u32 %v4647_v22, 16  ;;  %v2892_v35 = vshll.u32 %v4647_v22, 16  ;;  %v5667_v37 = vld [vmem:[%s5773_s14 + $0x40] ss:$8 sps:$4 sm:$0xff]   ;;  %v5673_v62 = vld [vmem:[%s6629_s1 + $0x318] sm:$0xff]  }
  0xba   : > { %5430 = vmatpush3.bf16.msra.mxu1 %v5649_v55  ;;  %5407 = vmatprep.subr.bf16.mxu0 %v5650_v7  ;;  %v2811_v40 = vor.u32 %v2810_v29, %v2807_v27  ;;  %v2803_v54 = vsel %vm5808_vm2, %v2798_v47, %v2802_v26  ;;  %v2825_v55 = vor.u32 %v2824_v49, %v2821_v48  ;;  %v4648_v27 = vld [vmem:[%s5773_s14 + $0x4c] sm:$0x1]  ;;  %v2875_v29 = vshrl.u32 %v4645_v18, 16  ;;  %v4687_v11 = vld [vmem:[%s5773_s14 + $0x10] sm:$0xf] }
  0xbb   : > { %5431 = vmatprep.subr.bf16.mxu1 %v5651_v4  ;;  %v2872_v26 = vrot.slane %v2870_v17, 5  ;;  %v2898_v36 = vshll.u32 %v4648_v27, 16  ;;  %v2891_v45 = vrot.slane %v2889_v34, 4  ;;  %v5677_v17 = vld [vmem:[%s6629_s1 + $0x308] sm:$0xff]   ;;  %v3140_v20 = vshrl.u32 %v4687_v11, 16 }
  0xbc   : > { %v2812_v50 = vrot.slane %v2811_v40, 4  ;;  %v2826_v61 = vrot.slane %v2825_v55, 4  ;;  %v2877_v40 = vrot.slane %v2875_v29, 4  ;;  %v4690_v22 = vld [vmem:[%s5773_s14 + $0x1c] sm:$0x1] }
  0xbd   : > { %5408 = vmatpush3.bf16.msra.mxu0 %v5650_v7  ;;  %v4642_v7 = vld [vmem:[%s5773_s14 + $0x34] sm:$0x1]  ;;  %v2900_v52 = vrot.slane %v2898_v36, 5  ;;  %v4719_v27 = vld [vmem:[%s5773_s14 + $0x18] sm:$0xe]  ;;  %v3142_v29 = vrot.slane %v3140_v20, 4 }
  0xbe   : > { %5432 = vmatpush3.bf16.msra.mxu1 %v5651_v4  ;;  %5409 = vmatprep.subr.bf16.mxu0 %v5654_v21  ;;  %v2817_v57 = vsel %vm5808_vm2, %v2812_v50, %v2816_v30  ;;  %v2831_v0 = vsel %vm5808_vm2, %v2826_v61, %v2830_v51  ;;  %v2856_v14 = vshll.u32 %v4642_v7, 16  ;;  %v2878_v30 = vshll.u32 %v4645_v18, 16 }
  0xbf   : > { %5433 = vmatprep.subr.bf16.mxu1 %v5655_v10  ;;  %v4665_v60 = vcombine.low %v2803_v54, %v2817_v57  ;;  %v4666_v4 = vcombine.low %v2831_v0, %v2845_v3  ;;  %v5675_v0 = vld [vmem:[%s6629_s1 + $0x310] sm:$0xff]   ;;  %v4717_v3 = vld [vmem:[%s5773_s14 + $0x8] sm:$0xe] }
  0xc0   : > { %v2858_v23 = vrot.slane %v2856_v14, 5  ;;  %v2880_v43 = vrot.slane %v2878_v30, 5 }
  0xc1   : > { %5410 = vmatpush3.bf16.msra.mxu0 %v5654_v21  ;;  %5439 = vmatprep.mubr.bf16.mxu1 %v4665_v60  ;;  %v4646_v21 = vld [vmem:[%s5773_s14 + $0x44] sm:$0x1]  ;;  %v5672_v60 = vld [vmem:[%s6629_s1 + $0x358] sm:$0xff]  }
  0xc2   : > { %5434 = vmatpush3.bf16.msra.mxu1 %v5655_v10  ;;  %5411 = vmatprep.subr.bf16.mxu0 %v5656_v39  ;;  %v4643_v10 = vld [vmem:[%s5773_s14 + $0x38] sm:$0xf]  ;;  %v2884_v31 = vshll.u32 %v4646_v21, 16  ;;  %v2881_v48 = vor.u32 %v2880_v43, %v2877_v40  ;;  %v3143_v21 = vshll.u32 %v4687_v11, 16 }
  0xc3   : > { %5435 = vmatprep.subr.bf16.mxu1 %v5657_v33  ;;  %v2861_v15 = vshrl.u32 %v4643_v10, 16  ;;  %v2864_v16 = vshll.u32 %v4643_v10, 16  ;;  %v4685_v10 = vld [vmem:[%s5773_s14 + $0x8] sm:$0xf] }
  0xc4   : > { %v2886_v49 = vrot.slane %v2884_v31, 5  ;;  %v2882_v55 = vrot.slane %v2881_v48, 4  ;;  %v3126_v14 = vshrl.u32 %v4685_v10, 16  ;;  %v3145_v30 = vrot.slane %v3143_v21, 5  ;;  %v5678_v48 = vld [vmem:[%s6629_s1 + $0x340] sm:$0xff]  }
  0xc5   : > { %5412 = vmatpush3.bf16.msra.mxu0 %v5656_v39  ;;  %v2863_v24 = vrot.slane %v2861_v15, 4  ;;  %v2866_v25 = vrot.slane %v2864_v16, 5  ;;  %v2854_v39 = vrot.slane %v2853_v28, 4  ;;  %v3129_v15 = vshll.u32 %v4685_v10, 16  ;;  %v5676_v16 = vld [vmem:[%s6629_s1 + $0x348] sm:$0xff]  }
  0xc6   : > { %5436 = vmatpush3.bf16.msra.mxu1 %v5657_v33  ;;  %5413 = vmatprep.subr.bf16.mxu0 %v5658_v56  ;;  %v2887_v59 = vsel %vm5808_vm2, %v2882_v55, %v2886_v49  ;;  %v4720_v28 = vld [vmem:[%s5773_s14 + $0x20] sm:$0xe]  ;;  %v4693_v21 = vld [vmem:[%s5773_s14 + $0x28] sm:$0xf] }
  0xc7   : > { %5437 = vmatprep.subr.bf16.mxu1 %v5659_v46  ;;  %v2867_v33 = vor.u32 %v2866_v25, %v2863_v24  ;;  %v2859_v47 = vsel %vm5808_vm2, %v2854_v39, %v2858_v23  ;;  %v3128_v24 = vrot.slane %v3126_v14, 4  ;;  %v3131_v25 = vrot.slane %v3129_v15, 5  ;;  %v5679_v49 = vld [vmem:[%s6629_s1 + $0x300] sm:$0xff]   ;;  %v4722_v14 = vld [vmem:[%s5773_s14 + $0x30] sm:$0xe] }
  0xc8   : > { %v4728_v36 = vrot.slane %v4720_v28, 9  ;;  %v3146_v39 = vor.u32 %v3145_v30, %v3142_v29  ;;  %v4730_v20 = vrot.slane %v4722_v14, 9 }
  0xc9   : > { %5414 = vmatpush3.bf16.msra.mxu0 %v5658_v56  ;;  %v2868_v44 = vrot.slane %v2867_v33, 4  ;;  %v5671_v56 = vld [vmem:[%s6629_s1 + $0x320] sm:$0xff]   ;;  %v4689_v33 = vld [vmem:[%s5773_s14 + $0x18] sm:$0xf]  ;;  %v3132_v34 = vor.u32 %v3131_v25, %v3128_v24  ;;  %v3182_v24 = vshrl.u32 %v4693_v21, 16  ;;  %v3185_v25 = vshll.u32 %v4693_v21, 16 }
  0xca   : > { %5438 = vmatpush3.bf16.msra.mxu1 %v5659_v46  ;;  %5447 = vmatprep.subr.bf16.mxu0 %v5662_v63  ;;  %v2894_v46 = vrot.slane %v2892_v35, 5  ;;  %v3288_v35 = vrot.slane %v4690_v22, 5  ;;  %v3157_v43 = vshll.u32 %v4689_v33, 16 }
  0xcb   : > { %5471 = vmatprep.subr.bf16.mxu1 %v5663_v1  ;;  %v2873_v50 = vsel %vm5808_vm2, %v2868_v44, %v2872_v26  ;;  %v4692_v26 = vld [vmem:[%s5773_s14 + $0x24] sm:$0x1]  ;;  %v3133_v44 = vrot.slane %v3132_v34, 4  ;;  %v3184_v34 = vrot.slane %v3182_v24, 4  ;;  %v5690_v24 = vld [vmem:[%s6629_s1 + $0x390] sm:$0xff]  }
  0xcc   : > { %5416 = vmatmul.mubr.bf16.vlgmr.msra.gmra.mxu0 %v5661_v2  ;;  %v2895_v51 = vor.u32 %v2894_v46, %v2891_v45  ;;  %v4667_v54 = vcombine.low %v2859_v47, %v2873_v50  ;;  %v4688_v2 = vld [vmem:[%s5773_s14 + $0x14] sm:$0x1]  ;;  %v3292_v40 = vrot.slane %v4692_v26, 5  ;;  %v3163_v46 = vshll.u32 %v4690_v22, 16 }
  0xcd   : > { %5440 = vmatmul.mubr.bf16.vlgmr.msra.gmra.mxu1 %v4666_v4  ;;  %5448 = vmatpush3.bf16.msra.mxu0 %v5662_v63  ;;  %v5674_v63 = vld [vmem:[%s6629_s1 + $0x350] sm:$0xff]   ;;  %v3284_v7 = vrot.slane %v4688_v2, 5  ;;  %v3149_v12 = vshll.u32 %v4688_v2, 16  ;;  %v3147_v50 = vrot.slane %v3146_v39, 4  ;;  %v3177_v55 = vshll.u32 %v4692_v26, 16  ;;  %v5684_v26 = vld [vmem:[%s6629_s1 + $0x3a8] sm:$0xff]  }
  0xce   : > { %5472 = vmatpush3.bf16.msra.mxu1 %v5663_v1  ;;  %5449 = vmatprep.subr.bf16.mxu0 %v5664_v8  ;;  %v2896_v57 = vrot.slane %v2895_v51, 4  ;;  %v4686_v1 = vld [vmem:[%s5773_s14 + $0xc] sm:$0x1]  ;;  %v4718_v4 = vld [vmem:[%s5773_s14 + $0x10] sm:$0xe]  ;;  %v3159_v51 = vrot.slane %v3157_v43, 5 }
  0xcf   : > { %5473 = vmatprep.subr.bf16.mxu1 %v5665_v5  ;;  %5419 = vmatprep.mubr.bf16.mxu0 %v5666_v9  ;;  %v3280_v6 = vrot.slane %v4686_v1, 5  ;;  %v4726_v9 = vrot.slane %v4718_v4, 9  ;;  %v3151_v31 = vrot.slane %v3149_v12, 5  ;;  %v3179_v2 = vrot.slane %v3177_v55, 5  ;;  %v4696_v12 = vld [vmem:[%s5773_s14 + $0x34] sm:$0x1] }
  0xd0   : > { %5443 = vmatprep.mubr.bf16.mxu1 %v4667_v54  ;;  %v2901_v58 = vsel %vm5808_vm2, %v2896_v57, %v2900_v52  ;;  %v3300_v22 = vrot.slane %v4696_v12, 5 }
  0xd1   : > { %5450 = vmatpush3.bf16.msra.mxu0 %v5664_v8  ;;  %v4668_v61 = vcombine.low %v2887_v59, %v2901_v58  ;;  %v3135_v8 = vshll.u32 %v4686_v1, 16  ;;  %v3285_v18 = vsel %vm5949_vm5, %v4726_v9, %v3284_v7  ;;  %v5680_v58 = vld [vmem:[%s6629_s1 + $0x3b8] sm:$0xff]   ;;  %v4694_v9 = vld [vmem:[%s5773_s14 + $0x2c] sm:$0x1] }
  0xd2   : > { %5474 = vmatpush3.bf16.msra.mxu1 %v5665_v5  ;;  %5451 = vmatprep.subr.bf16.mxu0 %v5668_v38  ;;  %v4725_v5 = vrot.slane %v4717_v3, 9  ;;  %v3191_v29 = vshll.u32 %v4694_v9, 16 }
  0xd3   : > { %5475 = vmatprep.subr.bf16.mxu1 %v5669_v32  ;;  %v3137_v19 = vrot.slane %v3135_v8, 5  ;;  %v5682_v8 = vld [vmem:[%s6629_s1 + $0x3b0] sm:$0xff]  }
  0xd4   : > { %5420 = vmatmul.mubr.bf16.gmra.mxu0 %v5667_v37  ;;  %v3281_v13 = vsel %vm5949_vm5, %v4725_v5, %v3280_v6  ;;  %v4691_v37 = vld [vmem:[%s5773_s14 + $0x20] sm:$0xf] }
  0xd5   : > { %5452 = vmatpush3.bf16.msra.mxu0 %v5668_v38  ;;  %5444 = vmatmul.mubr.bf16.gmra.mxu1 %v4668_v61  ;;  %v4749_v23 = vcombine.low %v3281_v13, %v3285_v18  ;;  %v3154_v38 = vshrl.u32 %v4689_v33, 16  ;;  %v3168_v47 = vshrl.u32 %v4691_v37, 16  ;;  %v3138_v52 = vsel %vm5808_vm2, %v3133_v44, %v3137_v19  ;;  %v4721_v13 = vld [vmem:[%s5773_s14 + $0x28] sm:$0xe] }
  0xd6   : > { %5476 = vmatpush3.bf16.msra.mxu1 %v5669_v32  ;;  %5453 = vmatprep.subr.bf16.mxu0 %v5670_v53  ;;  %v4727_v32 = vrot.slane %v4719_v27, 9  ;;  %v3171_v54 = vshll.u32 %v4691_v37, 16  ;;  %v4729_v18 = vrot.slane %v4721_v13, 9  ;;  %v3296_v19 = vrot.slane %v4694_v9, 5  ;;  %v5685_v27 = vld [vmem:[%s6629_s1 + $0x3e8] sm:$0xff]   ;;  %v5688_v9 = vld [vmem:[%s6629_s1 + $0x398] sm:$0xff]  }
  0xd7   : > { %5477 = vmatprep.subr.bf16.mxu1 %v5671_v56  ;;  %5463 = vmatprep.mubr.bf16.mxu0 %v4749_v23  ;;  %v3156_v45 = vrot.slane %v3154_v38, 4  ;;  %v4695_v23 = vld [vmem:[%s5773_s14 + $0x30] sm:$0xf]  ;;  %v3301_v33 = vsel %vm5949_vm5, %v4730_v20, %v3300_v22  ;;  %v4700_v37 = vld [vmem:[%s5773_s14 + $0x44] sm:$0x1]  ;;  %v3193_v44 = vrot.slane %v3191_v29, 5 }
  0xd8   : > { %v3289_v57 = vsel %vm5949_vm5, %v4727_v32, %v3288_v35  ;;  %v3297_v28 = vsel %vm5949_vm5, %v4729_v18, %v3296_v19  ;;  %v3196_v30 = vshrl.u32 %v4695_v23, 16  ;;  %v3187_v35 = vrot.slane %v3185_v25, 5  ;;  %v4723_v38 = vld [vmem:[%s5773_s14 + $0x38] sm:$0xe]  ;;  %v4773_v29 = vld [vmem:[%s5773_s14 + $0x10] sm:$0xf] }
  0xd9   : > { %5454 = vmatpush3.bf16.msra.mxu0 %v5670_v53  ;;  %v3170_v53 = vrot.slane %v3168_v47, 4  ;;  %v3160_v59 = vor.u32 %v3159_v51, %v3156_v45  ;;  %v4751_v43 = vcombine.low %v3297_v28, %v3301_v33  ;;  %v4724_v47 = vld [vmem:[%s5773_s14 + $0x40] sm:$0xe]  ;;  %v4697_v51 = vld [vmem:[%s5773_s14 + $0x38] sm:$0xf]  ;;  %v3233_v21 = vshll.u32 %v4700_v37, 16 }
  0xda   : > { %5478 = vmatpush3.bf16.msra.mxu1 %v5671_v56  ;;  %5455 = vmatprep.subr.bf16.mxu0 %v5672_v60  ;;  %v3152_v56 = vsel %vm5808_vm2, %v3147_v50, %v3151_v31  ;;  %v3199_v31 = vshll.u32 %v4695_v23, 16  ;;  %v3198_v45 = vrot.slane %v3196_v30, 4  ;;  %v4731_v50 = vrot.slane %v4723_v38, 9 }
  0xdb   : > { %5479 = vmatprep.subr.bf16.mxu1 %v5673_v62  ;;  %v4761_v61 = vcombine.low %v3138_v52, %v3152_v56  ;;  %v3161_v1 = vrot.slane %v3160_v59, 4  ;;  %v4699_v52 = vld [vmem:[%s5773_s14 + $0x40] sm:$0xf]  ;;  %v4732_v56 = vrot.slane %v4724_v47, 9  ;;  %v4817_v47 = vld [vmem:[%s5773_s14 + $0x10] sm:$0xe] }
  0xdc   : > { %v3224_v13 = vshrl.u32 %v4699_v52, 16  ;;  %v3227_v14 = vshll.u32 %v4699_v52, 16  ;;  %v4818_v52 = vld [vmem:[%s5773_s14 + $0x18] sm:$0xe] }
  0xdd   : > { %5456 = vmatpush3.bf16.msra.mxu0 %v5672_v60  ;;  %v5681_v60 = vld [vmem:[%s6629_s1 + $0x3f8] sm:$0xff]   ;;  %5487 = vmatprep.mubr.bf16.mxu1 %v4761_v61  ;;  %v3210_v61 = vshrl.u32 %v4697_v51, 16 }
  0xde   : > { %5480 = vmatpush3.bf16.msra.mxu1 %v5673_v62  ;;  %5457 = vmatprep.subr.bf16.mxu0 %v5674_v63  ;;  %v3293_v62 = vsel %vm5949_vm5, %v4728_v36, %v3292_v40  ;;  %v4698_v36 = vld [vmem:[%s5773_s14 + $0x3c] sm:$0x1]  ;;  %v5686_v40 = vld [vmem:[%s6629_s1 + $0x3a0] sm:$0xff]   ;;  %v3226_v22 = vrot.slane %v3224_v13, 4  ;;  %v3229_v23 = vrot.slane %v3227_v14, 5 }
  0xdf   : > { %5481 = vmatprep.subr.bf16.mxu1 %v5675_v0  ;;  %v4750_v4 = vcombine.low %v3289_v57, %v3293_v62  ;;  %v3304_v55 = vrot.slane %v4698_v36, 5  ;;  %v3308_v57 = vrot.slane %v4700_v37, 5  ;;  %v3213_v62 = vshll.u32 %v4697_v51, 16  ;;  %v5694_v14 = vld [vmem:[%s6629_s1 + $0x380] sm:$0xff]  }
  0xe1   : > { %5458 = vmatpush3.bf16.msra.mxu0 %v5674_v63  ;;  %v3165_v63 = vrot.slane %v3163_v46, 5  ;;  %v3201_v46 = vrot.slane %v3199_v31, 5 }
  0xe2   : > { %5482 = vmatpush3.bf16.msra.mxu1 %v5675_v0  ;;  %5459 = vmatprep.subr.bf16.mxu0 %v5676_v16  ;;  %v3173_v0 = vrot.slane %v3171_v54, 5 }
  0xe3   : > { %5483 = vmatprep.subr.bf16.mxu1 %v5677_v17  ;;  %v3166_v5 = vsel %vm5808_vm2, %v3161_v1, %v3165_v63  ;;  %v3202_v54 = vor.u32 %v3201_v46, %v3198_v45  ;;  %v3305_v1 = vsel %vm5949_vm5, %v4731_v50, %v3304_v55 }
  0xe4   : > { %v3174_v3 = vor.u32 %v3173_v0, %v3170_v53  ;;  %v5687_v53 = vld [vmem:[%s6629_s1 + $0x3e0] sm:$0xff]  }
  0xe5   : > { %5460 = vmatpush3.bf16.msra.mxu0 %v5676_v16  ;;  %v3203_v0 = vrot.slane %v3202_v54, 4 }
  0xe6   : > { %5484 = vmatpush3.bf16.msra.mxu1 %v5677_v17  ;;  %5461 = vmatprep.subr.bf16.mxu0 %v5678_v48  ;;  %v3175_v6 = vrot.slane %v3174_v3, 4  ;;  %v5683_v17 = vld [vmem:[%s6629_s1 + $0x3f0] sm:$0xff]   ;;  %v3219_v3 = vshll.u32 %v4698_v36, 16  ;;  %v4776_v36 = vld [vmem:[%s5773_s14 + $0x1c] sm:$0x1] }
  0xe7   : > { %5485 = vmatprep.subr.bf16.mxu1 %v5679_v49  ;;  %v3625_v51 = vshll.u32 %v4776_v36, 16 }
  0xe8   : > { %v3180_v11 = vsel %vm5808_vm2, %v3175_v6, %v3179_v2  ;;  %v3309_v2 = vsel %vm5949_vm5, %v4732_v56, %v3308_v57  ;;  %v3212_v6 = vrot.slane %v3210_v61, 4  ;;  %v3221_v20 = vrot.slane %v3219_v3, 5  ;;  %v5692_v56 = vld [vmem:[%s6629_s1 + $0x388] sm:$0xff]  }
  0xe9   : > { %5462 = vmatpush3.bf16.msra.mxu0 %v5678_v48  ;;  %v4762_v15 = vcombine.low %v3166_v5, %v3180_v11  ;;  %v3188_v48 = vor.u32 %v3187_v35, %v3184_v34  ;;  %v4752_v5 = vcombine.low %v3305_v1, %v3309_v2  ;;  %v5689_v11 = vld [vmem:[%s6629_s1 + $0x3d8] sm:$0xff]   ;;  %v3230_v34 = vor.u32 %v3229_v23, %v3226_v22  ;;  %v4778_v1 = vld [vmem:[%s5773_s14 + $0x24] sm:$0x1]  ;;  %v4779_v2 = vld [vmem:[%s5773_s14 + $0x28] sm:$0xf] }
  0xea   : > { %5486 = vmatpush3.bf16.msra.mxu1 %v5679_v49  ;;  %5495 = vmatprep.subr.bf16.mxu0 %v5680_v58  ;;  %v3205_v49 = vshll.u32 %v4696_v12, 16  ;;  %v5693_v3 = vld [vmem:[%s6629_s1 + $0x3c8] sm:$0xff]  }
  0xeb   : > { %5519 = vmatprep.subr.bf16.mxu1 %v5681_v60 }
  0xec   : > { %v6414_v10 = vpop.f32.mrf.mxu0  ;;  %5464 = vmatmul.mubr.bf16.vlgmr.msra.gmra.mxu0 %v4750_v4 }
  0xed   : > { %v6408_v7 = vpop.f32.mrf.mxu1  ;;  %5496 = vmatpush3.bf16.msra.mxu0 %v5680_v58  ;;  %5488 = vmatmul.mubr.bf16.vlgmr.msra.gmra.mxu1 %v4762_v15  ;;  %v3189_v58 = vrot.slane %v3188_v48, 4 }
  0xee   : > { %5497 = vmatprep.subr.bf16.mxu0 %v5682_v8  ;;  %5520 = vmatpush3.bf16.msra.mxu1 %v5681_v60  ;;  %v6436_v32 = vpop.f32.mrf.mxu0  ;;  %v3207_v60 = vrot.slane %v3205_v49, 5  ;;  %v6473_v25 = vadd.f32 %v6408_v7, %v6414_v10  ;;  %v4774_v7 = vld [vmem:[%s5773_s14 + $0x14] sm:$0x1]  ;;  %v4775_v10 = vld [vmem:[%s5773_s14 + $0x18] sm:$0xf] }
  0xef   : > { %v6421_v16 = vpop.f32.mrf.mxu1  ;;  %5521 = vmatprep.subr.bf16.mxu1 %v5683_v17  ;;  %5467 = vmatprep.mubr.bf16.mxu0 %v4751_v43  ;;  %v3194_v4 = vsel %vm5808_vm2, %v3189_v58, %v3193_v44  ;;  %v3231_v43 = vrot.slane %v3230_v34, 4  ;;  %v5691_v44 = vld [vmem:[%s6629_s1 + $0x3d0] sm:$0xff]   ;;  %v3616_v45 = vshrl.u32 %v4775_v10, 16  ;;  %v3619_v46 = vshll.u32 %v4775_v10, 16  ;;  %v5695_v34 = vld [vmem:[%s6629_s1 + $0x3c0] sm:$0xff]  }
  0xf0   : > { %v5178_v59 = vpop.f32.mrf.mxu0  ;;  %v3208_v12 = vsel %vm5808_vm2, %v3203_v0, %v3207_v60  ;;  %v6478_v30 = vadd.f32 %v6421_v16, %v6436_v32  ;;  %v3605_v16 = vshll.u32 %v4773_v29, 16  ;;  %v3611_v32 = vshll.u32 %v4774_v7, 16  ;;  %v4777_v60 = vld [vmem:[%s5773_s14 + $0x20] sm:$0xf] }
  0xf1   : > { %v6443_v39 = vpop.f32.mrf.mxu1  ;;  %5498 = vmatpush3.bf16.msra.mxu0 %v5682_v8  ;;  %v3215_v8 = vrot.slane %v3213_v62, 5  ;;  %v4763_v18 = vcombine.low %v3194_v4, %v3208_v12  ;;  %v3621_v58 = vrot.slane %v3619_v46, 5  ;;  %v4825_v0 = vrot.slane %v4817_v47, 9  ;;  %v4782_v47 = vld [vmem:[%s5773_s14 + $0x34] sm:$0x1] }
  0xf2   : > { %5499 = vmatprep.subr.bf16.mxu0 %v5684_v26  ;;  %5522 = vmatpush3.bf16.msra.mxu1 %v5683_v17  ;;  %v481_v17 = vpop.f32.mrf.mxu0  ;;  %v6481_v31 = vadd.f32 %v6443_v39, %v5178_v59  ;;  %v3607_v50 = vrot.slane %v3605_v16, 5  ;;  %v3613_v57 = vrot.slane %v3611_v32, 5  ;;  %v3618_v59 = vrot.slane %v3616_v45, 4 }
  0xf3   : > { %v618_v63 = vpop.f32.mrf.mxu1  ;;  %5523 = vmatprep.subr.bf16.mxu1 %v5685_v27  ;;  %v3216_v19 = vor.u32 %v3215_v8, %v3212_v6  ;;  %5491 = vmatprep.mubr.bf16.mxu1 %v4763_v18  ;;  %v3893_v6 = vrot.slane %v4774_v7, 5  ;;  %v4826_v8 = vrot.slane %v4818_v52, 9  ;;  %v3630_v12 = vshrl.u32 %v4777_v60, 16  ;;  %v4780_v18 = vld [vmem:[%s5773_s14 + $0x2c] sm:$0x1] }
  0xf4   : > { %5468 = vmatmul.mubr.bf16.gmra.mxu0 %v4752_v5  ;;  %v5181_v28 = vpop.f32.mrf.mxu0  ;;  %v6483_v33 = vadd.f32 %v618_v63, %v481_v17  ;;  %v3622_v4 = vor.u32 %v3621_v58, %v3618_v59  ;;  %v3627_v5 = vrot.slane %v3625_v51, 5  ;;  %v3633_v13 = vshll.u32 %v4777_v60, 16  ;;  %v4783_v52 = vld [vmem:[%s5773_s14 + $0x38] sm:$0xf]  ;;  %v4821_v58 = vld [vmem:[%s5773_s14 + $0x30] sm:$0xe] }
  0xf5   : > { %5500 = vmatpush3.bf16.msra.mxu0 %v5684_v26  ;;  %v5205_v15 = vpop.f32.mrf.mxu1  ;;  %v3217_v26 = vrot.slane %v3216_v19, 4  ;;  %v3894_v17 = vsel %vm5949_vm5, %v4825_v0, %v3893_v6  ;;  %v3639_v19 = vshll.u32 %v4778_v1, 16  ;;  %v3632_v23 = vrot.slane %v3630_v12, 4 }
  0xf6   : > { %5501 = vmatprep.subr.bf16.mxu0 %v5686_v40  ;;  %5524 = vmatpush3.bf16.msra.mxu1 %v5685_v27  ;;  %v3235_v27 = vrot.slane %v3233_v21, 5  ;;  %v6488_v37 = vadd.f32 %v5205_v15, %v5181_v28  ;;  %v494_v38 = vpop.f32.mrf.mxu0  ;;  %v3623_v15 = vrot.slane %v3622_v4, 4  ;;  %v3647_v32 = vshll.u32 %v4779_v2, 16 }
  0xf7   : > { %5525 = vmatprep.subr.bf16.mxu1 %v5687_v53  ;;  %v631_v35 = vpop.f32.mrf.mxu1  ;;  %v3222_v39 = vsel %vm5808_vm2, %v3217_v26, %v3221_v20  ;;  %v3644_v20 = vshrl.u32 %v4779_v2, 16  ;;  %v4819_v26 = vld [vmem:[%s5773_s14 + $0x20] sm:$0xe]  ;;  %v3641_v10 = vrot.slane %v3639_v19, 5  ;;  %v3905_v46 = vrot.slane %v4780_v18, 5 }
  0xf8   : > { %v6496_v48 = vadd.f32 %v631_v35, %v494_v38  ;;  %v5182_v54 = vpop.f32.mrf.mxu0  ;;  %v3628_v35 = vsel %vm5808_vm2, %v3623_v15, %v3627_v5  ;;  %v4781_v38 = vld [vmem:[%s5773_s14 + $0x30] sm:$0xf]  ;;  %v3649_v51 = vrot.slane %v3647_v32, 5  ;;  %v3672_v6 = vshrl.u32 %v4783_v52, 16 }
  0xf9   : > { %5502 = vmatpush3.bf16.msra.mxu0 %v5686_v40  ;;  %v3602_v40 = vshrl.u32 %v4773_v29, 16  ;;  %v5206_v55 = vpop.f32.mrf.mxu1  ;;  %v3661_v59 = vshll.u32 %v4781_v38, 16 }
  0xfa   : > { %5503 = vmatprep.subr.bf16.mxu0 %v5688_v9  ;;  %5526 = vmatpush3.bf16.msra.mxu1 %v5687_v53  ;;  %v3236_v53 = vsel %vm5808_vm2, %v3231_v43, %v3235_v27  ;;  %v6505_v62 = vadd.f32 %v5206_v55, %v5182_v54  ;;  %v4820_v27 = vld [vmem:[%s5773_s14 + $0x28] sm:$0xe]  ;;  %v497_v28 = vpop.f32.mrf.mxu0  ;;  %v4827_v43 = vrot.slane %v4819_v26, 9  ;;  %v3674_v19 = vrot.slane %v3672_v6, 4 }
  0xfb   : > { %5527 = vmatprep.subr.bf16.mxu1 %v5689_v11  ;;  %v3604_v49 = vrot.slane %v3602_v40, 4  ;;  %v4764_v61 = vcombine.low %v3222_v39, %v3236_v53  ;;  %v634_v29 = vpop.f32.mrf.mxu1  ;;  %v3653_v39 = vshll.u32 %v4780_v18, 16  ;;  %v4828_v45 = vrot.slane %v4820_v27, 9 }
  0xfc   : > { %v3658_v53 = vshrl.u32 %v4781_v38, 16  ;;  %v3663_v5 = vrot.slane %v3661_v59, 5  ;;  %v4788_v59 = vld [vmem:[%s5773_s14 + $0x4c] sm:$0x1] }
  0xfd   : > { %5504 = vmatpush3.bf16.msra.mxu0 %v5688_v9  ;;  %v3608_v63 = vor.u32 %v3607_v50, %v3604_v49  ;;  %5492 = vmatmul.mubr.bf16.gmra.mxu1 %v4764_v61  ;;  %v6531_v49 = vadd.f32 %v634_v29, %v497_v28  ;;  %v3655_v54 = vrot.slane %v3653_v39, 5 }
  0xfe   : > { %5505 = vmatprep.subr.bf16.mxu0 %v5690_v24  ;;  %5528 = vmatpush3.bf16.msra.mxu1 %v5689_v11  ;;  %v3897_v11 = vrot.slane %v4776_v36, 5  ;;  %v3646_v36 = vrot.slane %v3644_v20, 4  ;;  %v3660_v0 = vrot.slane %v3658_v53, 4  ;;  %v4786_v53 = vld [vmem:[%s5773_s14 + $0x44] sm:$0x1] }
  0xff   : > { %5529 = vmatprep.subr.bf16.mxu1 %v5691_v44  ;;  %v3609_v9 = vrot.slane %v3608_v63, 4 }
 0x100   : > { %v3898_v22 = vsel %vm5949_vm5, %v4826_v8, %v3897_v11  ;;  %v3650_v63 = vor.u32 %v3649_v51, %v3646_v36  ;;  %v3675_v11 = vshll.u32 %v4783_v52, 16  ;;  %v3664_v18 = vor.u32 %v3663_v5, %v3660_v0 }
 0x101   : > { %5506 = vmatpush3.bf16.msra.mxu0 %v5690_v24  ;;  %v3614_v21 = vsel %vm5808_vm2, %v3609_v9, %v3613_v57  ;;  %v3635_v24 = vrot.slane %v3633_v13, 5  ;;  %v4849_v7 = vcombine.low %v3894_v17, %v3898_v22  ;;  %v4784_v57 = vld [vmem:[%s5773_s14 + $0x3c] sm:$0x1]  ;;  %v4829_v13 = vrot.slane %v4821_v58, 9 }
 0x102   : > { %5507 = vmatprep.subr.bf16.mxu0 %v5692_v56  ;;  %5530 = vmatpush3.bf16.msra.mxu1 %v5691_v44  ;;  %v4805_v40 = vcombine.low %v3614_v21, %v3628_v35  ;;  %v3901_v44 = vrot.slane %v4778_v1, 5  ;;  %v3667_v1 = vshll.u32 %v4782_v47, 16  ;;  %v3651_v8 = vrot.slane %v3650_v63, 4 }
 0x103   : > { %5531 = vmatprep.subr.bf16.mxu1 %v5693_v3  ;;  %v3636_v16 = vor.u32 %v3635_v24, %v3632_v23  ;;  %5535 = vmatprep.mubr.bf16.mxu1 %v4849_v7  ;;  %v3681_v12 = vshll.u32 %v4784_v57, 16  ;;  %v3677_v23 = vrot.slane %v3675_v11, 5  ;;  %v3909_v24 = vrot.slane %v4782_v47, 5 }
 0x104   : > { %5511 = vmatprep.mubr.bf16.mxu0 %v4805_v40  ;;  %v3902_v55 = vsel %vm5949_vm5, %v4827_v43, %v3901_v44  ;;  %v3656_v20 = vsel %vm5808_vm2, %v3651_v8, %v3655_v54  ;;  %v3669_v22 = vrot.slane %v3667_v1, 5  ;;  %v3913_v39 = vrot.slane %v4784_v57, 5  ;;  %v4787_v54 = vld [vmem:[%s5773_s14 + $0x48] sm:$0xf] }
 0x105   : > { %5508 = vmatpush3.bf16.msra.mxu0 %v5692_v56  ;;  %v3637_v50 = vrot.slane %v3636_v16, 4  ;;  %v3906_v56 = vsel %vm5949_vm5, %v4828_v45, %v3905_v46  ;;  %v3678_v36 = vor.u32 %v3677_v23, %v3674_v19  ;;  %v3910_v32 = vsel %vm5949_vm5, %v4829_v13, %v3909_v24  ;;  %v4824_v8 = vld [vmem:[%s5773_s14 + $0x48] sm:$0xe] }
 0x106   : > { %5509 = vmatprep.subr.bf16.mxu0 %v5694_v14  ;;  %5532 = vmatpush3.bf16.msra.mxu1 %v5693_v3  ;;  %v4850_v4 = vcombine.low %v3902_v55, %v3906_v56  ;;  %v3700_v5 = vshrl.u32 %v4787_v54, 16  ;;  %v3703_v6 = vshll.u32 %v4787_v54, 16  ;;  %v4832_v23 = vrot.slane %v4824_v8, 9 }
 0x107   : > { %5533 = vmatprep.subr.bf16.mxu1 %v5695_v34  ;;  %v3642_v61 = vsel %vm5808_vm2, %v3637_v50, %v3641_v10  ;;  %v3665_v10 = vrot.slane %v3664_v18, 4  ;;  %v3679_v44 = vrot.slane %v3678_v36, 4 }
 0x108   : > { %v4806_v26 = vcombine.low %v3642_v61, %v3656_v20  ;;  %v3702_v19 = vrot.slane %v3700_v5, 4 }
 0x109   : > { %5510 = vmatpush3.bf16.msra.mxu0 %v5694_v14  ;;  %v3670_v43 = vsel %vm5808_vm2, %v3665_v10, %v3669_v22  ;;  %v3917_v22 = vrot.slane %v4786_v53, 5 }
 0x10a   : > { %5534 = vmatpush3.bf16.msra.mxu1 %v5695_v34  ;;  %v4785_v34 = vld [vmem:[%s5773_s14 + $0x40] sm:$0xf] }
 0x10b   : > { %v3686_v46 = vshrl.u32 %v4785_v34, 16 }
 0x10c   : > { %v5225_v60 = vpop.f32.mrf.mxu0  ;;  %5512 = vmatmul.mubr.bf16.vlgmr.msra.gmra.mxu0 %v4806_v26 }
 0x10d   : > { %v811_v2 = vadd.f32 %v5225_v60, %v6473_v25  ;;  %v5249_v3 = vpop.f32.mrf.mxu1  ;;  %v4822_v25 = vld [vmem:[%s5773_s14 + $0x38] sm:$0xe]  ;;  %5536 = vmatmul.mubr.bf16.vlgmr.msra.gmra.mxu1 %v4850_v4  ;;  %v3688_v58 = vrot.slane %v3686_v46, 4  ;;  %v4823_v60 = vld [vmem:[%s5773_s14 + $0x40] sm:$0xe]  ;;  %v3695_v4 = vshll.u32 %v4786_v53, 16 }
 0x10e   : > { %v778_v9 = vpop.f32.mrf.mxu0  ;;  %v4830_v38 = vrot.slane %v4822_v25, 9  ;;  %v4831_v13 = vrot.slane %v4823_v60, 9  ;;  %v3705_v25 = vrot.slane %v3703_v6, 5 }
 0x10f   : > { %v1093_v14 = vadd.f32 %v5249_v3, %v811_v2  ;;  %v809_v15 = vadd.f32 %v778_v9, %v6478_v30  ;;  %v1060_v17 = vpop.f32.mrf.mxu1  ;;  %v3683_v30 = vrot.slane %v3681_v12, 5  ;;  %v3709_v12 = vshll.u32 %v4788_v59, 16 }
 0x110   : > { %v5226_v21 = vpop.f32.mrf.mxu0  ;;  %v3914_v52 = vsel %vm5949_vm5, %v4830_v38, %v3913_v39  ;;  %v3697_v18 = vrot.slane %v3695_v4, 5 }
 0x111   : > { %v1091_v27 = vadd.f32 %v1060_v17, %v809_v15  ;;  %v812_v28 = vadd.f32 %v5226_v21, %v6481_v31  ;;  %v5250_v29 = vpop.f32.mrf.mxu1  ;;  %v1131_v35 = vmul.f32 %v1093_v14, %v1093_v14  ;;  %v3684_v55 = vsel %vm5808_vm2, %v3679_v44, %v3683_v30 }
 0x112   : > { %v781_v7 = vpop.f32.mrf.mxu0  ;;  %v4851_v56 = vcombine.low %v3910_v32, %v3914_v52  ;;  %v4807_v2 = vcombine.low %v3670_v43, %v3684_v55  ;;  %v3711_v21 = vrot.slane %v3709_v12, 5 }
 0x113   : > { %v1094_v40 = vadd.f32 %v5250_v29, %v812_v28  ;;  %v810_v16 = vadd.f32 %v781_v7, %v6483_v33  ;;  %v1063_v31 = vpop.f32.mrf.mxu1  ;;  %v3689_v33 = vshll.u32 %v4785_v34, 16  ;;  %v1129_v47 = vmul.f32 %v1091_v27, %v1091_v27 }
 0x114   : > { %v5229_v45 = vpop.f32.mrf.mxu0  ;;  %5539 = vmatprep.mubr.bf16.mxu1 %v4851_v56  ;;  %5515 = vmatprep.mubr.bf16.mxu0 %v4807_v2  ;;  %v3921_v28 = vrot.slane %v4788_v59, 5  ;;  %v3918_v34 = vsel %vm5949_vm5, %v4831_v13, %v3917_v22 }
 0x115   : > { %v4880_v50 = vpack.c.bf16 %v1094_v40, %v1093_v14  ;;  %v1092_v51 = vadd.f32 %v1063_v31, %v810_v16  ;;  %v815_v57 = vadd.f32 %v5229_v45, %v6488_v37  ;;  %v3691_v3 = vrot.slane %v3689_v33, 5  ;;  %v5253_v15 = vpop.f32.mrf.mxu1 }
 0x116   : > { %v794_v61 = vpop.f32.mrf.mxu0  ;;  %v1132_v30 = vmul.f32 %v1094_v40, %v1094_v40  ;;  %v3922_v16 = vsel %vm5949_vm5, %v4832_v23, %v3921_v28 }
 0x117   : > { %4952 = vst [vmem:[%s6556_s26 + $0x8] sm:$0xff] %v4880_v50   ;;  %v4875_v63 = vpack.c.bf16 %v1092_v51, %v1091_v27  ;;  %v1115_v0 = vadd.f32 %v1092_v51, %v1091_v27  ;;  %v1130_v1 = vmul.f32 %v1092_v51, %v1092_v51  ;;  %v3692_v17 = vor.u32 %v3691_v3, %v3688_v58  ;;  %v1076_v24 = vpop.f32.mrf.mxu1 }
 0x118   : > { %v5230_v9 = vpop.f32.mrf.mxu0  ;;  %v3706_v27 = vor.u32 %v3705_v25, %v3702_v19  ;;  %v813_v29 = vadd.f32 %v794_v61, %v6496_v48  ;;  %v4852_v39 = vcombine.low %v3918_v34, %v3922_v16  ;;  %v1097_v31 = vadd.f32 %v5253_v15, %v815_v57 }
 0x119   : > { %4876 = vst [vmem:[%s6556_s26] sm:$0xff] %v4875_v63   ;;  %v1116_v11 = vadd.f32 %v1115_v0, %v1093_v14  ;;  %v1137_v37 = vadd.f32 %v1130_v1, %v1129_v47  ;;  %v3693_v26 = vrot.slane %v3692_v17, 4  ;;  %v816_v7 = vadd.f32 %v5230_v9, %v6505_v62  ;;  %v5254_v36 = vpop.f32.mrf.mxu1 }
 0x11a   : > { %v797_v14 = vpop.f32.mrf.mxu0  ;;  %v3707_v38 = vrot.slane %v3706_v27, 4  ;;  %v1095_v32 = vadd.f32 %v1076_v24, %v813_v29  ;;  %5540 = vmatmul.mubr.bf16.gmra.mxu1 %v4852_v39  ;;  %v1135_v54 = vmul.f32 %v1097_v31, %v1097_v31 }
 0x11b   : > { %v1138_v20 = vadd.f32 %v1137_v37, %v1131_v35  ;;  %v1117_v10 = vadd.f32 %v1116_v11, %v1094_v40  ;;  %v3698_v35 = vsel %vm5808_vm2, %v3693_v26, %v3697_v18  ;;  %v814_v43 = vadd.f32 %v797_v14, %v6531_v49  ;;  %v1079_v44 = vpop.f32.mrf.mxu1 }
 0x11c   : > { %v3712_v62 = vsel %vm5808_vm2, %v3707_v38, %v3711_v21  ;;  %v1133_v45 = vmul.f32 %v1095_v32, %v1095_v32  ;;  %v1098_v46 = vadd.f32 %v5254_v36, %v816_v7 }
 0x11d   : > { %v1139_v48 = vadd.f32 %v1138_v20, %v1132_v30  ;;  %v1118_v40 = vadd.f32 %v1117_v10, %v1095_v32  ;;  %v4808_v33 = vcombine.low %v3698_v35, %v3712_v62  ;;  %v1096_v47 = vadd.f32 %v1079_v44, %v814_v43 }
 0x11e   : > { %v4890_v50 = vpack.c.bf16 %v1098_v46, %v1097_v31  ;;  %v1136_v42 = vmul.f32 %v1098_v46, %v1098_v46 }
 0x11f   : > { %v1140_v41 = vadd.f32 %v1139_v48, %v1133_v45  ;;  %5516 = vmatmul.mubr.bf16.gmra.mxu0 %v4808_v33  ;;  %v4885_v51 = vpack.c.bf16 %v1096_v47, %v1095_v32  ;;  %v1119_v52 = vadd.f32 %v1118_v40, %v1096_v47  ;;  %v1134_v53 = vmul.f32 %v1096_v47, %v1096_v47 }
 0x120   : > { %4954 = vst [vmem:[%s6556_s26 + $0x18] sm:$0xff] %v4890_v50  }
 0x121   : > { %4953 = vst [vmem:[%s6556_s26 + $0x10] sm:$0xff] %v4885_v51   ;;  %v1120_v49 = vadd.f32 %v1119_v52, %v1097_v31  ;;  %v1141_v55 = vadd.f32 %v1140_v41, %v1134_v53 }
 0x123   : > { %v6585_v56 = vadd.f32 %v1120_v49, %v1098_v46  ;;  %v1142_v57 = vadd.f32 %v1141_v55, %v1135_v54 }
 0x125   : > { %v6587_v59 = vadd.f32 %v1142_v57, %v1136_v42  ;;  %v1122_v57 = vrot.slane %v6585_v56, 4 }
 0x12c   : > { %v5273_v58 = vpop.f32.mrf.mxu0 }
 0x12d   : > { %v5297_v60 = vpop.f32.mrf.mxu1 }
 0x12e   : > { %v1470_v61 = vpop.f32.mrf.mxu0  ;;  %v1608_v17 = vadd.f32 %v5297_v60, %v5273_v58 }
 0x12f   : > { %v1599_v63 = vpop.f32.mrf.mxu1 }
 0x130   : > { %v5274_v0 = vpop.f32.mrf.mxu0  ;;  %v1600_v18 = vadd.f32 %v1599_v63, %v1470_v61 }
 0x131   : > { %v5298_v1 = vpop.f32.mrf.mxu1 }
 0x132   : > { %v1473_v2 = vpop.f32.mrf.mxu0  ;;  %v1611_v20 = vadd.f32 %v5298_v1, %v5274_v0 }
 0x133   : > { %v1602_v3 = vpop.f32.mrf.mxu1 }
 0x134   : > { %v5277_v4 = vpop.f32.mrf.mxu0  ;;  %v1603_v26 = vadd.f32 %v1602_v3, %v1473_v2 }
 0x136   : > { %v1486_v8 = vpop.f32.mrf.mxu0 }
 0x138   : > { %v5278_v11 = vpop.f32.mrf.mxu0 }
 0x13a   : > { %v1489_v12 = vpop.f32.mrf.mxu0 }
 0x13b   : > { %v5301_v5 = vpop.f32.mrf.mxu1 }
 0x13c   : > { %v1624_v35 = vadd.f32 %v5301_v5, %v5277_v4  ;;  %v1144_v4 = vrot.slane %v6587_v59, 4 }
 0x13d   : > { %v1615_v6 = vpop.f32.mrf.mxu1 }
 0x13e   : > { %v1616_v43 = vadd.f32 %v1615_v6, %v1486_v8 }
 0x13f   : > { %v5302_v9 = vpop.f32.mrf.mxu1 }
 0x140   : > { %v1627_v47 = vadd.f32 %v5302_v9, %v5278_v11  ;;  %v1123_v9 = vadd.f32 %v1122_v57, %v6585_v56 }
 0x141   : > { %v1618_v37 = vpop.f32.mrf.mxu1 }
 0x142   : > { %v1619_v49 = vadd.f32 %v1618_v37, %v1489_v12 }
 0x14c   : > { %v5321_v15 = vpop.f32.mrf.mxu0 }
 0x14d   : > { %v5345_v13 = vpop.f32.mrf.mxu1  ;;  %v1906_v21 = vadd.f32 %v5321_v15, %v1608_v17 }
 0x14e   : > { %v1873_v25 = vpop.f32.mrf.mxu0 }
 0x14f   : > { %v2083_v19 = vpop.f32.mrf.mxu1  ;;  %v1904_v22 = vadd.f32 %v1873_v25, %v1600_v18  ;;  %v2116_v29 = vadd.f32 %v5345_v13, %v1906_v21  ;;  %v1145_v13 = vadd.f32 %v1144_v4, %v6587_v59 }
 0x150   : > { %v5322_v23 = vpop.f32.mrf.mxu0 }
 0x151   : > { %v5346_v24 = vpop.f32.mrf.mxu1  ;;  %v1907_v27 = vadd.f32 %v5322_v23, %v1611_v20  ;;  %v2114_v14 = vadd.f32 %v2083_v19, %v1904_v22  ;;  %v2155_v44 = vmul.f32 %v2116_v29, %v2116_v29  ;;  %v1124_v19 = vrot.slane %v1123_v9, 2 }
 0x152   : > { %v1876_v28 = vpop.f32.mrf.mxu0  ;;  %v1146_v22 = vrot.slane %v1145_v13, 2 }
 0x153   : > { %v2117_v30 = vadd.f32 %v5346_v24, %v1907_v27  ;;  %v1905_v34 = vadd.f32 %v1876_v28, %v1603_v26  ;;  %v2086_v7 = vpop.f32.mrf.mxu1  ;;  %v2153_v38 = vmul.f32 %v2114_v14, %v2114_v14  ;;  %v1125_v26 = vadd.f32 %v1124_v19, %v1123_v9 }
 0x154   : > { %v5325_v31 = vpop.f32.mrf.mxu0  ;;  %v1147_v28 = vadd.f32 %v1146_v22, %v1145_v13 }
 0x155   : > { %v4900_v10 = vpack.c.bf16 %v2117_v30, %v2116_v29  ;;  %v2115_v36 = vadd.f32 %v2086_v7, %v1905_v34  ;;  %v5349_v48 = vpop.f32.mrf.mxu1  ;;  %v1910_v45 = vadd.f32 %v5325_v31, %v1624_v35  ;;  %v2156_v50 = vmul.f32 %v2117_v30, %v2117_v30 }
 0x156   : > { %v1889_v46 = vpop.f32.mrf.mxu0 }
 0x157   : > { %4956 = vst [vmem:[%s6556_s26 + $0x28] sm:$0xff] %v4900_v10   ;;  %v4895_v16 = vpack.c.bf16 %v2115_v36, %v2114_v14  ;;  %v2139_v32 = vadd.f32 %v2115_v36, %v2114_v14  ;;  %v2154_v39 = vmul.f32 %v2115_v36, %v2115_v36  ;;  %v2099_v33 = vpop.f32.mrf.mxu1  ;;  %v1908_v41 = vadd.f32 %v1889_v46, %v1616_v43 }
 0x158   : > { %v5326_v52 = vpop.f32.mrf.mxu0  ;;  %v2120_v58 = vadd.f32 %v5349_v48, %v1910_v45  ;;  %v1148_v10 = vrot.slane %v1147_v28, 1 }
 0x159   : > { %4955 = vst [vmem:[%s6556_s26 + $0x20] sm:$0xff] %v4895_v16   ;;  %v2140_v62 = vadd.f32 %v2139_v32, %v2116_v29  ;;  %v2161_v40 = vadd.f32 %v2154_v39, %v2153_v38  ;;  %v5350_v54 = vpop.f32.mrf.mxu1  ;;  %v1911_v55 = vadd.f32 %v5326_v52, %v1627_v47  ;;  %v2118_v42 = vadd.f32 %v2099_v33, %v1908_v41 }
 0x15a   : > { %v1892_v61 = vpop.f32.mrf.mxu0  ;;  %v2159_v15 = vmul.f32 %v2120_v58, %v2120_v58  ;;  %v1149_v48 = vadd.f32 %v1148_v10, %v1147_v28 }
 0x15b   : > { %v2162_v51 = vadd.f32 %v2161_v40, %v2155_v44  ;;  %v2141_v53 = vadd.f32 %v2140_v62, %v2117_v30  ;;  %v2102_v63 = vpop.f32.mrf.mxu1  ;;  %v2157_v1 = vmul.f32 %v2118_v42, %v2118_v42  ;;  %v1909_v2 = vadd.f32 %v1892_v61, %v1619_v49 }
 0x15c   : > { %v2121_v3 = vadd.f32 %v5350_v54, %v1911_v55  ;;  %v1126_v30 = vrot.slane %v1125_v26, 1 }
 0x15d   : > { %v2163_v60 = vadd.f32 %v2162_v51, %v2156_v50  ;;  %v2142_v0 = vadd.f32 %v2141_v53, %v2118_v42  ;;  %v2119_v8 = vadd.f32 %v2102_v63, %v1909_v2 }
 0x15e   : > { %v4910_v6 = vpack.c.bf16 %v2121_v3, %v2120_v58  ;;  %v2160_v25 = vmul.f32 %v2121_v3, %v2121_v3  ;;  %v1127_v16 = vadd.f32 %v1126_v30, %v1125_v26 }
 0x15f   : > { %v2164_v5 = vadd.f32 %v2163_v60, %v2157_v1  ;;  %v4905_v11 = vpack.c.bf16 %v2119_v8, %v2118_v42  ;;  %v2143_v37 = vadd.f32 %v2142_v0, %v2119_v8  ;;  %v2158_v12 = vmul.f32 %v2119_v8, %v2119_v8 }
 0x160   : > { %4958 = vst [vmem:[%s6556_s26 + $0x38] sm:$0xff] %v4910_v6  }
 0x161   : > { %4957 = vst [vmem:[%s6556_s26 + $0x30] sm:$0xff] %v4905_v11   ;;  %v2144_v17 = vadd.f32 %v2143_v37, %v2120_v58  ;;  %v2165_v18 = vadd.f32 %v2164_v5, %v2158_v12 }
 0x163   : > { %v2145_v20 = vadd.f32 %v2144_v17, %v2121_v3  ;;  %v2166_v21 = vadd.f32 %v2165_v18, %v2159_v15 }
 0x165   : > { %v2146_v23 = vrot.slane %v2145_v20, 4  ;;  %v2167_v24 = vadd.f32 %v2166_v21, %v2160_v25 }
 0x167   : > { %v2147_v27 = vadd.f32 %v2146_v23, %v2145_v20  ;;  %v2168_v56 = vrot.slane %v2167_v24, 4 }
 0x169   : > { %v2148_v29 = vrot.slane %v2147_v27, 2  ;;  %v2169_v14 = vadd.f32 %v2168_v56, %v2167_v24 }
 0x16b   : > { %v2149_v34 = vadd.f32 %v2148_v29, %v2147_v27  ;;  %v2170_v59 = vrot.slane %v2169_v14, 2 }
 0x16c   : > { %v5369_v38 = vpop.f32.mrf.mxu0 }
 0x16d   : > { %v5393_v7 = vpop.f32.mrf.mxu1  ;;  %v2150_v36 = vrot.slane %v2149_v34, 1  ;;  %v2171_v35 = vadd.f32 %v2170_v59, %v2169_v14 }
 0x16e   : > { %v2435_v62 = vpop.f32.mrf.mxu0  ;;  %v2581_v58 = vadd.f32 %v5393_v7, %v5369_v38 }
 0x16f   : > { %v2151_v32 = vadd.f32 %v2150_v36, %v2149_v34  ;;  %v2172_v39 = vrot.slane %v2171_v35, 1  ;;  %v2572_v31 = vpop.f32.mrf.mxu1 }
 0x170   : > { %v5370_v46 = vpop.f32.mrf.mxu0  ;;  %v2573_v60 = vadd.f32 %v2572_v31, %v2435_v62 }
 0x171   : > { %v6597_v43 = vadd.f32 %v2151_v32, %v1127_v16  ;;  %v2173_v44 = vadd.f32 %v2172_v39, %v2171_v35  ;;  %v5394_v45 = vpop.f32.mrf.mxu1 }
 0x172   : > { %v2438_v47 = vpop.f32.mrf.mxu0  ;;  %v2584_v0 = vadd.f32 %v5394_v45, %v5370_v46 }
 0x173   : > { %v6599_v40 = vadd.f32 %v2173_v44, %v1149_v48  ;;  %v2575_v33 = vpop.f32.mrf.mxu1 }
 0x174   : > { %v5373_v50 = vpop.f32.mrf.mxu0  ;;  %v2576_v5 = vadd.f32 %v2575_v33, %v2438_v47 }
 0x175   : > { %v5397_v41 = vpop.f32.mrf.mxu1 }
 0x176   : > { %v2451_v52 = vpop.f32.mrf.mxu0  ;;  %v2597_v25 = vadd.f32 %v5397_v41, %v5373_v50 }
 0x177   : > { %v2588_v51 = vpop.f32.mrf.mxu1 }
 0x178   : > { %v5374_v54 = vpop.f32.mrf.mxu0  ;;  %v2589_v17 = vadd.f32 %v2588_v51, %v2451_v52 }
 0x179   : > { %v5398_v53 = vpop.f32.mrf.mxu1 }
 0x17a   : > { %v2454_v55 = vpop.f32.mrf.mxu0  ;;  %v2600_v20 = vadd.f32 %v5398_v53, %v5374_v54 }
 0x17b   : > { %v2591_v49 = vpop.f32.mrf.mxu1 }
 0x17c   : > { %v2592_v7 = vadd.f32 %v2591_v49, %v2454_v55 }
 0x18c   : > { %v5417_v57 = vpop.f32.mrf.mxu0 }
 0x18d   : > { %v5441_v42 = vpop.f32.mrf.mxu1  ;;  %v2768_v1 = vadd.f32 %v5417_v57, %v2581_v58 }
 0x18e   : > { %v2735_v63 = vpop.f32.mrf.mxu0 }
 0x18f   : > { %v3017_v61 = vpop.f32.mrf.mxu1  ;;  %v2766_v2 = vadd.f32 %v2735_v63, %v2573_v60  ;;  %v3050_v11 = vadd.f32 %v5441_v42, %v2768_v1 }
 0x190   : > { %v5418_v3 = vpop.f32.mrf.mxu0 }
 0x191   : > { %v5442_v4 = vpop.f32.mrf.mxu1  ;;  %v2769_v6 = vadd.f32 %v5418_v3, %v2584_v0  ;;  %v3048_v8 = vadd.f32 %v3017_v61, %v2766_v2  ;;  %v3089_v14 = vmul.f32 %v3050_v11, %v3050_v11 }
 0x192   : > { %v2738_v9 = vpop.f32.mrf.mxu0 }
 0x193   : > { %v3051_v37 = vadd.f32 %v5442_v4, %v2769_v6  ;;  %v2767_v12 = vadd.f32 %v2738_v9, %v2576_v5  ;;  %v3020_v13 = vpop.f32.mrf.mxu1  ;;  %v3087_v21 = vmul.f32 %v3048_v8, %v3048_v8 }
 0x194   : > { %v5421_v15 = vpop.f32.mrf.mxu0 }
 0x195   : > { %v4920_v18 = vpack.c.bf16 %v3051_v37, %v3050_v11  ;;  %v3049_v19 = vadd.f32 %v3020_v13, %v2767_v12  ;;  %v2772_v56 = vadd.f32 %v5421_v15, %v2597_v25  ;;  %v5445_v28 = vpop.f32.mrf.mxu1  ;;  %v3090_v35 = vmul.f32 %v3051_v37, %v3051_v37 }
 0x196   : > { %v2751_v22 = vpop.f32.mrf.mxu0 }
 0x197   : > { %4960 = vst [vmem:[%s6556_s26 + $0x48] sm:$0xff] %v4920_v18   ;;  %v4915_v23 = vpack.c.bf16 %v3049_v19, %v3048_v8  ;;  %v3073_v24 = vadd.f32 %v3049_v19, %v3048_v8  ;;  %v3088_v26 = vmul.f32 %v3049_v19, %v3049_v19  ;;  %v2770_v27 = vadd.f32 %v2751_v22, %v2589_v17  ;;  %v3033_v10 = vpop.f32.mrf.mxu1 }
 0x198   : > { %v5422_v29 = vpop.f32.mrf.mxu0  ;;  %v3054_v39 = vadd.f32 %v5445_v28, %v2772_v56 }
 0x199   : > { %4959 = vst [vmem:[%s6556_s26 + $0x40] sm:$0xff] %v4915_v23   ;;  %v3074_v30 = vadd.f32 %v3073_v24, %v3050_v11  ;;  %v3095_v34 = vadd.f32 %v3088_v26, %v3087_v21  ;;  %v2773_v59 = vadd.f32 %v5422_v29, %v2600_v20  ;;  %v3052_v16 = vadd.f32 %v3033_v10, %v2770_v27  ;;  %v5446_v48 = vpop.f32.mrf.mxu1 }
 0x19a   : > { %v2754_v36 = vpop.f32.mrf.mxu0  ;;  %v3093_v54 = vmul.f32 %v3054_v39, %v3054_v39 }
 0x19b   : > { %v3096_v38 = vadd.f32 %v3095_v34, %v3089_v14  ;;  %v3075_v32 = vadd.f32 %v3074_v30, %v3051_v37  ;;  %v2771_v31 = vadd.f32 %v2754_v36, %v2592_v7  ;;  %v3091_v62 = vmul.f32 %v3052_v16, %v3052_v16  ;;  %v3036_v33 = vpop.f32.mrf.mxu1 }
 0x19c   : > { %v3055_v46 = vadd.f32 %v5446_v48, %v2773_v59 }
 0x19d   : > { %v3076_v44 = vadd.f32 %v3075_v32, %v3052_v16  ;;  %v3097_v45 = vadd.f32 %v3096_v38, %v3090_v35  ;;  %v3053_v50 = vadd.f32 %v3036_v33, %v2771_v31 }
 0x19e   : > { %v4930_v41 = vpack.c.bf16 %v3055_v46, %v3054_v39  ;;  %v3094_v42 = vmul.f32 %v3055_v46, %v3055_v46 }
 0x19f   : > { %v3098_v47 = vadd.f32 %v3097_v45, %v3091_v62  ;;  %v4925_v51 = vpack.c.bf16 %v3053_v50, %v3052_v16  ;;  %v3077_v52 = vadd.f32 %v3076_v44, %v3053_v50  ;;  %v3092_v53 = vmul.f32 %v3053_v50, %v3053_v50 }
 0x1a0   : > { %4962 = vst [vmem:[%s6556_s26 + $0x58] sm:$0xff] %v4930_v41  }
 0x1a1   : > { %4961 = vst [vmem:[%s6556_s26 + $0x50] sm:$0xff] %v4925_v51   ;;  %v3078_v49 = vadd.f32 %v3077_v52, %v3054_v39  ;;  %v3099_v55 = vadd.f32 %v3098_v47, %v3092_v53 }
 0x1a3   : > { %v3079_v57 = vadd.f32 %v3078_v49, %v3055_v46  ;;  %v3100_v58 = vadd.f32 %v3099_v55, %v3093_v54 }
 0x1a5   : > { %v3080_v60 = vrot.slane %v3079_v57, 4  ;;  %v3101_v61 = vadd.f32 %v3100_v58, %v3094_v42 }
 0x1a7   : > { %v3081_v63 = vadd.f32 %v3080_v60, %v3079_v57  ;;  %v3102_v0 = vrot.slane %v3101_v61, 4 }
 0x1a9   : > { %v3082_v1 = vrot.slane %v3081_v63, 2  ;;  %v3103_v2 = vadd.f32 %v3102_v0, %v3101_v61 }
 0x1ab   : > { %v3083_v3 = vadd.f32 %v3082_v1, %v3081_v63  ;;  %v3104_v4 = vrot.slane %v3103_v2, 2 }
 0x1ac   : > { %v5465_v13 = vpop.f32.mrf.mxu0 }
 0x1ad   : > { %v3084_v5 = vrot.slane %v3083_v3, 1  ;;  %v3105_v6 = vadd.f32 %v3104_v4, %v3103_v2  ;;  %v5489_v12 = vpop.f32.mrf.mxu1 }
 0x1ae   : > { %v3425_v18 = vpop.f32.mrf.mxu0  ;;  %v3563_v34 = vadd.f32 %v5489_v12, %v5465_v13 }
 0x1af   : > { %v3085_v8 = vadd.f32 %v3084_v5, %v3083_v3  ;;  %v3106_v9 = vrot.slane %v3105_v6, 1  ;;  %v3554_v17 = vpop.f32.mrf.mxu1 }
 0x1b0   : > { %v5466_v25 = vpop.f32.mrf.mxu0 }
 0x1b1   : > { %v6606_v11 = vadd.f32 %v3085_v8, %v6597_v43  ;;  %v3107_v37 = vadd.f32 %v3106_v9, %v3105_v6  ;;  %v5490_v19 = vpop.f32.mrf.mxu1 }
 0x1b2   : > { %v3428_v21 = vpop.f32.mrf.mxu0  ;;  %v3566_v7 = vadd.f32 %v5490_v19, %v5466_v25 }
 0x1b3   : > { %v6609_v15 = vadd.f32 %v3107_v37, %v6599_v40  ;;  %v3557_v20 = vpop.f32.mrf.mxu1  ;;  %v3555_v40 = vadd.f32 %v3554_v17, %v3425_v18 }
 0x1b4   : > { %v5469_v23 = vpop.f32.mrf.mxu0  ;;  %v3558_v16 = vadd.f32 %v3557_v20, %v3428_v21 }
 0x1b6   : > { %v3441_v26 = vpop.f32.mrf.mxu0 }
 0x1b8   : > { %v5470_v56 = vpop.f32.mrf.mxu0 }
 0x1ba   : > { %v3444_v28 = vpop.f32.mrf.mxu0 }
 0x1bd   : > { %v5493_v22 = vpop.f32.mrf.mxu1 }
 0x1be   : > { %v3579_v55 = vadd.f32 %v5493_v22, %v5469_v23 }
 0x1bf   : > { %v3570_v24 = vpop.f32.mrf.mxu1 }
 0x1c0   : > { %v3571_v58 = vadd.f32 %v3570_v24, %v3441_v26 }
 0x1c1   : > { %v5494_v27 = vpop.f32.mrf.mxu1 }
 0x1c2   : > { %v3582_v0 = vadd.f32 %v5494_v27, %v5470_v56 }
 0x1c3   : > { %v3573_v43 = vpop.f32.mrf.mxu1 }
 0x1c4   : > { %v3574_v6 = vadd.f32 %v3573_v43, %v3444_v28 }
 0x1cc   : > { %v5513_v14 = vpop.f32.mrf.mxu0 }
 0x1cd   : > { %v5537_v29 = vpop.f32.mrf.mxu1  ;;  %v3861_v10 = vadd.f32 %v5513_v14, %v3563_v34 }
 0x1ce   : > { %v3828_v59 = vpop.f32.mrf.mxu0 }
 0x1cf   : > { %v4038_v30 = vpop.f32.mrf.mxu1  ;;  %v3859_v36 = vadd.f32 %v3828_v59, %v3555_v40  ;;  %v4071_v31 = vadd.f32 %v5537_v29, %v3861_v10 }
 0x1d0   : > { %v5514_v35 = vpop.f32.mrf.mxu0 }
 0x1d1   : > { %v5538_v38 = vpop.f32.mrf.mxu1  ;;  %v3862_v32 = vadd.f32 %v5514_v35, %v3566_v7  ;;  %v4069_v48 = vadd.f32 %v4038_v30, %v3859_v36  ;;  %v4110_v54 = vmul.f32 %v4071_v31, %v4071_v31 }
 0x1d2   : > { %v3831_v39 = vpop.f32.mrf.mxu0 }
 0x1d3   : > { %v4072_v44 = vadd.f32 %v5538_v38, %v3862_v32  ;;  %v3860_v62 = vadd.f32 %v3831_v39, %v3558_v16  ;;  %v4041_v45 = vpop.f32.mrf.mxu1  ;;  %v4108_v47 = vmul.f32 %v4069_v48, %v4069_v48 }
 0x1d5   : > { %v4940_v46 = vpack.c.bf16 %v4072_v44, %v4071_v31  ;;  %v4070_v33 = vadd.f32 %v4041_v45, %v3860_v62  ;;  %v4111_v1 = vmul.f32 %v4072_v44, %v4072_v44 }
 0x1d7   : > { %4964 = vst [vmem:[%s6556_s26 + $0x68] sm:$0xff] %v4940_v46   ;;  %v4935_v41 = vpack.c.bf16 %v4070_v33, %v4069_v48  ;;  %v4094_v50 = vadd.f32 %v4070_v33, %v4069_v48  ;;  %v4109_v51 = vmul.f32 %v4070_v33, %v4070_v33 }
 0x1d9   : > { %4963 = vst [vmem:[%s6556_s26 + $0x60] sm:$0xff] %v4935_v41   ;;  %v4116_v52 = vadd.f32 %v4109_v51, %v4108_v47  ;;  %v4095_v49 = vadd.f32 %v4094_v50, %v4071_v31 }
 0x1da   : > { %v5541_v53 = vpop.f32.mrf.mxu1 }
 0x1db   : > { %v4117_v60 = vadd.f32 %v4116_v52, %v4110_v54  ;;  %v4096_v3 = vadd.f32 %v4095_v49, %v4072_v44 }
 0x1dc   : > { %v4054_v57 = vpop.f32.mrf.mxu1 }
 0x1dd   : > { %v4118_v9 = vadd.f32 %v4117_v60, %v4111_v1 }
 0x1de   : > { %v5542_v5 = vpop.f32.mrf.mxu1 }
 0x1df   : > { %v5517_v42 = vpop.f32.mrf.mxu0 }
 0x1e0   : > { %v3865_v61 = vadd.f32 %v5517_v42, %v3579_v55  ;;  %v4057_v20 = vpop.f32.mrf.mxu1 }
 0x1e1   : > { %v3844_v63 = vpop.f32.mrf.mxu0 }
 0x1e2   : > { %v3863_v2 = vadd.f32 %v3844_v63, %v3571_v58  ;;  %v4075_v12 = vadd.f32 %v5541_v53, %v3865_v61 }
 0x1e3   : > { %v5518_v4 = vpop.f32.mrf.mxu0 }
 0x1e4   : > { %v4073_v8 = vadd.f32 %v4054_v57, %v3863_v2  ;;  %v3866_v37 = vadd.f32 %v5518_v4, %v3582_v0  ;;  %v4114_v56 = vmul.f32 %v4075_v12, %v4075_v12 }
 0x1e5   : > { %v3847_v13 = vpop.f32.mrf.mxu0 }
 0x1e6   : > { %v4097_v17 = vadd.f32 %v4096_v3, %v4073_v8  ;;  %v4112_v18 = vmul.f32 %v4073_v8, %v4073_v8  ;;  %v4076_v19 = vadd.f32 %v5542_v5, %v3866_v37  ;;  %v3864_v25 = vadd.f32 %v3847_v13, %v3574_v6 }
 0x1e8   : > { %v4119_v21 = vadd.f32 %v4118_v9, %v4112_v18  ;;  %v4950_v22 = vpack.c.bf16 %v4076_v19, %v4075_v12  ;;  %v4074_v23 = vadd.f32 %v4057_v20, %v3864_v25  ;;  %v4115_v29 = vmul.f32 %v4076_v19, %v4076_v19 }
 0x1ea   : > { %4966 = vst [vmem:[%s6556_s26 + $0x78] sm:$0xff] %v4950_v22   ;;  %v4945_v24 = vpack.c.bf16 %v4074_v23, %v4073_v8  ;;  %v4098_v26 = vadd.f32 %v4097_v17, %v4074_v23  ;;  %v4113_v27 = vmul.f32 %v4074_v23, %v4074_v23 }
 0x1ec   : > { %4965 = vst [vmem:[%s6556_s26 + $0x70] sm:$0xff] %v4945_v24   ;;  %v4099_v43 = vadd.f32 %v4098_v26, %v4075_v12  ;;  %v4120_v28 = vadd.f32 %v4119_v21, %v4113_v27 }
 0x1ee   : > { %v4100_v14 = vadd.f32 %v4099_v43, %v4076_v19  ;;  %v4121_v30 = vadd.f32 %v4120_v28, %v4114_v56 }
 0x1f0   : > { %v4101_v34 = vrot.slane %v4100_v14, 4  ;;  %v4122_v40 = vadd.f32 %v4121_v30, %v4115_v29 }
 0x1f2   : > { %v4102_v59 = vadd.f32 %v4101_v34, %v4100_v14  ;;  %v4123_v7 = vrot.slane %v4122_v40, 4 }
 0x1f4   : > { %v4103_v10 = vrot.slane %v4102_v59, 2  ;;  %v4124_v36 = vadd.f32 %v4123_v7, %v4122_v40 }
 0x1f6   : > { %v4104_v35 = vadd.f32 %v4103_v10, %v4102_v59  ;;  %v4125_v38 = vrot.slane %v4124_v36, 2 }
 0x1f8   : > { %v4105_v16 = vrot.slane %v4104_v35, 1  ;;  %v4126_v32 = vadd.f32 %v4125_v38, %v4124_v36 }
 0x1fa   : > { %v4106_v39 = vadd.f32 %v4105_v16, %v4104_v35  ;;  %v4127_v31 = vrot.slane %v4126_v32, 1 }
 0x1fc   : > { %v4107_v48 = vadd.f32 %v4106_v39, %v6606_v11  ;;  %v4128_v44 = vadd.f32 %v4127_v31, %v4126_v32 }
 0x1fe   : > { %v4129_v62 = vadd.f32 %v4128_v44, %v6609_v15  ;;  %4130 = vst [vmem:[%s211_s28] sm:$0x1] %v4107_v48 }
 0x200   : > { %4131 = vst [vmem:[%s214_s5] sm:$0x1] %v4129_v62 }
 0x201 PF: > { %s15_s15 = sadd.s32 1, %s5702_s15  }
 0x202   : > { %p12_p4 = scmp.ge.s32.totalorder %s15_s15, 4  }
 0x204   :  { %14 = sbr.rel (!%p12_p4) target bundleno = 1 (0x1), region = 102 }

</bundles_post_ra>
